<compile_context>
chip_gen: v6e
topology: v6e:2x2x1
jax: 0.10.0
libtpu: 0.0.40
codegen_flags: <defaults>
</compile_context>

<pallas_src>
import numpy as np
import jax
import jax.numpy as jnp
from jax import lax
from jax.experimental import pallas as pl
from jax.experimental.pallas import tpu as pltpu

# ---------------- configuration (small, consistent with CBAM defaults) ------
B = 2            # batch
C = 32           # channels (c1 == c2); must be >= ratio
RATIO = 16       # ChannelAttention ratio
CR = C // RATIO  # hidden channels of the channel-attention MLP (= 2)
H = W = 16       # spatial size
KSZ = 7          # SpatialAttention kernel size
PAD = KSZ // 2   # = 3


# ---------------- fused CBAM kernel ----------------
def _cbam_kernel(x_ref, w1_ref, w2_ref, wsp_ref, o_ref,
                 pad_a_ref, pad_m_ref, sa_ref):
    # x_ref:   (1, C, H*W) VMEM block (one image, NCHW with spatial flattened)
    # w1_ref:  (C, CR) VMEM  -- ChannelAttention.f1 weight, stored transposed (C -> CR)
    # w2_ref:  (C, CR) VMEM  -- ChannelAttention.f2 weight (C, CR)
    # wsp_ref: (KSZ*KSZ*2,) SMEM -- SpatialAttention 7x7 taps, [kh][kw][avg,max]
    # o_ref:   (1, C, H*W) VMEM block
    # pad_*:   (H+2*PAD, W+2*PAD) VMEM scratch (zero-padded 2-D stat maps)
    # sa_ref:  (1, H*W) VMEM scratch (flat spatial-attention map)
    _, c, hw = x_ref.shape
    cr = w1_ref.shape[1]
    hp, wp = pad_a_ref.shape
    h = hp - 2 * PAD
    w = wp - 2 * PAD

    xb = x_ref[0]                                            # (C, H*W), lane-dense

    # ---------------- channel attention ----------------
    # adaptive avg/max pool over H*W: one lane reduction per statistic.
    avg_c = jnp.sum(xb, axis=1, keepdims=True) * (1.0 / float(hw))   # (C, 1)
    max_c = jnp.max(xb, axis=1, keepdims=True)                        # (C, 1)

    # Shared MLP, unrolled over the tiny hidden dim (CR = C // ratio = 2).
    # f2 is linear, so f2(relu(f1(avg))) + f2(relu(f1(max))) collapses into a
    # single f2 accumulation over relu(h_avg_j) + relu(h_max_j).
    ca_logit = jnp.zeros((c, 1), jnp.float32)
    for j in range(cr):
        w1j = w1_ref[:, j:j + 1]                                            # (C, 1)
        h_avg = jnp.maximum(jnp.sum(w1j * avg_c, axis=0, keepdims=True), 0.0)  # (1, 1)
        h_max = jnp.maximum(jnp.sum(w1j * max_c, axis=0, keepdims=True), 0.0)  # (1, 1)
        ca_logit = ca_logit + w2_ref[:, j:j + 1] * (h_avg + h_max)             # (C, 1)
    ca = jax.nn.sigmoid(ca_logit)                                              # (C, 1)

    out1 = xb * ca                                           # (C, H*W), lane broadcast of ca

    # ---------------- spatial attention ----------------
    # channel-wise mean / max: sublane reductions, flat (1, H*W) results.
    avg_f = jnp.sum(out1, axis=0, keepdims=True) * (1.0 / float(c))   # (1, H*W)
    max_f = jnp.max(out1, axis=0, keepdims=True)                      # (1, H*W)

    # zero-padded 2-D stat maps (W on lanes).  Zeroing is a handful of vreg
    # stores at this layout and keeps correctness independent of which core
    # ran grid step 0, so do it every step.
    pad_a_ref[...] = jnp.zeros_like(pad_a_ref)
    pad_m_ref[...] = jnp.zeros_like(pad_m_ref)
    for r in range(h):
        pad_a_ref[PAD + r:PAD + r + 1, PAD:PAD + w] = avg_f[:, r * w:(r + 1) * w]
        pad_m_ref[PAD + r:PAD + r + 1, PAD:PAD + w] = max_f[:, r * w:(r + 1) * w]

    # 7x7 conv (cross-correlation, like nn.Conv2d): 7 per-kh padded-row loads,
    # then static lane slices per kw; taps are SMEM scalars.
    acc = jnp.zeros((h, w), jnp.float32)
    for kh in range(KSZ):
        rows_a = pad_a_ref[kh:kh + h, :]                     # (H, W + 2*PAD)
        rows_m = pad_m_ref[kh:kh + h, :]
        for kw in range(KSZ):
            base = (kh * KSZ + kw) * 2
            acc = acc + wsp_ref[base + 0] * rows_a[:, kw:kw + w]
            acc = acc + wsp_ref[base + 1] * rows_m[:, kw:kw + w]
    sa2d = jax.nn.sigmoid(acc)                               # (H, W)

    # flatten the spatial map back to (1, H*W) via the scratch ref so the final
    # multiply and output store stay one lane-dense (C, H*W) operation.
    for r in range(h):
        sa_ref[0:1, r * w:(r + 1) * w] = sa2d[r:r + 1, :]

    o_ref[0] = out1 * sa_ref[...]                            # (C, H*W)


@jax.jit
def cbam_forward(x_nchw, params):
    """x_nchw: float32 (B, C, H, W) -> CBAM output (B, C, H, W)."""
    w1_t, w2_t, wsp = params
    b, c, h, w = x_nchw.shape
    x = x_nchw.reshape(b, c, h * w)                          # free view, stays NCHW
    wsp_flat = wsp.reshape(-1)                               # (KSZ*KSZ*2,)

    out = pl.pallas_call(
        _cbam_kernel,
        out_shape=jax.ShapeDtypeStruct((b, c, h * w), jnp.float32),
        grid=(b,),                                           # exact grid, no remainder
        in_specs=[
            pl.BlockSpec((1, c, h * w), lambda i: (i, 0, 0)),
            pl.BlockSpec((c, w1_t.shape[1]), lambda i: (0, 0)),   # resident
            pl.BlockSpec((c, w2_t.shape[1]), lambda i: (0, 0)),   # resident
            pl.BlockSpec(memory_space=pltpu.MemorySpace.SMEM),    # 7x7 taps as scalars
        ],
        out_specs=pl.BlockSpec((1, c, h * w), lambda i: (i, 0, 0)),
        scratch_shapes=[
            pltpu.VMEM((h + 2 * PAD, w + 2 * PAD), jnp.float32),
            pltpu.VMEM((h + 2 * PAD, w + 2 * PAD), jnp.float32),
            pltpu.VMEM((1, h * w), jnp.float32),
        ],
        compiler_params=pltpu.CompilerParams(
            dimension_semantics=("parallel",)),
    )(x, w1_t, w2_t, wsp_flat)

    return out.reshape(b, c, h, w)


# ---------------- parameter init (deterministic, synthetic) ----------------
def init_params(key):
    k1, k2, k3 = jax.random.split(key, 3)
    # ChannelAttention.f1: 1x1 conv C -> CR, no bias -> stored transposed (C, CR)
    w1_t = jax.random.normal(k1, (C, CR), jnp.float32) * 0.2
    # ChannelAttention.f2: 1x1 conv CR -> C, no bias -> weight (C, CR)
    w2_t = jax.random.normal(k2, (C, CR), jnp.float32) * 0.2
    # SpatialAttention.conv: 7x7, inputs = [avg, max], no bias -> (KSZ, KSZ, 2)
    wsp = jax.random.normal(k3, (KSZ, KSZ, 2), jnp.float32) * 0.2
    return w1_t, w2_t, wsp


# ---------------- pure-JAX reference for verification ----------------
def reference_forward(x_nchw, params):
    w1_t, w2_t, wsp = params
    x = jnp.transpose(x_nchw, (0, 2, 3, 1))                  # NHWC (reference only)
    avg_c = jnp.mean(x, axis=(1, 2))                         # (B, C)
    max_c = jnp.max(x, axis=(1, 2))                          # (B, C)

    def mlp(p):
        hid = jnp.maximum(jnp.dot(p, w1_t, precision=lax.Precision.HIGHEST), 0.0)
        return jnp.dot(hid, w2_t.T, precision=lax.Precision.HIGHEST)

    ca = jax.nn.sigmoid(mlp(avg_c) + mlp(max_c))             # (B, C)
    out1 = x * ca[:, None, None, :]

    avg_s = jnp.mean(out1, axis=-1, keepdims=True)
    max_s = jnp.max(out1, axis=-1, keepdims=True)
    stats = jnp.concatenate([avg_s, max_s], axis=-1)         # (B, H, W, 2)
    sa = jax.nn.sigmoid(lax.conv_general_dilated(
        stats, wsp[..., None], (1, 1), "SAME",
        dimension_numbers=("NHWC", "HWIO", "NHWC"),
        precision=lax.Precision.HIGHEST))                    # (B, H, W, 1)
    out = out1 * sa
    return jnp.transpose(out, (0, 3, 1, 2))                  # NCHW


if __name__ == "__main__":
    key = jax.random.PRNGKey(0)
    kp, kx = jax.random.split(key)
    params = init_params(kp)
    x = jax.random.normal(kx, (B, C, H, W), jnp.float32)

    out = jax.block_until_ready(cbam_forward(x, params))
    ref = jax.block_until_ready(reference_forward(x, params))

    assert out.shape == (B, C, H, W), out.shape
    np.testing.assert_allclose(np.asarray(out), np.asarray(ref), rtol=5e-4, atol=5e-5)

    print("KERNEL_OK")
</pallas_src>

<mosaic_0001>
module attributes {stable_mosaic.version = 11 : i64} {
  func.func @_cbam_kernel(%arg0: i32, %arg1: memref<1x32x256xf32, #tpu.memory_space<vmem>>, %arg2: memref<32x2xf32, #tpu.memory_space<vmem>>, %arg3: memref<32x2xf32, #tpu.memory_space<vmem>>, %arg4: memref<98xf32, #tpu.memory_space<smem>>, %arg5: memref<1x32x256xf32, #tpu.memory_space<vmem>>, %arg6: memref<22x22xf32, #tpu.memory_space<vmem>>, %arg7: memref<22x22xf32, #tpu.memory_space<vmem>>, %arg8: memref<1x256xf32, #tpu.memory_space<vmem>>) attributes {dimension_semantics = [#tpu.dimension_semantics<parallel>], iteration_bounds = array<i64: 2>, scalar_prefetch = 0 : i64, scratch_operands = 3 : i64, tpu.core_type = #tpu.core_type<tc>, window_params = [{transform_indices = @transform_0, window_bounds = array<i64: 1, 32, 256>}, {pipeline_mode = #tpu.pipeline_mode<synchronous>, transform_indices = @transform_1, window_bounds = array<i64: 32, 2>}, {pipeline_mode = #tpu.pipeline_mode<synchronous>, transform_indices = @transform_2, window_bounds = array<i64: 32, 2>}, {transform_indices = @transform_3, window_bounds = array<i64: 98>}, {transform_indices = @transform_4, window_bounds = array<i64: 1, 32, 256>}]} {
    %c0 = arith.constant 0 : index
    %c0_0 = arith.constant 0 : index
    %c0_1 = arith.constant 0 : index
    %0 = vector.load %arg1[%c0, %c0_0, %c0_1] : memref<1x32x256xf32, #tpu.memory_space<vmem>>, vector<1x32x256xf32>
    %1 = vector.shape_cast %0 : vector<1x32x256xf32> to vector<32x256xf32>
    %cst = arith.constant dense<0.000000e+00> : vector<32xf32>
    %2 = vector.multi_reduction <add>, %1, %cst [1] : vector<32x256xf32> to vector<32xf32>
    %3 = vector.shape_cast %2 : vector<32xf32> to vector<32x1xf32>
    %cst_2 = arith.constant 3.906250e-03 : f32
    %4 = vector.broadcast %cst_2 : f32 to vector<32x1xf32>
    %5 = arith.mulf %3, %4 : vector<32x1xf32>
    %cst_3 = arith.constant dense<0xFF800000> : vector<32xf32>
    %6 = vector.multi_reduction <maximumf>, %1, %cst_3 [1] : vector<32x256xf32> to vector<32xf32>
    %7 = vector.shape_cast %6 : vector<32xf32> to vector<32x1xf32>
    %cst_4 = arith.constant 0.000000e+00 : f32
    %8 = vector.broadcast %cst_4 : f32 to vector<32x1xf32>
    %c0_5 = arith.constant 0 : index
    %c0_6 = arith.constant 0 : index
    %9 = vector.load %arg2[%c0_5, %c0_6] : memref<32x2xf32, #tpu.memory_space<vmem>>, vector<32x1xf32>
    %10 = arith.mulf %9, %5 : vector<32x1xf32>
    %cst_7 = arith.constant dense<0.000000e+00> : vector<1xf32>
    %11 = vector.multi_reduction <add>, %10, %cst_7 [0] : vector<32x1xf32> to vector<1xf32>
    %12 = vector.shape_cast %11 : vector<1xf32> to vector<1x1xf32>
    %cst_8 = arith.constant 0.000000e+00 : f32
    %13 = vector.broadcast %cst_8 : f32 to vector<1x1xf32>
    %14 = arith.maximumf %12, %13 : vector<1x1xf32>
    %15 = arith.mulf %9, %7 : vector<32x1xf32>
    %cst_9 = arith.constant dense<0.000000e+00> : vector<1xf32>
    %16 = vector.multi_reduction <add>, %15, %cst_9 [0] : vector<32x1xf32> to vector<1xf32>
    %17 = vector.shape_cast %16 : vector<1xf32> to vector<1x1xf32>
    %cst_10 = arith.constant 0.000000e+00 : f32
    %18 = vector.broadcast %cst_10 : f32 to vector<1x1xf32>
    %19 = arith.maximumf %17, %18 : vector<1x1xf32>
    %c0_11 = arith.constant 0 : index
    %c0_12 = arith.constant 0 : index
    %20 = vector.load %arg3[%c0_11, %c0_12] : memref<32x2xf32, #tpu.memory_space<vmem>>, vector<32x1xf32>
    %21 = arith.addf %14, %19 : vector<1x1xf32>
    %22 = vector.broadcast %21 : vector<1x1xf32> to vector<32x1xf32>
    %23 = arith.mulf %20, %22 : vector<32x1xf32>
    %24 = arith.addf %8, %23 : vector<32x1xf32>
    %c0_13 = arith.constant 0 : index
    %c1 = arith.constant 1 : index
    %25 = vector.load %arg2[%c0_13, %c1] : memref<32x2xf32, #tpu.memory_space<vmem>>, vector<32x1xf32>
    %26 = arith.mulf %25, %5 : vector<32x1xf32>
    %cst_14 = arith.constant dense<0.000000e+00> : vector<1xf32>
    %27 = vector.multi_reduction <add>, %26, %cst_14 [0] : vector<32x1xf32> to vector<1xf32>
    %28 = vector.shape_cast %27 : vector<1xf32> to vector<1x1xf32>
    %cst_15 = arith.constant 0.000000e+00 : f32
    %29 = vector.broadcast %cst_15 : f32 to vector<1x1xf32>
    %30 = arith.maximumf %28, %29 : vector<1x1xf32>
    %31 = arith.mulf %25, %7 : vector<32x1xf32>
    %cst_16 = arith.constant dense<0.000000e+00> : vector<1xf32>
    %32 = vector.multi_reduction <add>, %31, %cst_16 [0] : vector<32x1xf32> to vector<1xf32>
    %33 = vector.shape_cast %32 : vector<1xf32> to vector<1x1xf32>
    %cst_17 = arith.constant 0.000000e+00 : f32
    %34 = vector.broadcast %cst_17 : f32 to vector<1x1xf32>
    %35 = arith.maximumf %33, %34 : vector<1x1xf32>
    %c0_18 = arith.constant 0 : index
    %c1_19 = arith.constant 1 : index
    %36 = vector.load %arg3[%c0_18, %c1_19] : memref<32x2xf32, #tpu.memory_space<vmem>>, vector<32x1xf32>
    %37 = arith.addf %30, %35 : vector<1x1xf32>
    %38 = vector.broadcast %37 : vector<1x1xf32> to vector<32x1xf32>
    %39 = arith.mulf %36, %38 : vector<32x1xf32>
    %40 = arith.addf %24, %39 : vector<32x1xf32>
    %41 = arith.negf %40 : vector<32x1xf32>
    %42 = math.exp %41 : vector<32x1xf32>
    %cst_20 = arith.constant 1.000000e+00 : f32
    %43 = vector.broadcast %cst_20 : f32 to vector<32x1xf32>
    %44 = arith.addf %43, %42 : vector<32x1xf32>
    %45 = arith.divf %43, %44 : vector<32x1xf32>
    %46 = vector.broadcast %45 : vector<32x1xf32> to vector<32x256xf32>
    %47 = arith.mulf %1, %46 : vector<32x256xf32>
    %cst_21 = arith.constant dense<0.000000e+00> : vector<256xf32>
    %48 = vector.multi_reduction <add>, %47, %cst_21 [0] : vector<32x256xf32> to vector<256xf32>
    %49 = vector.shape_cast %48 : vector<256xf32> to vector<1x256xf32>
    %cst_22 = arith.constant 3.125000e-02 : f32
    %50 = vector.broadcast %cst_22 : f32 to vector<1x256xf32>
    %51 = arith.mulf %49, %50 : vector<1x256xf32>
    %cst_23 = arith.constant dense<0xFF800000> : vector<256xf32>
    %52 = vector.multi_reduction <maximumf>, %47, %cst_23 [0] : vector<32x256xf32> to vector<256xf32>
    %53 = vector.shape_cast %52 : vector<256xf32> to vector<1x256xf32>
    %cst_24 = arith.constant 0.000000e+00 : f32
    %54 = vector.broadcast %cst_24 : f32 to vector<22x22xf32>
    %c0_25 = arith.constant 0 : index
    %c0_26 = arith.constant 0 : index
    %55 = vector.load %arg6[%c0_25, %c0_26] : memref<22x22xf32, #tpu.memory_space<vmem>>, vector<22x22xf32>
    tpu.vector_store %arg6[%c0_25, %c0_26], %54 {strides = array<i32>} : memref<22x22xf32, #tpu.memory_space<vmem>>, vector<22x22xf32>,
    %cst_27 = arith.constant 0.000000e+00 : f32
    %56 = vector.broadcast %cst_27 : f32 to vector<22x22xf32>
    %c0_28 = arith.constant 0 : index
    %c0_29 = arith.constant 0 : index
    %57 = vector.load %arg7[%c0_28, %c0_29] : memref<22x22xf32, #tpu.memory_space<vmem>>, vector<22x22xf32>
    tpu.vector_store %arg7[%c0_28, %c0_29], %56 {strides = array<i32>} : memref<22x22xf32, #tpu.memory_space<vmem>>, vector<22x22xf32>,
    %58 = vector.extract_strided_slice %51 {offsets = [0, 0], sizes = [1, 16], strides = [1, 1]} : vector<1x256xf32> to vector<1x16xf32>
    %c3 = arith.constant 3 : index
    %c3_30 = arith.constant 3 : index
    %59 = vector.load %arg6[%c3, %c3_30] : memref<22x22xf32, #tpu.memory_space<vmem>>, vector<1x16xf32>
    tpu.vector_store %arg6[%c3, %c3_30], %58 {strides = array<i32>} : memref<22x22xf32, #tpu.memory_space<vmem>>, vector<1x16xf32>,
    %60 = vector.extract_strided_slice %53 {offsets = [0, 0], sizes = [1, 16], strides = [1, 1]} : vector<1x256xf32> to vector<1x16xf32>
    %c3_31 = arith.constant 3 : index
    %c3_32 = arith.constant 3 : index
    %61 = vector.load %arg7[%c3_31, %c3_32] : memref<22x22xf32, #tpu.memory_space<vmem>>, vector<1x16xf32>
    tpu.vector_store %arg7[%c3_31, %c3_32], %60 {strides = array<i32>} : memref<22x22xf32, #tpu.memory_space<vmem>>, vector<1x16xf32>,
    %62 = vector.extract_strided_slice %51 {offsets = [0, 16], sizes = [1, 16], strides = [1, 1]} : vector<1x256xf32> to vector<1x16xf32>
    %c4 = arith.constant 4 : index
    %c3_33 = arith.constant 3 : index
    %63 = vector.load %arg6[%c4, %c3_33] : memref<22x22xf32, #tpu.memory_space<vmem>>, vector<1x16xf32>
    tpu.vector_store %arg6[%c4, %c3_33], %62 {strides = array<i32>} : memref<22x22xf32, #tpu.memory_space<vmem>>, vector<1x16xf32>,
    %64 = vector.extract_strided_slice %53 {offsets = [0, 16], sizes = [1, 16], strides = [1, 1]} : vector<1x256xf32> to vector<1x16xf32>
    %c4_34 = arith.constant 4 : index
    %c3_35 = arith.constant 3 : index
    %65 = vector.load %arg7[%c4_34, %c3_35] : memref<22x22xf32, #tpu.memory_space<vmem>>, vector<1x16xf32>
    tpu.vector_store %arg7[%c4_34, %c3_35], %64 {strides = array<i32>} : memref<22x22xf32, #tpu.memory_space<vmem>>, vector<1x16xf32>,
    %66 = vector.extract_strided_slice %51 {offsets = [0, 32], sizes = [1, 16], strides = [1, 1]} : vector<1x256xf32> to vector<1x16xf32>
    %c5 = arith.constant 5 : index
    %c3_36 = arith.constant 3 : index
    %67 = vector.load %arg6[%c5, %c3_36] : memref<22x22xf32, #tpu.memory_space<vmem>>, vector<1x16xf32>
    tpu.vector_store %arg6[%c5, %c3_36], %66 {strides = array<i32>} : memref<22x22xf32, #tpu.memory_space<vmem>>, vector<1x16xf32>,
    %68 = vector.extract_strided_slice %53 {offsets = [0, 32], sizes = [1, 16], strides = [1, 1]} : vector<1x256xf32> to vector<1x16xf32>
    %c5_37 = arith.constant 5 : index
    %c3_38 = arith.constant 3 : index
    %69 = vector.load %arg7[%c5_37, %c3_38] : memref<22x22xf32, #tpu.memory_space<vmem>>, vector<1x16xf32>
    tpu.vector_store %arg7[%c5_37, %c3_38], %68 {strides = array<i32>} : memref<22x22xf32, #tpu.memory_space<vmem>>, vector<1x16xf32>,
    %70 = vector.extract_strided_slice %51 {offsets = [0, 48], sizes = [1, 16], strides = [1, 1]} : vector<1x256xf32> to vector<1x16xf32>
    %c6 = arith.constant 6 : index
    %c3_39 = arith.constant 3 : index
    %71 = vector.load %arg6[%c6, %c3_39] : memref<22x22xf32, #tpu.memory_space<vmem>>, vector<1x16xf32>
    tpu.vector_store %arg6[%c6, %c3_39], %70 {strides = array<i32>} : memref<22x22xf32, #tpu.memory_space<vmem>>, vector<1x16xf32>,
    %72 = vector.extract_strided_slice %53 {offsets = [0, 48], sizes = [1, 16], strides = [1, 1]} : vector<1x256xf32> to vector<1x16xf32>
    %c6_40 = arith.constant 6 : index
    %c3_41 = arith.constant 3 : index
    %73 = vector.load %arg7[%c6_40, %c3_41] : memref<22x22xf32, #tpu.memory_space<vmem>>, vector<1x16xf32>
    tpu.vector_store %arg7[%c6_40, %c3_41], %72 {strides = array<i32>} : memref<22x22xf32, #tpu.memory_space<vmem>>, vector<1x16xf32>,
    %74 = vector.extract_strided_slice %51 {offsets = [0, 64], sizes = [1, 16], strides = [1, 1]} : vector<1x256xf32> to vector<1x16xf32>
    %c7 = arith.constant 7 : index
    %c3_42 = arith.constant 3 : index
    %75 = vector.load %arg6[%c7, %c3_42] : memref<22x22xf32, #tpu.memory_space<vmem>>, vector<1x16xf32>
    tpu.vector_store %arg6[%c7, %c3_42], %74 {strides = array<i32>} : memref<22x22xf32, #tpu.memory_space<vmem>>, vector<1x16xf32>,
    %76 = vector.extract_strided_slice %53 {offsets = [0, 64], sizes = [1, 16], strides = [1, 1]} : vector<1x256xf32> to vector<1x16xf32>
    %c7_43 = arith.constant 7 : index
    %c3_44 = arith.constant 3 : index
    %77 = vector.load %arg7[%c7_43, %c3_44] : memref<22x22xf32, #tpu.memory_space<vmem>>, vector<1x16xf32>
    tpu.vector_store %arg7[%c7_43, %c3_44], %76 {strides = array<i32>} : memref<22x22xf32, #tpu.memory_space<vmem>>, vector<1x16xf32>,
    %78 = vector.extract_strided_slice %51 {offsets = [0, 80], sizes = [1, 16], strides = [1, 1]} : vector<1x256xf32> to vector<1x16xf32>
    %c8 = arith.constant 8 : index
    %c3_45 = arith.constant 3 : index
    %79 = vector.load %arg6[%c8, %c3_45] : memref<22x22xf32, #tpu.memory_space<vmem>>, vector<1x16xf32>
    tpu.vector_store %arg6[%c8, %c3_45], %78 {strides = array<i32>} : memref<22x22xf32, #tpu.memory_space<vmem>>, vector<1x16xf32>,
    %80 = vector.extract_strided_slice %53 {offsets = [0, 80], sizes = [1, 16], strides = [1, 1]} : vector<1x256xf32> to vector<1x16xf32>
    %c8_46 = arith.constant 8 : index
    %c3_47 = arith.constant 3 : index
    %81 = vector.load %arg7[%c8_46, %c3_47] : memref<22x22xf32, #tpu.memory_space<vmem>>, vector<1x16xf32>
    tpu.vector_store %arg7[%c8_46, %c3_47], %80 {strides = array<i32>} : memref<22x22xf32, #tpu.memory_space<vmem>>, vector<1x16xf32>,
    %82 = vector.extract_strided_slice %51 {offsets = [0, 96], sizes = [1, 16], strides = [1, 1]} : vector<1x256xf32> to vector<1x16xf32>
    %c9 = arith.constant 9 : index
    %c3_48 = arith.constant 3 : index
    %83 = vector.load %arg6[%c9, %c3_48] : memref<22x22xf32, #tpu.memory_space<vmem>>, vector<1x16xf32>
    tpu.vector_store %arg6[%c9, %c3_48], %82 {strides = array<i32>} : memref<22x22xf32, #tpu.memory_space<vmem>>, vector<1x16xf32>,
    %84 = vector.extract_strided_slice %53 {offsets = [0, 96], sizes = [1, 16], strides = [1, 1]} : vector<1x256xf32> to vector<1x16xf32>
    %c9_49 = arith.constant 9 : index
    %c3_50 = arith.constant 3 : index
    %85 = vector.load %arg7[%c9_49, %c3_50] : memref<22x22xf32, #tpu.memory_space<vmem>>, vector<1x16xf32>
    tpu.vector_store %arg7[%c9_49, %c3_50], %84 {strides = array<i32>} : memref<22x22xf32, #tpu.memory_space<vmem>>, vector<1x16xf32>,
    %86 = vector.extract_strided_slice %51 {offsets = [0, 112], sizes = [1, 16], strides = [1, 1]} : vector<1x256xf32> to vector<1x16xf32>
    %c10 = arith.constant 10 : index
    %c3_51 = arith.constant 3 : index
    %87 = vector.load %arg6[%c10, %c3_51] : memref<22x22xf32, #tpu.memory_space<vmem>>, vector<1x16xf32>
    tpu.vector_store %arg6[%c10, %c3_51], %86 {strides = array<i32>} : memref<22x22xf32, #tpu.memory_space<vmem>>, vector<1x16xf32>,
    %88 = vector.extract_strided_slice %53 {offsets = [0, 112], sizes = [1, 16], strides = [1, 1]} : vector<1x256xf32> to vector<1x16xf32>
    %c10_52 = arith.constant 10 : index
    %c3_53 = arith.constant 3 : index
    %89 = vector.load %arg7[%c10_52, %c3_53] : memref<22x22xf32, #tpu.memory_space<vmem>>, vector<1x16xf32>
    tpu.vector_store %arg7[%c10_52, %c3_53], %88 {strides = array<i32>} : memref<22x22xf32, #tpu.memory_space<vmem>>, vector<1x16xf32>,
    %90 = vector.extract_strided_slice %51 {offsets = [0, 128], sizes = [1, 16], strides = [1, 1]} : vector<1x256xf32> to vector<1x16xf32>
    %c11 = arith.constant 11 : index
    %c3_54 = arith.constant 3 : index
    %91 = vector.load %arg6[%c11, %c3_54] : memref<22x22xf32, #tpu.memory_space<vmem>>, vector<1x16xf32>
    tpu.vector_store %arg6[%c11, %c3_54], %90 {strides = array<i32>} : memref<22x22xf32, #tpu.memory_space<vmem>>, vector<1x16xf32>,
    %92 = vector.extract_strided_slice %53 {offsets = [0, 128], sizes = [1, 16], strides = [1, 1]} : vector<1x256xf32> to vector<1x16xf32>
    %c11_55 = arith.constant 11 : index
    %c3_56 = arith.constant 3 : index
    %93 = vector.load %arg7[%c11_55, %c3_56] : memref<22x22xf32, #tpu.memory_space<vmem>>, vector<1x16xf32>
    tpu.vector_store %arg7[%c11_55, %c3_56], %92 {strides = array<i32>} : memref<22x22xf32, #tpu.memory_space<vmem>>, vector<1x16xf32>,
    %94 = vector.extract_strided_slice %51 {offsets = [0, 144], sizes = [1, 16], strides = [1, 1]} : vector<1x256xf32> to vector<1x16xf32>
    %c12 = arith.constant 12 : index
    %c3_57 = arith.constant 3 : index
    %95 = vector.load %arg6[%c12, %c3_57] : memref<22x22xf32, #tpu.memory_space<vmem>>, vector<1x16xf32>
    tpu.vector_store %arg6[%c12, %c3_57], %94 {strides = array<i32>} : memref<22x22xf32, #tpu.memory_space<vmem>>, vector<1x16xf32>,
    %96 = vector.extract_strided_slice %53 {offsets = [0, 144], sizes = [1, 16], strides = [1, 1]} : vector<1x256xf32> to vector<1x16xf32>
    %c12_58 = arith.constant 12 : index
    %c3_59 = arith.constant 3 : index
    %97 = vector.load %arg7[%c12_58, %c3_59] : memref<22x22xf32, #tpu.memory_space<vmem>>, vector<1x16xf32>
    tpu.vector_store %arg7[%c12_58, %c3_59], %96 {strides = array<i32>} : memref<22x22xf32, #tpu.memory_space<vmem>>, vector<1x16xf32>,
    %98 = vector.extract_strided_slice %51 {offsets = [0, 160], sizes = [1, 16], strides = [1, 1]} : vector<1x256xf32> to vector<1x16xf32>
    %c13 = arith.constant 13 : index
    %c3_60 = arith.constant 3 : index
    %99 = vector.load %arg6[%c13, %c3_60] : memref<22x22xf32, #tpu.memory_space<vmem>>, vector<1x16xf32>
    tpu.vector_store %arg6[%c13, %c3_60], %98 {strides = array<i32>} : memref<22x22xf32, #tpu.memory_space<vmem>>, vector<1x16xf32>,
    %100 = vector.extract_strided_slice %53 {offsets = [0, 160], sizes = [1, 16], strides = [1, 1]} : vector<1x256xf32> to vector<1x16xf32>
    %c13_61 = arith.constant 13 : index
    %c3_62 = arith.constant 3 : index
    %101 = vector.load %arg7[%c13_61, %c3_62] : memref<22x22xf32, #tpu.memory_space<vmem>>, vector<1x16xf32>
    tpu.vector_store %arg7[%c13_61, %c3_62], %100 {strides = array<i32>} : memref<22x22xf32, #tpu.memory_space<vmem>>, vector<1x16xf32>,
    %102 = vector.extract_strided_slice %51 {offsets = [0, 176], sizes = [1, 16], strides = [1, 1]} : vector<1x256xf32> to vector<1x16xf32>
    %c14 = arith.constant 14 : index
    %c3_63 = arith.constant 3 : index
    %103 = vector.load %arg6[%c14, %c3_63] : memref<22x22xf32, #tpu.memory_space<vmem>>, vector<1x16xf32>
    tpu.vector_store %arg6[%c14, %c3_63], %102 {strides = array<i32>} : memref<22x22xf32, #tpu.memory_space<vmem>>, vector<1x16xf32>,
    %104 = vector.extract_strided_slice %53 {offsets = [0, 176], sizes = [1, 16], strides = [1, 1]} : vector<1x256xf32> to vector<1x16xf32>
    %c14_64 = arith.constant 14 : index
    %c3_65 = arith.constant 3 : index
    %105 = vector.load %arg7[%c14_64, %c3_65] : memref<22x22xf32, #tpu.memory_space<vmem>>, vector<1x16xf32>
    tpu.vector_store %arg7[%c14_64, %c3_65], %104 {strides = array<i32>} : memref<22x22xf32, #tpu.memory_space<vmem>>, vector<1x16xf32>,
    %106 = vector.extract_strided_slice %51 {offsets = [0, 192], sizes = [1, 16], strides = [1, 1]} : vector<1x256xf32> to vector<1x16xf32>
    %c15 = arith.constant 15 : index
    %c3_66 = arith.constant 3 : index
    %107 = vector.load %arg6[%c15, %c3_66] : memref<22x22xf32, #tpu.memory_space<vmem>>, vector<1x16xf32>
    tpu.vector_store %arg6[%c15, %c3_66], %106 {strides = array<i32>} : memref<22x22xf32, #tpu.memory_space<vmem>>, vector<1x16xf32>,
    %108 = vector.extract_strided_slice %53 {offsets = [0, 192], sizes = [1, 16], strides = [1, 1]} : vector<1x256xf32> to vector<1x16xf32>
    %c15_67 = arith.constant 15 : index
    %c3_68 = arith.constant 3 : index
    %109 = vector.load %arg7[%c15_67, %c3_68] : memref<22x22xf32, #tpu.memory_space<vmem>>, vector<1x16xf32>
    tpu.vector_store %arg7[%c15_67, %c3_68], %108 {strides = array<i32>} : memref<22x22xf32, #tpu.memory_space<vmem>>, vector<1x16xf32>,
    %110 = vector.extract_strided_slice %51 {offsets = [0, 208], sizes = [1, 16], strides = [1, 1]} : vector<1x256xf32> to vector<1x16xf32>
    %c16 = arith.constant 16 : index
    %c3_69 = arith.constant 3 : index
    %111 = vector.load %arg6[%c16, %c3_69] : memref<22x22xf32, #tpu.memory_space<vmem>>, vector<1x16xf32>
    tpu.vector_store %arg6[%c16, %c3_69], %110 {strides = array<i32>} : memref<22x22xf32, #tpu.memory_space<vmem>>, vector<1x16xf32>,
    %112 = vector.extract_strided_slice %53 {offsets = [0, 208], sizes = [1, 16], strides = [1, 1]} : vector<1x256xf32> to vector<1x16xf32>
    %c16_70 = arith.constant 16 : index
    %c3_71 = arith.constant 3 : index
    %113 = vector.load %arg7[%c16_70, %c3_71] : memref<22x22xf32, #tpu.memory_space<vmem>>, vector<1x16xf32>
    tpu.vector_store %arg7[%c16_70, %c3_71], %112 {strides = array<i32>} : memref<22x22xf32, #tpu.memory_space<vmem>>, vector<1x16xf32>,
    %114 = vector.extract_strided_slice %51 {offsets = [0, 224], sizes = [1, 16], strides = [1, 1]} : vector<1x256xf32> to vector<1x16xf32>
    %c17 = arith.constant 17 : index
    %c3_72 = arith.constant 3 : index
    %115 = vector.load %arg6[%c17, %c3_72] : memref<22x22xf32, #tpu.memory_space<vmem>>, vector<1x16xf32>
    tpu.vector_store %arg6[%c17, %c3_72], %114 {strides = array<i32>} : memref<22x22xf32, #tpu.memory_space<vmem>>, vector<1x16xf32>,
    %116 = vector.extract_strided_slice %53 {offsets = [0, 224], sizes = [1, 16], strides = [1, 1]} : vector<1x256xf32> to vector<1x16xf32>
    %c17_73 = arith.constant 17 : index
    %c3_74 = arith.constant 3 : index
    %117 = vector.load %arg7[%c17_73, %c3_74] : memref<22x22xf32, #tpu.memory_space<vmem>>, vector<1x16xf32>
    tpu.vector_store %arg7[%c17_73, %c3_74], %116 {strides = array<i32>} : memref<22x22xf32, #tpu.memory_space<vmem>>, vector<1x16xf32>,
    %118 = vector.extract_strided_slice %51 {offsets = [0, 240], sizes = [1, 16], strides = [1, 1]} : vector<1x256xf32> to vector<1x16xf32>
    %c18 = arith.constant 18 : index
    %c3_75 = arith.constant 3 : index
    %119 = vector.load %arg6[%c18, %c3_75] : memref<22x22xf32, #tpu.memory_space<vmem>>, vector<1x16xf32>
    tpu.vector_store %arg6[%c18, %c3_75], %118 {strides = array<i32>} : memref<22x22xf32, #tpu.memory_space<vmem>>, vector<1x16xf32>,
    %120 = vector.extract_strided_slice %53 {offsets = [0, 240], sizes = [1, 16], strides = [1, 1]} : vector<1x256xf32> to vector<1x16xf32>
    %c18_76 = arith.constant 18 : index
    %c3_77 = arith.constant 3 : index
    %121 = vector.load %arg7[%c18_76, %c3_77] : memref<22x22xf32, #tpu.memory_space<vmem>>, vector<1x16xf32>
    tpu.vector_store %arg7[%c18_76, %c3_77], %120 {strides = array<i32>} : memref<22x22xf32, #tpu.memory_space<vmem>>, vector<1x16xf32>,
    %cst_78 = arith.constant 0.000000e+00 : f32
    %122 = vector.broadcast %cst_78 : f32 to vector<16x16xf32>
    %c0_79 = arith.constant 0 : index
    %c0_80 = arith.constant 0 : index
    %123 = vector.load %arg6[%c0_79, %c0_80] : memref<22x22xf32, #tpu.memory_space<vmem>>, vector<16x22xf32>
    %c0_81 = arith.constant 0 : index
    %c0_82 = arith.constant 0 : index
    %124 = vector.load %arg7[%c0_81, %c0_82] : memref<22x22xf32, #tpu.memory_space<vmem>>, vector<16x22xf32>
    %c0_83 = arith.constant 0 : index
    %125 = memref.load %arg4[%c0_83] : memref<98xf32, #tpu.memory_space<smem>>
    %126 = vector.extract_strided_slice %123 {offsets = [0, 0], sizes = [16, 16], strides = [1, 1]} : vector<16x22xf32> to vector<16x16xf32>
    %127 = vector.broadcast %125 : f32 to vector<16x16xf32>
    %128 = arith.mulf %127, %126 : vector<16x16xf32>
    %129 = arith.addf %122, %128 : vector<16x16xf32>
    %c1_84 = arith.constant 1 : index
    %130 = memref.load %arg4[%c1_84] : memref<98xf32, #tpu.memory_space<smem>>
    %131 = vector.extract_strided_slice %124 {offsets = [0, 0], sizes = [16, 16], strides = [1, 1]} : vector<16x22xf32> to vector<16x16xf32>
    %132 = vector.broadcast %130 : f32 to vector<16x16xf32>
    %133 = arith.mulf %132, %131 : vector<16x16xf32>
    %134 = arith.addf %129, %133 : vector<16x16xf32>
    %c2 = arith.constant 2 : index
    %135 = memref.load %arg4[%c2] : memref<98xf32, #tpu.memory_space<smem>>
    %136 = vector.extract_strided_slice %123 {offsets = [0, 1], sizes = [16, 16], strides = [1, 1]} : vector<16x22xf32> to vector<16x16xf32>
    %137 = vector.broadcast %135 : f32 to vector<16x16xf32>
    %138 = arith.mulf %137, %136 : vector<16x16xf32>
    %139 = arith.addf %134, %138 : vector<16x16xf32>
    %c3_85 = arith.constant 3 : index
    %140 = memref.load %arg4[%c3_85] : memref<98xf32, #tpu.memory_space<smem>>
    %141 = vector.extract_strided_slice %124 {offsets = [0, 1], sizes = [16, 16], strides = [1, 1]} : vector<16x22xf32> to vector<16x16xf32>
    %142 = vector.broadcast %140 : f32 to vector<16x16xf32>
    %143 = arith.mulf %142, %141 : vector<16x16xf32>
    %144 = arith.addf %139, %143 : vector<16x16xf32>
    %c4_86 = arith.constant 4 : index
    %145 = memref.load %arg4[%c4_86] : memref<98xf32, #tpu.memory_space<smem>>
    %146 = vector.extract_strided_slice %123 {offsets = [0, 2], sizes = [16, 16], strides = [1, 1]} : vector<16x22xf32> to vector<16x16xf32>
    %147 = vector.broadcast %145 : f32 to vector<16x16xf32>
    %148 = arith.mulf %147, %146 : vector<16x16xf32>
    %149 = arith.addf %144, %148 : vector<16x16xf32>
    %c5_87 = arith.constant 5 : index
    %150 = memref.load %arg4[%c5_87] : memref<98xf32, #tpu.memory_space<smem>>
    %151 = vector.extract_strided_slice %124 {offsets = [0, 2], sizes = [16, 16], strides = [1, 1]} : vector<16x22xf32> to vector<16x16xf32>
    %152 = vector.broadcast %150 : f32 to vector<16x16xf32>
    %153 = arith.mulf %152, %151 : vector<16x16xf32>
    %154 = arith.addf %149, %153 : vector<16x16xf32>
    %c6_88 = arith.constant 6 : index
    %155 = memref.load %arg4[%c6_88] : memref<98xf32, #tpu.memory_space<smem>>
    %156 = vector.extract_strided_slice %123 {offsets = [0, 3], sizes = [16, 16], strides = [1, 1]} : vector<16x22xf32> to vector<16x16xf32>
    %157 = vector.broadcast %155 : f32 to vector<16x16xf32>
    %158 = arith.mulf %157, %156 : vector<16x16xf32>
    %159 = arith.addf %154, %158 : vector<16x16xf32>
    %c7_89 = arith.constant 7 : index
    %160 = memref.load %arg4[%c7_89] : memref<98xf32, #tpu.memory_space<smem>>
    %161 = vector.extract_strided_slice %124 {offsets = [0, 3], sizes = [16, 16], strides = [1, 1]} : vector<16x22xf32> to vector<16x16xf32>
    %162 = vector.broadcast %160 : f32 to vector<16x16xf32>
    %163 = arith.mulf %162, %161 : vector<16x16xf32>
    %164 = arith.addf %159, %163 : vector<16x16xf32>
    %c8_90 = arith.constant 8 : index
    %165 = memref.load %arg4[%c8_90] : memref<98xf32, #tpu.memory_space<smem>>
    %166 = vector.extract_strided_slice %123 {offsets = [0, 4], sizes = [16, 16], strides = [1, 1]} : vector<16x22xf32> to vector<16x16xf32>
    %167 = vector.broadcast %165 : f32 to vector<16x16xf32>
    %168 = arith.mulf %167, %166 : vector<16x16xf32>
    %169 = arith.addf %164, %168 : vector<16x16xf32>
    %c9_91 = arith.constant 9 : index
    %170 = memref.load %arg4[%c9_91] : memref<98xf32, #tpu.memory_space<smem>>
    %171 = vector.extract_strided_slice %124 {offsets = [0, 4], sizes = [16, 16], strides = [1, 1]} : vector<16x22xf32> to vector<16x16xf32>
    %172 = vector.broadcast %170 : f32 to vector<16x16xf32>
    %173 = arith.mulf %172, %171 : vector<16x16xf32>
    %174 = arith.addf %169, %173 : vector<16x16xf32>
    %c10_92 = arith.constant 10 : index
    %175 = memref.load %arg4[%c10_92] : memref<98xf32, #tpu.memory_space<smem>>
    %176 = vector.extract_strided_slice %123 {offsets = [0, 5], sizes = [16, 16], strides = [1, 1]} : vector<16x22xf32> to vector<16x16xf32>
    %177 = vector.broadcast %175 : f32 to vector<16x16xf32>
    %178 = arith.mulf %177, %176 : vector<16x16xf32>
    %179 = arith.addf %174, %178 : vector<16x16xf32>
    %c11_93 = arith.constant 11 : index
    %180 = memref.load %arg4[%c11_93] : memref<98xf32, #tpu.memory_space<smem>>
    %181 = vector.extract_strided_slice %124 {offsets = [0, 5], sizes = [16, 16], strides = [1, 1]} : vector<16x22xf32> to vector<16x16xf32>
    %182 = vector.broadcast %180 : f32 to vector<16x16xf32>
    %183 = arith.mulf %182, %181 : vector<16x16xf32>
    %184 = arith.addf %179, %183 : vector<16x16xf32>
    %c12_94 = arith.constant 12 : index
    %185 = memref.load %arg4[%c12_94] : memref<98xf32, #tpu.memory_space<smem>>
    %186 = vector.extract_strided_slice %123 {offsets = [0, 6], sizes = [16, 16], strides = [1, 1]} : vector<16x22xf32> to vector<16x16xf32>
    %187 = vector.broadcast %185 : f32 to vector<16x16xf32>
    %188 = arith.mulf %187, %186 : vector<16x16xf32>
    %189 = arith.addf %184, %188 : vector<16x16xf32>
    %c13_95 = arith.constant 13 : index
    %190 = memref.load %arg4[%c13_95] : memref<98xf32, #tpu.memory_space<smem>>
    %191 = vector.extract_strided_slice %124 {offsets = [0, 6], sizes = [16, 16], strides = [1, 1]} : vector<16x22xf32> to vector<16x16xf32>
    %192 = vector.broadcast %190 : f32 to vector<16x16xf32>
    %193 = arith.mulf %192, %191 : vector<16x16xf32>
    %194 = arith.addf %189, %193 : vector<16x16xf32>
    %c1_96 = arith.constant 1 : index
    %c0_97 = arith.constant 0 : index
    %195 = vector.load %arg6[%c1_96, %c0_97] : memref<22x22xf32, #tpu.memory_space<vmem>>, vector<16x22xf32>
    %c1_98 = arith.constant 1 : index
    %c0_99 = arith.constant 0 : index
    %196 = vector.load %arg7[%c1_98, %c0_99] : memref<22x22xf32, #tpu.memory_space<vmem>>, vector<16x22xf32>
    %c14_100 = arith.constant 14 : index
    %197 = memref.load %arg4[%c14_100] : memref<98xf32, #tpu.memory_space<smem>>
    %198 = vector.extract_strided_slice %195 {offsets = [0, 0], sizes = [16, 16], strides = [1, 1]} : vector<16x22xf32> to vector<16x16xf32>
    %199 = vector.broadcast %197 : f32 to vector<16x16xf32>
    %200 = arith.mulf %199, %198 : vector<16x16xf32>
    %201 = arith.addf %194, %200 : vector<16x16xf32>
    %c15_101 = arith.constant 15 : index
    %202 = memref.load %arg4[%c15_101] : memref<98xf32, #tpu.memory_space<smem>>
    %203 = vector.extract_strided_slice %196 {offsets = [0, 0], sizes = [16, 16], strides = [1, 1]} : vector<16x22xf32> to vector<16x16xf32>
    %204 = vector.broadcast %202 : f32 to vector<16x16xf32>
    %205 = arith.mulf %204, %203 : vector<16x16xf32>
    %206 = arith.addf %201, %205 : vector<16x16xf32>
    %c16_102 = arith.constant 16 : index
    %207 = memref.load %arg4[%c16_102] : memref<98xf32, #tpu.memory_space<smem>>
    %208 = vector.extract_strided_slice %195 {offsets = [0, 1], sizes = [16, 16], strides = [1, 1]} : vector<16x22xf32> to vector<16x16xf32>
    %209 = vector.broadcast %207 : f32 to vector<16x16xf32>
    %210 = arith.mulf %209, %208 : vector<16x16xf32>
    %211 = arith.addf %206, %210 : vector<16x16xf32>
    %c17_103 = arith.constant 17 : index
    %212 = memref.load %arg4[%c17_103] : memref<98xf32, #tpu.memory_space<smem>>
    %213 = vector.extract_strided_slice %196 {offsets = [0, 1], sizes = [16, 16], strides = [1, 1]} : vector<16x22xf32> to vector<16x16xf32>
    %214 = vector.broadcast %212 : f32 to vector<16x16xf32>
    %215 = arith.mulf %214, %213 : vector<16x16xf32>
    %216 = arith.addf %211, %215 : vector<16x16xf32>
    %c18_104 = arith.constant 18 : index
    %217 = memref.load %arg4[%c18_104] : memref<98xf32, #tpu.memory_space<smem>>
    %218 = vector.extract_strided_slice %195 {offsets = [0, 2], sizes = [16, 16], strides = [1, 1]} : vector<16x22xf32> to vector<16x16xf32>
    %219 = vector.broadcast %217 : f32 to vector<16x16xf32>
    %220 = arith.mulf %219, %218 : vector<16x16xf32>
    %221 = arith.addf %216, %220 : vector<16x16xf32>
    %c19 = arith.constant 19 : index
    %222 = memref.load %arg4[%c19] : memref<98xf32, #tpu.memory_space<smem>>
    %223 = vector.extract_strided_slice %196 {offsets = [0, 2], sizes = [16, 16], strides = [1, 1]} : vector<16x22xf32> to vector<16x16xf32>
    %224 = vector.broadcast %222 : f32 to vector<16x16xf32>
    %225 = arith.mulf %224, %223 : vector<16x16xf32>
    %226 = arith.addf %221, %225 : vector<16x16xf32>
    %c20 = arith.constant 20 : index
    %227 = memref.load %arg4[%c20] : memref<98xf32, #tpu.memory_space<smem>>
    %228 = vector.extract_strided_slice %195 {offsets = [0, 3], sizes = [16, 16], strides = [1, 1]} : vector<16x22xf32> to vector<16x16xf32>
    %229 = vector.broadcast %227 : f32 to vector<16x16xf32>
    %230 = arith.mulf %229, %228 : vector<16x16xf32>
    %231 = arith.addf %226, %230 : vector<16x16xf32>
    %c21 = arith.constant 21 : index
    %232 = memref.load %arg4[%c21] : memref<98xf32, #tpu.memory_space<smem>>
    %233 = vector.extract_strided_slice %196 {offsets = [0, 3], sizes = [16, 16], strides = [1, 1]} : vector<16x22xf32> to vector<16x16xf32>
    %234 = vector.broadcast %232 : f32 to vector<16x16xf32>
    %235 = arith.mulf %234, %233 : vector<16x16xf32>
    %236 = arith.addf %231, %235 : vector<16x16xf32>
    %c22 = arith.constant 22 : index
    %237 = memref.load %arg4[%c22] : memref<98xf32, #tpu.memory_space<smem>>
    %238 = vector.extract_strided_slice %195 {offsets = [0, 4], sizes = [16, 16], strides = [1, 1]} : vector<16x22xf32> to vector<16x16xf32>
    %239 = vector.broadcast %237 : f32 to vector<16x16xf32>
    %240 = arith.mulf %239, %238 : vector<16x16xf32>
    %241 = arith.addf %236, %240 : vector<16x16xf32>
    %c23 = arith.constant 23 : index
    %242 = memref.load %arg4[%c23] : memref<98xf32, #tpu.memory_space<smem>>
    %243 = vector.extract_strided_slice %196 {offsets = [0, 4], sizes = [16, 16], strides = [1, 1]} : vector<16x22xf32> to vector<16x16xf32>
    %244 = vector.broadcast %242 : f32 to vector<16x16xf32>
    %245 = arith.mulf %244, %243 : vector<16x16xf32>
    %246 = arith.addf %241, %245 : vector<16x16xf32>
    %c24 = arith.constant 24 : index
    %247 = memref.load %arg4[%c24] : memref<98xf32, #tpu.memory_space<smem>>
    %248 = vector.extract_strided_slice %195 {offsets = [0, 5], sizes = [16, 16], strides = [1, 1]} : vector<16x22xf32> to vector<16x16xf32>
    %249 = vector.broadcast %247 : f32 to vector<16x16xf32>
    %250 = arith.mulf %249, %248 : vector<16x16xf32>
    %251 = arith.addf %246, %250 : vector<16x16xf32>
    %c25 = arith.constant 25 : index
    %252 = memref.load %arg4[%c25] : memref<98xf32, #tpu.memory_space<smem>>
    %253 = vector.extract_strided_slice %196 {offsets = [0, 5], sizes = [16, 16], strides = [1, 1]} : vector<16x22xf32> to vector<16x16xf32>
    %254 = vector.broadcast %252 : f32 to vector<16x16xf32>
    %255 = arith.mulf %254, %253 : vector<16x16xf32>
    %256 = arith.addf %251, %255 : vector<16x16xf32>
    %c26 = arith.constant 26 : index
    %257 = memref.load %arg4[%c26] : memref<98xf32, #tpu.memory_space<smem>>
    %258 = vector.extract_strided_slice %195 {offsets = [0, 6], sizes = [16, 16], strides = [1, 1]} : vector<16x22xf32> to vector<16x16xf32>
    %259 = vector.broadcast %257 : f32 to vector<16x16xf32>
    %260 = arith.mulf %259, %258 : vector<16x16xf32>
    %261 = arith.addf %256, %260 : vector<16x16xf32>
    %c27 = arith.constant 27 : index
    %262 = memref.load %arg4[%c27] : memref<98xf32, #tpu.memory_space<smem>>
    %263 = vector.extract_strided_slice %196 {offsets = [0, 6], sizes = [16, 16], strides = [1, 1]} : vector<16x22xf32> to vector<16x16xf32>
    %264 = vector.broadcast %262 : f32 to vector<16x16xf32>
    %265 = arith.mulf %264, %263 : vector<16x16xf32>
    %266 = arith.addf %261, %265 : vector<16x16xf32>
    %c2_105 = arith.constant 2 : index
    %c0_106 = arith.constant 0 : index
    %267 = vector.load %arg6[%c2_105, %c0_106] : memref<22x22xf32, #tpu.memory_space<vmem>>, vector<16x22xf32>
    %c2_107 = arith.constant 2 : index
    %c0_108 = arith.constant 0 : index
    %268 = vector.load %arg7[%c2_107, %c0_108] : memref<22x22xf32, #tpu.memory_space<vmem>>, vector<16x22xf32>
    %c28 = arith.constant 28 : index
    %269 = memref.load %arg4[%c28] : memref<98xf32, #tpu.memory_space<smem>>
    %270 = vector.extract_strided_slice %267 {offsets = [0, 0], sizes = [16, 16], strides = [1, 1]} : vector<16x22xf32> to vector<16x16xf32>
    %271 = vector.broadcast %269 : f32 to vector<16x16xf32>
    %272 = arith.mulf %271, %270 : vector<16x16xf32>
    %273 = arith.addf %266, %272 : vector<16x16xf32>
    %c29 = arith.constant 29 : index
    %274 = memref.load %arg4[%c29] : memref<98xf32, #tpu.memory_space<smem>>
    %275 = vector.extract_strided_slice %268 {offsets = [0, 0], sizes = [16, 16], strides = [1, 1]} : vector<16x22xf32> to vector<16x16xf32>
    %276 = vector.broadcast %274 : f32 to vector<16x16xf32>
    %277 = arith.mulf %276, %275 : vector<16x16xf32>
    %278 = arith.addf %273, %277 : vector<16x16xf32>
    %c30 = arith.constant 30 : index
    %279 = memref.load %arg4[%c30] : memref<98xf32, #tpu.memory_space<smem>>
    %280 = vector.extract_strided_slice %267 {offsets = [0, 1], sizes = [16, 16], strides = [1, 1]} : vector<16x22xf32> to vector<16x16xf32>
    %281 = vector.broadcast %279 : f32 to vector<16x16xf32>
    %282 = arith.mulf %281, %280 : vector<16x16xf32>
    %283 = arith.addf %278, %282 : vector<16x16xf32>
    %c31 = arith.constant 31 : index
    %284 = memref.load %arg4[%c31] : memref<98xf32, #tpu.memory_space<smem>>
    %285 = vector.extract_strided_slice %268 {offsets = [0, 1], sizes = [16, 16], strides = [1, 1]} : vector<16x22xf32> to vector<16x16xf32>
    %286 = vector.broadcast %284 : f32 to vector<16x16xf32>
    %287 = arith.mulf %286, %285 : vector<16x16xf32>
    %288 = arith.addf %283, %287 : vector<16x16xf32>
    %c32 = arith.constant 32 : index
    %289 = memref.load %arg4[%c32] : memref<98xf32, #tpu.memory_space<smem>>
    %290 = vector.extract_strided_slice %267 {offsets = [0, 2], sizes = [16, 16], strides = [1, 1]} : vector<16x22xf32> to vector<16x16xf32>
    %291 = vector.broadcast %289 : f32 to vector<16x16xf32>
    %292 = arith.mulf %291, %290 : vector<16x16xf32>
    %293 = arith.addf %288, %292 : vector<16x16xf32>
    %c33 = arith.constant 33 : index
    %294 = memref.load %arg4[%c33] : memref<98xf32, #tpu.memory_space<smem>>
    %295 = vector.extract_strided_slice %268 {offsets = [0, 2], sizes = [16, 16], strides = [1, 1]} : vector<16x22xf32> to vector<16x16xf32>
    %296 = vector.broadcast %294 : f32 to vector<16x16xf32>
    %297 = arith.mulf %296, %295 : vector<16x16xf32>
    %298 = arith.addf %293, %297 : vector<16x16xf32>
    %c34 = arith.constant 34 : index
    %299 = memref.load %arg4[%c34] : memref<98xf32, #tpu.memory_space<smem>>
    %300 = vector.extract_strided_slice %267 {offsets = [0, 3], sizes = [16, 16], strides = [1, 1]} : vector<16x22xf32> to vector<16x16xf32>
    %301 = vector.broadcast %299 : f32 to vector<16x16xf32>
    %302 = arith.mulf %301, %300 : vector<16x16xf32>
    %303 = arith.addf %298, %302 : vector<16x16xf32>
    %c35 = arith.constant 35 : index
    %304 = memref.load %arg4[%c35] : memref<98xf32, #tpu.memory_space<smem>>
    %305 = vector.extract_strided_slice %268 {offsets = [0, 3], sizes = [16, 16], strides = [1, 1]} : vector<16x22xf32> to vector<16x16xf32>
    %306 = vector.broadcast %304 : f32 to vector<16x16xf32>
    %307 = arith.mulf %306, %305 : vector<16x16xf32>
    %308 = arith.addf %303, %307 : vector<16x16xf32>
    %c36 = arith.constant 36 : index
    %309 = memref.load %arg4[%c36] : memref<98xf32, #tpu.memory_space<smem>>
    %310 = vector.extract_strided_slice %267 {offsets = [0, 4], sizes = [16, 16], strides = [1, 1]} : vector<16x22xf32> to vector<16x16xf32>
    %311 = vector.broadcast %309 : f32 to vector<16x16xf32>
    %312 = arith.mulf %311, %310 : vector<16x16xf32>
    %313 = arith.addf %308, %312 : vector<16x16xf32>
    %c37 = arith.constant 37 : index
    %314 = memref.load %arg4[%c37] : memref<98xf32, #tpu.memory_space<smem>>
    %315 = vector.extract_strided_slice %268 {offsets = [0, 4], sizes = [16, 16], strides = [1, 1]} : vector<16x22xf32> to vector<16x16xf32>
    %316 = vector.broadcast %314 : f32 to vector<16x16xf32>
    %317 = arith.mulf %316, %315 : vector<16x16xf32>
    %318 = arith.addf %313, %317 : vector<16x16xf32>
    %c38 = arith.constant 38 : index
    %319 = memref.load %arg4[%c38] : memref<98xf32, #tpu.memory_space<smem>>
    %320 = vector.extract_strided_slice %267 {offsets = [0, 5], sizes = [16, 16], strides = [1, 1]} : vector<16x22xf32> to vector<16x16xf32>
    %321 = vector.broadcast %319 : f32 to vector<16x16xf32>
    %322 = arith.mulf %321, %320 : vector<16x16xf32>
    %323 = arith.addf %318, %322 : vector<16x16xf32>
    %c39 = arith.constant 39 : index
    %324 = memref.load %arg4[%c39] : memref<98xf32, #tpu.memory_space<smem>>
    %325 = vector.extract_strided_slice %268 {offsets = [0, 5], sizes = [16, 16], strides = [1, 1]} : vector<16x22xf32> to vector<16x16xf32>
    %326 = vector.broadcast %324 : f32 to vector<16x16xf32>
    %327 = arith.mulf %326, %325 : vector<16x16xf32>
    %328 = arith.addf %323, %327 : vector<16x16xf32>
    %c40 = arith.constant 40 : index
    %329 = memref.load %arg4[%c40] : memref<98xf32, #tpu.memory_space<smem>>
    %330 = vector.extract_strided_slice %267 {offsets = [0, 6], sizes = [16, 16], strides = [1, 1]} : vector<16x22xf32> to vector<16x16xf32>
    %331 = vector.broadcast %329 : f32 to vector<16x16xf32>
    %332 = arith.mulf %331, %330 : vector<16x16xf32>
    %333 = arith.addf %328, %332 : vector<16x16xf32>
    %c41 = arith.constant 41 : index
    %334 = memref.load %arg4[%c41] : memref<98xf32, #tpu.memory_space<smem>>
    %335 = vector.extract_strided_slice %268 {offsets = [0, 6], sizes = [16, 16], strides = [1, 1]} : vector<16x22xf32> to vector<16x16xf32>
    %336 = vector.broadcast %334 : f32 to vector<16x16xf32>
    %337 = arith.mulf %336, %335 : vector<16x16xf32>
    %338 = arith.addf %333, %337 : vector<16x16xf32>
    %c3_109 = arith.constant 3 : index
    %c0_110 = arith.constant 0 : index
    %339 = vector.load %arg6[%c3_109, %c0_110] : memref<22x22xf32, #tpu.memory_space<vmem>>, vector<16x22xf32>
    %c3_111 = arith.constant 3 : index
    %c0_112 = arith.constant 0 : index
    %340 = vector.load %arg7[%c3_111, %c0_112] : memref<22x22xf32, #tpu.memory_space<vmem>>, vector<16x22xf32>
    %c42 = arith.constant 42 : index
    %341 = memref.load %arg4[%c42] : memref<98xf32, #tpu.memory_space<smem>>
    %342 = vector.extract_strided_slice %339 {offsets = [0, 0], sizes = [16, 16], strides = [1, 1]} : vector<16x22xf32> to vector<16x16xf32>
    %343 = vector.broadcast %341 : f32 to vector<16x16xf32>
    %344 = arith.mulf %343, %342 : vector<16x16xf32>
    %345 = arith.addf %338, %344 : vector<16x16xf32>
    %c43 = arith.constant 43 : index
    %346 = memref.load %arg4[%c43] : memref<98xf32, #tpu.memory_space<smem>>
    %347 = vector.extract_strided_slice %340 {offsets = [0, 0], sizes = [16, 16], strides = [1, 1]} : vector<16x22xf32> to vector<16x16xf32>
    %348 = vector.broadcast %346 : f32 to vector<16x16xf32>
    %349 = arith.mulf %348, %347 : vector<16x16xf32>
    %350 = arith.addf %345, %349 : vector<16x16xf32>
    %c44 = arith.constant 44 : index
    %351 = memref.load %arg4[%c44] : memref<98xf32, #tpu.memory_space<smem>>
    %352 = vector.extract_strided_slice %339 {offsets = [0, 1], sizes = [16, 16], strides = [1, 1]} : vector<16x22xf32> to vector<16x16xf32>
    %353 = vector.broadcast %351 : f32 to vector<16x16xf32>
    %354 = arith.mulf %353, %352 : vector<16x16xf32>
    %355 = arith.addf %350, %354 : vector<16x16xf32>
    %c45 = arith.constant 45 : index
    %356 = memref.load %arg4[%c45] : memref<98xf32, #tpu.memory_space<smem>>
    %357 = vector.extract_strided_slice %340 {offsets = [0, 1], sizes = [16, 16], strides = [1, 1]} : vector<16x22xf32> to vector<16x16xf32>
    %358 = vector.broadcast %356 : f32 to vector<16x16xf32>
    %359 = arith.mulf %358, %357 : vector<16x16xf32>
    %360 = arith.addf %355, %359 : vector<16x16xf32>
    %c46 = arith.constant 46 : index
    %361 = memref.load %arg4[%c46] : memref<98xf32, #tpu.memory_space<smem>>
    %362 = vector.extract_strided_slice %339 {offsets = [0, 2], sizes = [16, 16], strides = [1, 1]} : vector<16x22xf32> to vector<16x16xf32>
    %363 = vector.broadcast %361 : f32 to vector<16x16xf32>
    %364 = arith.mulf %363, %362 : vector<16x16xf32>
    %365 = arith.addf %360, %364 : vector<16x16xf32>
    %c47 = arith.constant 47 : index
    %366 = memref.load %arg4[%c47] : memref<98xf32, #tpu.memory_space<smem>>
    %367 = vector.extract_strided_slice %340 {offsets = [0, 2], sizes = [16, 16], strides = [1, 1]} : vector<16x22xf32> to vector<16x16xf32>
    %368 = vector.broadcast %366 : f32 to vector<16x16xf32>
    %369 = arith.mulf %368, %367 : vector<16x16xf32>
    %370 = arith.addf %365, %369 : vector<16x16xf32>
    %c48 = arith.constant 48 : index
    %371 = memref.load %arg4[%c48] : memref<98xf32, #tpu.memory_space<smem>>
    %372 = vector.extract_strided_slice %339 {offsets = [0, 3], sizes = [16, 16], strides = [1, 1]} : vector<16x22xf32> to vector<16x16xf32>
    %373 = vector.broadcast %371 : f32 to vector<16x16xf32>
    %374 = arith.mulf %373, %372 : vector<16x16xf32>
    %375 = arith.addf %370, %374 : vector<16x16xf32>
    %c49 = arith.constant 49 : index
    %376 = memref.load %arg4[%c49] : memref<98xf32, #tpu.memory_space<smem>>
    %377 = vector.extract_strided_slice %340 {offsets = [0, 3], sizes = [16, 16], strides = [1, 1]} : vector<16x22xf32> to vector<16x16xf32>
    %378 = vector.broadcast %376 : f32 to vector<16x16xf32>
    %379 = arith.mulf %378, %377 : vector<16x16xf32>
    %380 = arith.addf %375, %379 : vector<16x16xf32>
    %c50 = arith.constant 50 : index
    %381 = memref.load %arg4[%c50] : memref<98xf32, #tpu.memory_space<smem>>
    %382 = vector.extract_strided_slice %339 {offsets = [0, 4], sizes = [16, 16], strides = [1, 1]} : vector<16x22xf32> to vector<16x16xf32>
    %383 = vector.broadcast %381 : f32 to vector<16x16xf32>
    %384 = arith.mulf %383, %382 : vector<16x16xf32>
    %385 = arith.addf %380, %384 : vector<16x16xf32>
    %c51 = arith.constant 51 : index
    %386 = memref.load %arg4[%c51] : memref<98xf32, #tpu.memory_space<smem>>
    %387 = vector.extract_strided_slice %340 {offsets = [0, 4], sizes = [16, 16], strides = [1, 1]} : vector<16x22xf32> to vector<16x16xf32>
    %388 = vector.broadcast %386 : f32 to vector<16x16xf32>
    %389 = arith.mulf %388, %387 : vector<16x16xf32>
    %390 = arith.addf %385, %389 : vector<16x16xf32>
    %c52 = arith.constant 52 : index
    %391 = memref.load %arg4[%c52] : memref<98xf32, #tpu.memory_space<smem>>
    %392 = vector.extract_strided_slice %339 {offsets = [0, 5], sizes = [16, 16], strides = [1, 1]} : vector<16x22xf32> to vector<16x16xf32>
    %393 = vector.broadcast %391 : f32 to vector<16x16xf32>
    %394 = arith.mulf %393, %392 : vector<16x16xf32>
    %395 = arith.addf %390, %394 : vector<16x16xf32>
    %c53 = arith.constant 53 : index
    %396 = memref.load %arg4[%c53] : memref<98xf32, #tpu.memory_space<smem>>
    %397 = vector.extract_strided_slice %340 {offsets = [0, 5], sizes = [16, 16], strides = [1, 1]} : vector<16x22xf32> to vector<16x16xf32>
    %398 = vector.broadcast %396 : f32 to vector<16x16xf32>
    %399 = arith.mulf %398, %397 : vector<16x16xf32>
    %400 = arith.addf %395, %399 : vector<16x16xf32>
    %c54 = arith.constant 54 : index
    %401 = memref.load %arg4[%c54] : memref<98xf32, #tpu.memory_space<smem>>
    %402 = vector.extract_strided_slice %339 {offsets = [0, 6], sizes = [16, 16], strides = [1, 1]} : vector<16x22xf32> to vector<16x16xf32>
    %403 = vector.broadcast %401 : f32 to vector<16x16xf32>
    %404 = arith.mulf %403, %402 : vector<16x16xf32>
    %405 = arith.addf %400, %404 : vector<16x16xf32>
    %c55 = arith.constant 55 : index
    %406 = memref.load %arg4[%c55] : memref<98xf32, #tpu.memory_space<smem>>
    %407 = vector.extract_strided_slice %340 {offsets = [0, 6], sizes = [16, 16], strides = [1, 1]} : vector<16x22xf32> to vector<16x16xf32>
    %408 = vector.broadcast %406 : f32 to vector<16x16xf32>
    %409 = arith.mulf %408, %407 : vector<16x16xf32>
    %410 = arith.addf %405, %409 : vector<16x16xf32>
    %c4_113 = arith.constant 4 : index
    %c0_114 = arith.constant 0 : index
    %411 = vector.load %arg6[%c4_113, %c0_114] : memref<22x22xf32, #tpu.memory_space<vmem>>, vector<16x22xf32>
    %c4_115 = arith.constant 4 : index
    %c0_116 = arith.constant 0 : index
    %412 = vector.load %arg7[%c4_115, %c0_116] : memref<22x22xf32, #tpu.memory_space<vmem>>, vector<16x22xf32>
    %c56 = arith.constant 56 : index
    %413 = memref.load %arg4[%c56] : memref<98xf32, #tpu.memory_space<smem>>
    %414 = vector.extract_strided_slice %411 {offsets = [0, 0], sizes = [16, 16], strides = [1, 1]} : vector<16x22xf32> to vector<16x16xf32>
    %415 = vector.broadcast %413 : f32 to vector<16x16xf32>
    %416 = arith.mulf %415, %414 : vector<16x16xf32>
    %417 = arith.addf %410, %416 : vector<16x16xf32>
    %c57 = arith.constant 57 : index
    %418 = memref.load %arg4[%c57] : memref<98xf32, #tpu.memory_space<smem>>
    %419 = vector.extract_strided_slice %412 {offsets = [0, 0], sizes = [16, 16], strides = [1, 1]} : vector<16x22xf32> to vector<16x16xf32>
    %420 = vector.broadcast %418 : f32 to vector<16x16xf32>
    %421 = arith.mulf %420, %419 : vector<16x16xf32>
    %422 = arith.addf %417, %421 : vector<16x16xf32>
    %c58 = arith.constant 58 : index
    %423 = memref.load %arg4[%c58] : memref<98xf32, #tpu.memory_space<smem>>
    %424 = vector.extract_strided_slice %411 {offsets = [0, 1], sizes = [16, 16], strides = [1, 1]} : vector<16x22xf32> to vector<16x16xf32>
    %425 = vector.broadcast %423 : f32 to vector<16x16xf32>
    %426 = arith.mulf %425, %424 : vector<16x16xf32>
    %427 = arith.addf %422, %426 : vector<16x16xf32>
    %c59 = arith.constant 59 : index
    %428 = memref.load %arg4[%c59] : memref<98xf32, #tpu.memory_space<smem>>
    %429 = vector.extract_strided_slice %412 {offsets = [0, 1], sizes = [16, 16], strides = [1, 1]} : vector<16x22xf32> to vector<16x16xf32>
    %430 = vector.broadcast %428 : f32 to vector<16x16xf32>
    %431 = arith.mulf %430, %429 : vector<16x16xf32>
    %432 = arith.addf %427, %431 : vector<16x16xf32>
    %c60 = arith.constant 60 : index
    %433 = memref.load %arg4[%c60] : memref<98xf32, #tpu.memory_space<smem>>
    %434 = vector.extract_strided_slice %411 {offsets = [0, 2], sizes = [16, 16], strides = [1, 1]} : vector<16x22xf32> to vector<16x16xf32>
    %435 = vector.broadcast %433 : f32 to vector<16x16xf32>
    %436 = arith.mulf %435, %434 : vector<16x16xf32>
    %437 = arith.addf %432, %436 : vector<16x16xf32>
    %c61 = arith.constant 61 : index
    %438 = memref.load %arg4[%c61] : memref<98xf32, #tpu.memory_space<smem>>
    %439 = vector.extract_strided_slice %412 {offsets = [0, 2], sizes = [16, 16], strides = [1, 1]} : vector<16x22xf32> to vector<16x16xf32>
    %440 = vector.broadcast %438 : f32 to vector<16x16xf32>
    %441 = arith.mulf %440, %439 : vector<16x16xf32>
    %442 = arith.addf %437, %441 : vector<16x16xf32>
    %c62 = arith.constant 62 : index
    %443 = memref.load %arg4[%c62] : memref<98xf32, #tpu.memory_space<smem>>
    %444 = vector.extract_strided_slice %411 {offsets = [0, 3], sizes = [16, 16], strides = [1, 1]} : vector<16x22xf32> to vector<16x16xf32>
    %445 = vector.broadcast %443 : f32 to vector<16x16xf32>
    %446 = arith.mulf %445, %444 : vector<16x16xf32>
    %447 = arith.addf %442, %446 : vector<16x16xf32>
    %c63 = arith.constant 63 : index
    %448 = memref.load %arg4[%c63] : memref<98xf32, #tpu.memory_space<smem>>
    %449 = vector.extract_strided_slice %412 {offsets = [0, 3], sizes = [16, 16], strides = [1, 1]} : vector<16x22xf32> to vector<16x16xf32>
    %450 = vector.broadcast %448 : f32 to vector<16x16xf32>
    %451 = arith.mulf %450, %449 : vector<16x16xf32>
    %452 = arith.addf %447, %451 : vector<16x16xf32>
    %c64 = arith.constant 64 : index
    %453 = memref.load %arg4[%c64] : memref<98xf32, #tpu.memory_space<smem>>
    %454 = vector.extract_strided_slice %411 {offsets = [0, 4], sizes = [16, 16], strides = [1, 1]} : vector<16x22xf32> to vector<16x16xf32>
    %455 = vector.broadcast %453 : f32 to vector<16x16xf32>
    %456 = arith.mulf %455, %454 : vector<16x16xf32>
    %457 = arith.addf %452, %456 : vector<16x16xf32>
    %c65 = arith.constant 65 : index
    %458 = memref.load %arg4[%c65] : memref<98xf32, #tpu.memory_space<smem>>
    %459 = vector.extract_strided_slice %412 {offsets = [0, 4], sizes = [16, 16], strides = [1, 1]} : vector<16x22xf32> to vector<16x16xf32>
    %460 = vector.broadcast %458 : f32 to vector<16x16xf32>
    %461 = arith.mulf %460, %459 : vector<16x16xf32>
    %462 = arith.addf %457, %461 : vector<16x16xf32>
    %c66 = arith.constant 66 : index
    %463 = memref.load %arg4[%c66] : memref<98xf32, #tpu.memory_space<smem>>
    %464 = vector.extract_strided_slice %411 {offsets = [0, 5], sizes = [16, 16], strides = [1, 1]} : vector<16x22xf32> to vector<16x16xf32>
    %465 = vector.broadcast %463 : f32 to vector<16x16xf32>
    %466 = arith.mulf %465, %464 : vector<16x16xf32>
    %467 = arith.addf %462, %466 : vector<16x16xf32>
    %c67 = arith.constant 67 : index
    %468 = memref.load %arg4[%c67] : memref<98xf32, #tpu.memory_space<smem>>
    %469 = vector.extract_strided_slice %412 {offsets = [0, 5], sizes = [16, 16], strides = [1, 1]} : vector<16x22xf32> to vector<16x16xf32>
    %470 = vector.broadcast %468 : f32 to vector<16x16xf32>
    %471 = arith.mulf %470, %469 : vector<16x16xf32>
    %472 = arith.addf %467, %471 : vector<16x16xf32>
    %c68 = arith.constant 68 : index
    %473 = memref.load %arg4[%c68] : memref<98xf32, #tpu.memory_space<smem>>
    %474 = vector.extract_strided_slice %411 {offsets = [0, 6], sizes = [16, 16], strides = [1, 1]} : vector<16x22xf32> to vector<16x16xf32>
    %475 = vector.broadcast %473 : f32 to vector<16x16xf32>
    %476 = arith.mulf %475, %474 : vector<16x16xf32>
    %477 = arith.addf %472, %476 : vector<16x16xf32>
    %c69 = arith.constant 69 : index
    %478 = memref.load %arg4[%c69] : memref<98xf32, #tpu.memory_space<smem>>
    %479 = vector.extract_strided_slice %412 {offsets = [0, 6], sizes = [16, 16], strides = [1, 1]} : vector<16x22xf32> to vector<16x16xf32>
    %480 = vector.broadcast %478 : f32 to vector<16x16xf32>
    %481 = arith.mulf %480, %479 : vector<16x16xf32>
    %482 = arith.addf %477, %481 : vector<16x16xf32>
    %c5_117 = arith.constant 5 : index
    %c0_118 = arith.constant 0 : index
    %483 = vector.load %arg6[%c5_117, %c0_118] : memref<22x22xf32, #tpu.memory_space<vmem>>, vector<16x22xf32>
    %c5_119 = arith.constant 5 : index
    %c0_120 = arith.constant 0 : index
    %484 = vector.load %arg7[%c5_119, %c0_120] : memref<22x22xf32, #tpu.memory_space<vmem>>, vector<16x22xf32>
    %c70 = arith.constant 70 : index
    %485 = memref.load %arg4[%c70] : memref<98xf32, #tpu.memory_space<smem>>
    %486 = vector.extract_strided_slice %483 {offsets = [0, 0], sizes = [16, 16], strides = [1, 1]} : vector<16x22xf32> to vector<16x16xf32>
    %487 = vector.broadcast %485 : f32 to vector<16x16xf32>
    %488 = arith.mulf %487, %486 : vector<16x16xf32>
    %489 = arith.addf %482, %488 : vector<16x16xf32>
    %c71 = arith.constant 71 : index
    %490 = memref.load %arg4[%c71] : memref<98xf32, #tpu.memory_space<smem>>
    %491 = vector.extract_strided_slice %484 {offsets = [0, 0], sizes = [16, 16], strides = [1, 1]} : vector<16x22xf32> to vector<16x16xf32>
    %492 = vector.broadcast %490 : f32 to vector<16x16xf32>
    %493 = arith.mulf %492, %491 : vector<16x16xf32>
    %494 = arith.addf %489, %493 : vector<16x16xf32>
    %c72 = arith.constant 72 : index
    %495 = memref.load %arg4[%c72] : memref<98xf32, #tpu.memory_space<smem>>
    %496 = vector.extract_strided_slice %483 {offsets = [0, 1], sizes = [16, 16], strides = [1, 1]} : vector<16x22xf32> to vector<16x16xf32>
    %497 = vector.broadcast %495 : f32 to vector<16x16xf32>
    %498 = arith.mulf %497, %496 : vector<16x16xf32>
    %499 = arith.addf %494, %498 : vector<16x16xf32>
    %c73 = arith.constant 73 : index
    %500 = memref.load %arg4[%c73] : memref<98xf32, #tpu.memory_space<smem>>
    %501 = vector.extract_strided_slice %484 {offsets = [0, 1], sizes = [16, 16], strides = [1, 1]} : vector<16x22xf32> to vector<16x16xf32>
    %502 = vector.broadcast %500 : f32 to vector<16x16xf32>
    %503 = arith.mulf %502, %501 : vector<16x16xf32>
    %504 = arith.addf %499, %503 : vector<16x16xf32>
    %c74 = arith.constant 74 : index
    %505 = memref.load %arg4[%c74] : memref<98xf32, #tpu.memory_space<smem>>
    %506 = vector.extract_strided_slice %483 {offsets = [0, 2], sizes = [16, 16], strides = [1, 1]} : vector<16x22xf32> to vector<16x16xf32>
    %507 = vector.broadcast %505 : f32 to vector<16x16xf32>
    %508 = arith.mulf %507, %506 : vector<16x16xf32>
    %509 = arith.addf %504, %508 : vector<16x16xf32>
    %c75 = arith.constant 75 : index
    %510 = memref.load %arg4[%c75] : memref<98xf32, #tpu.memory_space<smem>>
    %511 = vector.extract_strided_slice %484 {offsets = [0, 2], sizes = [16, 16], strides = [1, 1]} : vector<16x22xf32> to vector<16x16xf32>
    %512 = vector.broadcast %510 : f32 to vector<16x16xf32>
    %513 = arith.mulf %512, %511 : vector<16x16xf32>
    %514 = arith.addf %509, %513 : vector<16x16xf32>
    %c76 = arith.constant 76 : index
    %515 = memref.load %arg4[%c76] : memref<98xf32, #tpu.memory_space<smem>>
    %516 = vector.extract_strided_slice %483 {offsets = [0, 3], sizes = [16, 16], strides = [1, 1]} : vector<16x22xf32> to vector<16x16xf32>
    %517 = vector.broadcast %515 : f32 to vector<16x16xf32>
    %518 = arith.mulf %517, %516 : vector<16x16xf32>
    %519 = arith.addf %514, %518 : vector<16x16xf32>
    %c77 = arith.constant 77 : index
    %520 = memref.load %arg4[%c77] : memref<98xf32, #tpu.memory_space<smem>>
    %521 = vector.extract_strided_slice %484 {offsets = [0, 3], sizes = [16, 16], strides = [1, 1]} : vector<16x22xf32> to vector<16x16xf32>
    %522 = vector.broadcast %520 : f32 to vector<16x16xf32>
    %523 = arith.mulf %522, %521 : vector<16x16xf32>
    %524 = arith.addf %519, %523 : vector<16x16xf32>
    %c78 = arith.constant 78 : index
    %525 = memref.load %arg4[%c78] : memref<98xf32, #tpu.memory_space<smem>>
    %526 = vector.extract_strided_slice %483 {offsets = [0, 4], sizes = [16, 16], strides = [1, 1]} : vector<16x22xf32> to vector<16x16xf32>
    %527 = vector.broadcast %525 : f32 to vector<16x16xf32>
    %528 = arith.mulf %527, %526 : vector<16x16xf32>
    %529 = arith.addf %524, %528 : vector<16x16xf32>
    %c79 = arith.constant 79 : index
    %530 = memref.load %arg4[%c79] : memref<98xf32, #tpu.memory_space<smem>>
    %531 = vector.extract_strided_slice %484 {offsets = [0, 4], sizes = [16, 16], strides = [1, 1]} : vector<16x22xf32> to vector<16x16xf32>
    %532 = vector.broadcast %530 : f32 to vector<16x16xf32>
    %533 = arith.mulf %532, %531 : vector<16x16xf32>
    %534 = arith.addf %529, %533 : vector<16x16xf32>
    %c80 = arith.constant 80 : index
    %535 = memref.load %arg4[%c80] : memref<98xf32, #tpu.memory_space<smem>>
    %536 = vector.extract_strided_slice %483 {offsets = [0, 5], sizes = [16, 16], strides = [1, 1]} : vector<16x22xf32> to vector<16x16xf32>
    %537 = vector.broadcast %535 : f32 to vector<16x16xf32>
    %538 = arith.mulf %537, %536 : vector<16x16xf32>
    %539 = arith.addf %534, %538 : vector<16x16xf32>
    %c81 = arith.constant 81 : index
    %540 = memref.load %arg4[%c81] : memref<98xf32, #tpu.memory_space<smem>>
    %541 = vector.extract_strided_slice %484 {offsets = [0, 5], sizes = [16, 16], strides = [1, 1]} : vector<16x22xf32> to vector<16x16xf32>
    %542 = vector.broadcast %540 : f32 to vector<16x16xf32>
    %543 = arith.mulf %542, %541 : vector<16x16xf32>
    %544 = arith.addf %539, %543 : vector<16x16xf32>
    %c82 = arith.constant 82 : index
    %545 = memref.load %arg4[%c82] : memref<98xf32, #tpu.memory_space<smem>>
    %546 = vector.extract_strided_slice %483 {offsets = [0, 6], sizes = [16, 16], strides = [1, 1]} : vector<16x22xf32> to vector<16x16xf32>
    %547 = vector.broadcast %545 : f32 to vector<16x16xf32>
    %548 = arith.mulf %547, %546 : vector<16x16xf32>
    %549 = arith.addf %544, %548 : vector<16x16xf32>
    %c83 = arith.constant 83 : index
    %550 = memref.load %arg4[%c83] : memref<98xf32, #tpu.memory_space<smem>>
    %551 = vector.extract_strided_slice %484 {offsets = [0, 6], sizes = [16, 16], strides = [1, 1]} : vector<16x22xf32> to vector<16x16xf32>
    %552 = vector.broadcast %550 : f32 to vector<16x16xf32>
    %553 = arith.mulf %552, %551 : vector<16x16xf32>
    %554 = arith.addf %549, %553 : vector<16x16xf32>
    %c6_121 = arith.constant 6 : index
    %c0_122 = arith.constant 0 : index
    %555 = vector.load %arg6[%c6_121, %c0_122] : memref<22x22xf32, #tpu.memory_space<vmem>>, vector<16x22xf32>
    %c6_123 = arith.constant 6 : index
    %c0_124 = arith.constant 0 : index
    %556 = vector.load %arg7[%c6_123, %c0_124] : memref<22x22xf32, #tpu.memory_space<vmem>>, vector<16x22xf32>
    %c84 = arith.constant 84 : index
    %557 = memref.load %arg4[%c84] : memref<98xf32, #tpu.memory_space<smem>>
    %558 = vector.extract_strided_slice %555 {offsets = [0, 0], sizes = [16, 16], strides = [1, 1]} : vector<16x22xf32> to vector<16x16xf32>
    %559 = vector.broadcast %557 : f32 to vector<16x16xf32>
    %560 = arith.mulf %559, %558 : vector<16x16xf32>
    %561 = arith.addf %554, %560 : vector<16x16xf32>
    %c85 = arith.constant 85 : index
    %562 = memref.load %arg4[%c85] : memref<98xf32, #tpu.memory_space<smem>>
    %563 = vector.extract_strided_slice %556 {offsets = [0, 0], sizes = [16, 16], strides = [1, 1]} : vector<16x22xf32> to vector<16x16xf32>
    %564 = vector.broadcast %562 : f32 to vector<16x16xf32>
    %565 = arith.mulf %564, %563 : vector<16x16xf32>
    %566 = arith.addf %561, %565 : vector<16x16xf32>
    %c86 = arith.constant 86 : index
    %567 = memref.load %arg4[%c86] : memref<98xf32, #tpu.memory_space<smem>>
    %568 = vector.extract_strided_slice %555 {offsets = [0, 1], sizes = [16, 16], strides = [1, 1]} : vector<16x22xf32> to vector<16x16xf32>
    %569 = vector.broadcast %567 : f32 to vector<16x16xf32>
    %570 = arith.mulf %569, %568 : vector<16x16xf32>
    %571 = arith.addf %566, %570 : vector<16x16xf32>
    %c87 = arith.constant 87 : index
    %572 = memref.load %arg4[%c87] : memref<98xf32, #tpu.memory_space<smem>>
    %573 = vector.extract_strided_slice %556 {offsets = [0, 1], sizes = [16, 16], strides = [1, 1]} : vector<16x22xf32> to vector<16x16xf32>
    %574 = vector.broadcast %572 : f32 to vector<16x16xf32>
    %575 = arith.mulf %574, %573 : vector<16x16xf32>
    %576 = arith.addf %571, %575 : vector<16x16xf32>
    %c88 = arith.constant 88 : index
    %577 = memref.load %arg4[%c88] : memref<98xf32, #tpu.memory_space<smem>>
    %578 = vector.extract_strided_slice %555 {offsets = [0, 2], sizes = [16, 16], strides = [1, 1]} : vector<16x22xf32> to vector<16x16xf32>
    %579 = vector.broadcast %577 : f32 to vector<16x16xf32>
    %580 = arith.mulf %579, %578 : vector<16x16xf32>
    %581 = arith.addf %576, %580 : vector<16x16xf32>
    %c89 = arith.constant 89 : index
    %582 = memref.load %arg4[%c89] : memref<98xf32, #tpu.memory_space<smem>>
    %583 = vector.extract_strided_slice %556 {offsets = [0, 2], sizes = [16, 16], strides = [1, 1]} : vector<16x22xf32> to vector<16x16xf32>
    %584 = vector.broadcast %582 : f32 to vector<16x16xf32>
    %585 = arith.mulf %584, %583 : vector<16x16xf32>
    %586 = arith.addf %581, %585 : vector<16x16xf32>
    %c90 = arith.constant 90 : index
    %587 = memref.load %arg4[%c90] : memref<98xf32, #tpu.memory_space<smem>>
    %588 = vector.extract_strided_slice %555 {offsets = [0, 3], sizes = [16, 16], strides = [1, 1]} : vector<16x22xf32> to vector<16x16xf32>
    %589 = vector.broadcast %587 : f32 to vector<16x16xf32>
    %590 = arith.mulf %589, %588 : vector<16x16xf32>
    %591 = arith.addf %586, %590 : vector<16x16xf32>
    %c91 = arith.constant 91 : index
    %592 = memref.load %arg4[%c91] : memref<98xf32, #tpu.memory_space<smem>>
    %593 = vector.extract_strided_slice %556 {offsets = [0, 3], sizes = [16, 16], strides = [1, 1]} : vector<16x22xf32> to vector<16x16xf32>
    %594 = vector.broadcast %592 : f32 to vector<16x16xf32>
    %595 = arith.mulf %594, %593 : vector<16x16xf32>
    %596 = arith.addf %591, %595 : vector<16x16xf32>
    %c92 = arith.constant 92 : index
    %597 = memref.load %arg4[%c92] : memref<98xf32, #tpu.memory_space<smem>>
    %598 = vector.extract_strided_slice %555 {offsets = [0, 4], sizes = [16, 16], strides = [1, 1]} : vector<16x22xf32> to vector<16x16xf32>
    %599 = vector.broadcast %597 : f32 to vector<16x16xf32>
    %600 = arith.mulf %599, %598 : vector<16x16xf32>
    %601 = arith.addf %596, %600 : vector<16x16xf32>
    %c93 = arith.constant 93 : index
    %602 = memref.load %arg4[%c93] : memref<98xf32, #tpu.memory_space<smem>>
    %603 = vector.extract_strided_slice %556 {offsets = [0, 4], sizes = [16, 16], strides = [1, 1]} : vector<16x22xf32> to vector<16x16xf32>
    %604 = vector.broadcast %602 : f32 to vector<16x16xf32>
    %605 = arith.mulf %604, %603 : vector<16x16xf32>
    %606 = arith.addf %601, %605 : vector<16x16xf32>
    %c94 = arith.constant 94 : index
    %607 = memref.load %arg4[%c94] : memref<98xf32, #tpu.memory_space<smem>>
    %608 = vector.extract_strided_slice %555 {offsets = [0, 5], sizes = [16, 16], strides = [1, 1]} : vector<16x22xf32> to vector<16x16xf32>
    %609 = vector.broadcast %607 : f32 to vector<16x16xf32>
    %610 = arith.mulf %609, %608 : vector<16x16xf32>
    %611 = arith.addf %606, %610 : vector<16x16xf32>
    %c95 = arith.constant 95 : index
    %612 = memref.load %arg4[%c95] : memref<98xf32, #tpu.memory_space<smem>>
    %613 = vector.extract_strided_slice %556 {offsets = [0, 5], sizes = [16, 16], strides = [1, 1]} : vector<16x22xf32> to vector<16x16xf32>
    %614 = vector.broadcast %612 : f32 to vector<16x16xf32>
    %615 = arith.mulf %614, %613 : vector<16x16xf32>
    %616 = arith.addf %611, %615 : vector<16x16xf32>
    %c96 = arith.constant 96 : index
    %617 = memref.load %arg4[%c96] : memref<98xf32, #tpu.memory_space<smem>>
    %618 = vector.extract_strided_slice %555 {offsets = [0, 6], sizes = [16, 16], strides = [1, 1]} : vector<16x22xf32> to vector<16x16xf32>
    %619 = vector.broadcast %617 : f32 to vector<16x16xf32>
    %620 = arith.mulf %619, %618 : vector<16x16xf32>
    %621 = arith.addf %616, %620 : vector<16x16xf32>
    %c97 = arith.constant 97 : index
    %622 = memref.load %arg4[%c97] : memref<98xf32, #tpu.memory_space<smem>>
    %623 = vector.extract_strided_slice %556 {offsets = [0, 6], sizes = [16, 16], strides = [1, 1]} : vector<16x22xf32> to vector<16x16xf32>
    %624 = vector.broadcast %622 : f32 to vector<16x16xf32>
    %625 = arith.mulf %624, %623 : vector<16x16xf32>
    %626 = arith.addf %621, %625 : vector<16x16xf32>
    %627 = arith.negf %626 : vector<16x16xf32>
    %628 = math.exp %627 : vector<16x16xf32>
    %cst_125 = arith.constant 1.000000e+00 : f32
    %629 = vector.broadcast %cst_125 : f32 to vector<16x16xf32>
    %630 = arith.addf %629, %628 : vector<16x16xf32>
    %631 = arith.divf %629, %630 : vector<16x16xf32>
    %632 = vector.extract_strided_slice %631 {offsets = [0, 0], sizes = [1, 16], strides = [1, 1]} : vector<16x16xf32> to vector<1x16xf32>
    %c0_126 = arith.constant 0 : index
    %c0_127 = arith.constant 0 : index
    %633 = vector.load %arg8[%c0_126, %c0_127] : memref<1x256xf32, #tpu.memory_space<vmem>>, vector<1x16xf32>
    tpu.vector_store %arg8[%c0_126, %c0_127], %632 {strides = array<i32>} : memref<1x256xf32, #tpu.memory_space<vmem>>, vector<1x16xf32>,
    %634 = vector.extract_strided_slice %631 {offsets = [1, 0], sizes = [1, 16], strides = [1, 1]} : vector<16x16xf32> to vector<1x16xf32>
    %c0_128 = arith.constant 0 : index
    %c16_129 = arith.constant 16 : index
    %635 = vector.load %arg8[%c0_128, %c16_129] : memref<1x256xf32, #tpu.memory_space<vmem>>, vector<1x16xf32>
    tpu.vector_store %arg8[%c0_128, %c16_129], %634 {strides = array<i32>} : memref<1x256xf32, #tpu.memory_space<vmem>>, vector<1x16xf32>,
    %636 = vector.extract_strided_slice %631 {offsets = [2, 0], sizes = [1, 16], strides = [1, 1]} : vector<16x16xf32> to vector<1x16xf32>
    %c0_130 = arith.constant 0 : index
    %c32_131 = arith.constant 32 : index
    %637 = vector.load %arg8[%c0_130, %c32_131] : memref<1x256xf32, #tpu.memory_space<vmem>>, vector<1x16xf32>
    tpu.vector_store %arg8[%c0_130, %c32_131], %636 {strides = array<i32>} : memref<1x256xf32, #tpu.memory_space<vmem>>, vector<1x16xf32>,
    %638 = vector.extract_strided_slice %631 {offsets = [3, 0], sizes = [1, 16], strides = [1, 1]} : vector<16x16xf32> to vector<1x16xf32>
    %c0_132 = arith.constant 0 : index
    %c48_133 = arith.constant 48 : index
    %639 = vector.load %arg8[%c0_132, %c48_133] : memref<1x256xf32, #tpu.memory_space<vmem>>, vector<1x16xf32>
    tpu.vector_store %arg8[%c0_132, %c48_133], %638 {strides = array<i32>} : memref<1x256xf32, #tpu.memory_space<vmem>>, vector<1x16xf32>,
    %640 = vector.extract_strided_slice %631 {offsets = [4, 0], sizes = [1, 16], strides = [1, 1]} : vector<16x16xf32> to vector<1x16xf32>
    %c0_134 = arith.constant 0 : index
    %c64_135 = arith.constant 64 : index
    %641 = vector.load %arg8[%c0_134, %c64_135] : memref<1x256xf32, #tpu.memory_space<vmem>>, vector<1x16xf32>
    tpu.vector_store %arg8[%c0_134, %c64_135], %640 {strides = array<i32>} : memref<1x256xf32, #tpu.memory_space<vmem>>, vector<1x16xf32>,
    %642 = vector.extract_strided_slice %631 {offsets = [5, 0], sizes = [1, 16], strides = [1, 1]} : vector<16x16xf32> to vector<1x16xf32>
    %c0_136 = arith.constant 0 : index
    %c80_137 = arith.constant 80 : index
    %643 = vector.load %arg8[%c0_136, %c80_137] : memref<1x256xf32, #tpu.memory_space<vmem>>, vector<1x16xf32>
    tpu.vector_store %arg8[%c0_136, %c80_137], %642 {strides = array<i32>} : memref<1x256xf32, #tpu.memory_space<vmem>>, vector<1x16xf32>,
    %644 = vector.extract_strided_slice %631 {offsets = [6, 0], sizes = [1, 16], strides = [1, 1]} : vector<16x16xf32> to vector<1x16xf32>
    %c0_138 = arith.constant 0 : index
    %c96_139 = arith.constant 96 : index
    %645 = vector.load %arg8[%c0_138, %c96_139] : memref<1x256xf32, #tpu.memory_space<vmem>>, vector<1x16xf32>
    tpu.vector_store %arg8[%c0_138, %c96_139], %644 {strides = array<i32>} : memref<1x256xf32, #tpu.memory_space<vmem>>, vector<1x16xf32>,
    %646 = vector.extract_strided_slice %631 {offsets = [7, 0], sizes = [1, 16], strides = [1, 1]} : vector<16x16xf32> to vector<1x16xf32>
    %c0_140 = arith.constant 0 : index
    %c112 = arith.constant 112 : index
    %647 = vector.load %arg8[%c0_140, %c112] : memref<1x256xf32, #tpu.memory_space<vmem>>, vector<1x16xf32>
    tpu.vector_store %arg8[%c0_140, %c112], %646 {strides = array<i32>} : memref<1x256xf32, #tpu.memory_space<vmem>>, vector<1x16xf32>,
    %648 = vector.extract_strided_slice %631 {offsets = [8, 0], sizes = [1, 16], strides = [1, 1]} : vector<16x16xf32> to vector<1x16xf32>
    %c0_141 = arith.constant 0 : index
    %c128 = arith.constant 128 : index
    %649 = vector.load %arg8[%c0_141, %c128] : memref<1x256xf32, #tpu.memory_space<vmem>>, vector<1x16xf32>
    tpu.vector_store %arg8[%c0_141, %c128], %648 {strides = array<i32>} : memref<1x256xf32, #tpu.memory_space<vmem>>, vector<1x16xf32>,
    %650 = vector.extract_strided_slice %631 {offsets = [9, 0], sizes = [1, 16], strides = [1, 1]} : vector<16x16xf32> to vector<1x16xf32>
    %c0_142 = arith.constant 0 : index
    %c144 = arith.constant 144 : index
    %651 = vector.load %arg8[%c0_142, %c144] : memref<1x256xf32, #tpu.memory_space<vmem>>, vector<1x16xf32>
    tpu.vector_store %arg8[%c0_142, %c144], %650 {strides = array<i32>} : memref<1x256xf32, #tpu.memory_space<vmem>>, vector<1x16xf32>,
    %652 = vector.extract_strided_slice %631 {offsets = [10, 0], sizes = [1, 16], strides = [1, 1]} : vector<16x16xf32> to vector<1x16xf32>
    %c0_143 = arith.constant 0 : index
    %c160 = arith.constant 160 : index
    %653 = vector.load %arg8[%c0_143, %c160] : memref<1x256xf32, #tpu.memory_space<vmem>>, vector<1x16xf32>
    tpu.vector_store %arg8[%c0_143, %c160], %652 {strides = array<i32>} : memref<1x256xf32, #tpu.memory_space<vmem>>, vector<1x16xf32>,
    %654 = vector.extract_strided_slice %631 {offsets = [11, 0], sizes = [1, 16], strides = [1, 1]} : vector<16x16xf32> to vector<1x16xf32>
    %c0_144 = arith.constant 0 : index
    %c176 = arith.constant 176 : index
    %655 = vector.load %arg8[%c0_144, %c176] : memref<1x256xf32, #tpu.memory_space<vmem>>, vector<1x16xf32>
    tpu.vector_store %arg8[%c0_144, %c176], %654 {strides = array<i32>} : memref<1x256xf32, #tpu.memory_space<vmem>>, vector<1x16xf32>,
    %656 = vector.extract_strided_slice %631 {offsets = [12, 0], sizes = [1, 16], strides = [1, 1]} : vector<16x16xf32> to vector<1x16xf32>
    %c0_145 = arith.constant 0 : index
    %c192 = arith.constant 192 : index
    %657 = vector.load %arg8[%c0_145, %c192] : memref<1x256xf32, #tpu.memory_space<vmem>>, vector<1x16xf32>
    tpu.vector_store %arg8[%c0_145, %c192], %656 {strides = array<i32>} : memref<1x256xf32, #tpu.memory_space<vmem>>, vector<1x16xf32>,
    %658 = vector.extract_strided_slice %631 {offsets = [13, 0], sizes = [1, 16], strides = [1, 1]} : vector<16x16xf32> to vector<1x16xf32>
    %c0_146 = arith.constant 0 : index
    %c208 = arith.constant 208 : index
    %659 = vector.load %arg8[%c0_146, %c208] : memref<1x256xf32, #tpu.memory_space<vmem>>, vector<1x16xf32>
    tpu.vector_store %arg8[%c0_146, %c208], %658 {strides = array<i32>} : memref<1x256xf32, #tpu.memory_space<vmem>>, vector<1x16xf32>,
    %660 = vector.extract_strided_slice %631 {offsets = [14, 0], sizes = [1, 16], strides = [1, 1]} : vector<16x16xf32> to vector<1x16xf32>
    %c0_147 = arith.constant 0 : index
    %c224 = arith.constant 224 : index
    %661 = vector.load %arg8[%c0_147, %c224] : memref<1x256xf32, #tpu.memory_space<vmem>>, vector<1x16xf32>
    tpu.vector_store %arg8[%c0_147, %c224], %660 {strides = array<i32>} : memref<1x256xf32, #tpu.memory_space<vmem>>, vector<1x16xf32>,
    %662 = vector.extract_strided_slice %631 {offsets = [15, 0], sizes = [1, 16], strides = [1, 1]} : vector<16x16xf32> to vector<1x16xf32>
    %c0_148 = arith.constant 0 : index
    %c240 = arith.constant 240 : index
    %663 = vector.load %arg8[%c0_148, %c240] : memref<1x256xf32, #tpu.memory_space<vmem>>, vector<1x16xf32>
    tpu.vector_store %arg8[%c0_148, %c240], %662 {strides = array<i32>} : memref<1x256xf32, #tpu.memory_space<vmem>>, vector<1x16xf32>,
    %c0_149 = arith.constant 0 : index
    %c0_150 = arith.constant 0 : index
    %664 = vector.load %arg8[%c0_149, %c0_150] : memref<1x256xf32, #tpu.memory_space<vmem>>, vector<1x256xf32>
    %665 = vector.broadcast %664 : vector<1x256xf32> to vector<32x256xf32>
    %666 = arith.mulf %47, %665 : vector<32x256xf32>
    %c0_151 = arith.constant 0 : index
    %c0_152 = arith.constant 0 : index
    %c0_153 = arith.constant 0 : index
    %667 = vector.load %arg5[%c0_151, %c0_152, %c0_153] : memref<1x32x256xf32, #tpu.memory_space<vmem>>, vector<1x32x256xf32>
    %668 = vector.shape_cast %667 : vector<1x32x256xf32> to vector<32x256xf32>
    %669 = vector.shape_cast %666 : vector<32x256xf32> to vector<1x32x256xf32>
    tpu.vector_store %arg5[%c0_151, %c0_152, %c0_153], %669 {strides = array<i32>} : memref<1x32x256xf32, #tpu.memory_space<vmem>>, vector<1x32x256xf32>,
    return
  }
  func.func @transform_0(%arg0: i32) -> (i32, i32, i32) {
    %c0_i32 = arith.constant 0 : i32
    %c0_i32_0 = arith.constant 0 : i32
    %c0_i32_1 = arith.constant 0 : i32
    return %arg0, %c0_i32, %c0_i32_0 : i32, i32, i32
  }
  func.func @transform_1(%arg0: i32) -> (i32, i32) {
    %c0_i32 = arith.constant 0 : i32
    %c0_i32_0 = arith.constant 0 : i32
    %c0_i32_1 = arith.constant 0 : i32
    return %c0_i32, %c0_i32_0 : i32, i32
  }
  func.func @transform_2(%arg0: i32) -> (i32, i32) {
    %c0_i32 = arith.constant 0 : i32
    %c0_i32_0 = arith.constant 0 : i32
    %c0_i32_1 = arith.constant 0 : i32
    return %c0_i32, %c0_i32_0 : i32, i32
  }
  func.func @transform_3(%arg0: i32) -> i32 {
    %c0_i32 = arith.constant 0 : i32
    %c0_i32_0 = arith.constant 0 : i32
    return %c0_i32 : i32
  }
  func.func @transform_4(%arg0: i32) -> (i32, i32, i32) {
    %c0_i32 = arith.constant 0 : i32
    %c0_i32_0 = arith.constant 0 : i32
    %c0_i32_1 = arith.constant 0 : i32
    return %arg0, %c0_i32, %c0_i32_0 : i32, i32, i32
  }
}

</mosaic_0001>

<bundles_post_ra>
// kernel: cbam_forward.1
= control target key start
LH: loop header
LB: loop body
LE: loop exit
PB: predicated region body
PF: predicated region fallthrough
CT: control target
= control target key end

     0   :  { %9 = vsyncpa [#allocation6], 0  ;;  %s2441_s15 = smov 0   ;;  %s3770_s0 = inlined_call_operand.vmem [shape: f32[2,32,256], index: 0, kind: input, shape index: {}]   ;;  %s3771_s1 = inlined_call_operand.vmem [shape: f32[32,2], index: 1, kind: input, shape index: {}]   ;;  %s3772_s2 = inlined_call_operand.vmem [shape: f32[32,2], index: 2, kind: input, shape index: {}]   ;;  %s3773_s3 = inlined_call_operand.vmem [shape: f32[98], index: 3, kind: input, shape index: {}]   ;;  %s3774_s4 = inlined_call_operand.vmem [shape: f32[2,32,256], index: 4, kind: output, shape index: {}]  }
   0x1 LB: > { %s2165_s16 = sadd.s32 4294967295, %s2389_s15   ;;  %p2167_p0 = scmp.ge.s32.totalorder %s2389_s15, 1  ;;  %s2389_s15 = sphi %s2441_s15, %s15_s15  }
   0x2   : > { %p135_p1 = scmp.lt.s32.totalorder %s2389_s15, 3  ;;  %s154_s19 = sshll.u32 %s3773_s3, 4  ;;  %s155_s19 = int_to_ptr.vmem [resolvable:$true] %s154_s19 }
   0x3   : > { %p2291_p3 = scmp.eq.s32.totalorder %s2165_s16, 0  ;;  %s2364_s21 = scalar_lea.vmem %s155_s19, 16 }
   0x4   : > { %p2452_p2 = pnand %p2167_p0, %p135_p1  ;;  %p2365_p6 = scmp.ne.s32.totalorder %s155_s19, %s2364_s21 }
   0x5   : > { %p2372_p10 = scmp.lt.s32.totalorder %s155_s19, %s155_s19  ;;  %p2373_p11 = scmp.lt.s32.totalorder %s2364_s21, %s2364_s21 }
   0x6   : > { %p2287_p4 = pneg %p2452_p2 }
   0x7   : > { %p2374_p12 = por %p2373_p11, %p2372_p10 }
   0x8   : > { %p2288_p5 = pnand %p2291_p3, %p2287_p4 }
   0xa   : > { %p2366_p7 = pneg %p2288_p5 }
   0xc   : > { %p2367_p8 = pnand %p2366_p7, %p2365_p6 }
   0xe   : > { %p2368_p9 = pneg %p2367_p8 }
  0x10   : > { %p2375_p13 = pnand %p2374_p12, %p2368_p9 }
  0x12   : > { %2378 = shalt.err (!%p2375_p13)
}
  0x13   : > { %s2391_s22 = smov [#allocation5]   ;;  %175 = sbr.rel (%p2452_p2) target bundleno = 1302 (0x516), region = 36 }
  0x14   : > { %2290 = dma.vmem_to_smem (!%p2288_p5), %s155_s19, 16, %s2391_s22, [#allocation6]  }
  0x18   : > { %2384 = dma.done.wait (%p2291_p3), [#allocation6], 16  }
  0x19   : > { %2386 = vsyncadd (%p2291_p3), [#allocation6], 4294967280 }
  0x1a   : > { %181 = sfence }
  0x1b   : > { %p202_p0 = scmp.lt.s32.totalorder %s2165_s16, 1  ;;  %v248_v19 = vld [vmem:[%s3771_s1] sm:$0xff]  ;;  %v250_v22 = vld [vmem:[%s3771_s1 + $0x10] sm:$0xff]  ;;  %v249_v25 = vld [vmem:[%s3771_s1 + $0x8] sm:$0xff]  ;;  %vm256_vm0 = vcmask 7168   ;;  %vm302_vm1 = vcmask 15368  }
  0x1c   : > { %v251_v31 = vld [vmem:[%s3771_s1 + $0x18] sm:$0xff]  ;;  %s2392_s19 = smov 127   ;;  %vm446_vm2 = vcmask 179200   ;;  %s2395_s20 = smov 115   ;;  %vm449_vm3 = vcmask 177152   ;;  %vm458_vm4 = vcmask 147480  }
  0x1d   : > { %s3903_s16 = smov (!%p202_p0, %s2165_s16), 1  ;;  %s2396_s21 = smov 3  }
  0x1e   : > { %s2281_s23 = sshll.u32 %s3903_s16, 6  ;;  %s2397_s22 = smov 83  }
  0x1f   : > { %s206_s26 = scalar_lea.vmem %s3770_s0, %s2281_s23  ;;  %s2398_s24 = smov 99  }
  0x20   : > { %v2471_v0 = vld [vmem:[%s206_s26 + $0x20] sm:$0xff]  ;;  %v2473_v1 = vld [vmem:[%s206_s26 + $0x28] sm:$0xff]  ;;  %v2481_v5 = vld [vmem:[%s206_s26 + $0x10] sm:$0xff]  ;;  %s2399_s25 = smov 51   ;;  %s2401_s27 = smov 19  }
  0x21   : > { %v2475_v2 = vld [vmem:[%s206_s26] sm:$0xff]  ;;  %v226_v3 = vadd.f32 %v2473_v1, %v2471_v0  ;;  %v2479_v4 = vld [vmem:[%s206_s26 + $0x8] sm:$0xff]  ;;  %v2483_v6 = vld [vmem:[%s206_s26 + $0x18] sm:$0xff]  ;;  %v242_v15 = vmax.f32 %v2471_v0, %v2473_v1  ;;  %s2402_s28 = smov 35   ;;  %s2629_s29 = sld [smem:[#allocation5 + $0x3]] }
  0x22   : > { %v220_v7 = vadd.f32 %v2479_v4, %v2475_v2  ;;  %v236_v8 = vmax.f32 %v2475_v2, %v2479_v4  ;;  %v223_v9 = vadd.f32 %v2483_v6, %v2481_v5  ;;  %v2491_v10 = vld [vmem:[%s206_s26 + $0x30] sm:$0xff]  ;;  %v2493_v11 = vld [vmem:[%s206_s26 + $0x38] sm:$0xff]  ;;  %v239_v13 = vmax.f32 %v2481_v5, %v2483_v6  ;;  %s2400_s26 = smov 67   ;;  %s2633_s30 = sld [smem:[#allocation5 + $0x5]] }
  0x23   : > { %227 = vadd.xlane.f32.xlu1 %v226_v3  ;;  %v229_v12 = vadd.f32 %v2493_v11, %v2491_v10  ;;  %v245_v14 = vmax.f32 %v2491_v10, %v2493_v11  ;;  %s2638_s5 = sld [smem:[#allocation5 + $0x7]]  ;;  %s2403_s8 = smov 126  }
  0x24   : > { %221 = vadd.xlane.f32.xlu0 %v220_v7  ;;  %s2646_s6 = sld [smem:[#allocation5 + $0x9]]  ;;  %s2404_s10 = smov 125  }
  0x25   : > { %s2653_s7 = sld [smem:[#allocation5 + $0xb]]  ;;  %s2405_s12 = smov 124  }
  0x26   : > { %s2660_s9 = sld [smem:[#allocation5 + $0xd]]  ;;  %s2406_s14 = smov 123  }
  0x27   : > { %237 = vmax.xlane.f32.xlu1 %v236_v8  ;;  %s2667_s11 = sld [smem:[#allocation5 + $0x11]]  ;;  %s2407_s18 = smov 122  }
  0x28   : > { %224 = vadd.xlane.f32.xlu0 %v223_v9  ;;  %s2677_s13 = sld [smem:[#allocation5 + $0x13]] }
  0x29   : > { %s2688_s17 = sld [smem:[#allocation5 + $0x15]] }
  0x2b   : > { %230 = vadd.xlane.f32.xlu1 %v229_v12 }
  0x2c   : > { %240 = vmax.xlane.f32.xlu0 %v239_v13 }
  0x2f   : > { %246 = vmax.xlane.f32.xlu1 %v245_v14 }
  0x30   : > { %243 = vmax.xlane.f32.xlu0 %v242_v15 }
  0xac   : > { %v228_v16 = vpop.xlane.xlu1 %227 }
  0xad   : > { %v222_v17 = vpop.xlane.xlu0 %221  ;;  %v234_v20 = vmul.f32 0.00390625, %v228_v16 }
  0xae   : > { %v232_v18 = vmul.f32 0.00390625, %v222_v17 }
  0xaf   : > { %v254_v27 = vmul.f32 %v250_v22, %v234_v20 }
  0xb0   : > { %v238_v21 = vpop.xlane.xlu1 %237  ;;  %v252_v23 = vmul.f32 %v248_v19, %v232_v18 }
  0xb1   : > { %v225_v24 = vpop.xlane.xlu0 %224  ;;  %v271_v28 = vmul.f32 %v248_v19, %v238_v21  ;;  %v260_v41 = vsel %vm256_vm0, %v254_v27, 0.0  ;;  %v306_v46 = vsel %vm302_vm1, %v254_v27, 0.0 }
  0xb2   : > { %v233_v26 = vmul.f32 0.00390625, %v225_v24  ;;  %v257_v32 = vsel %vm256_vm0, %v252_v23, 0.0  ;;  %v303_v35 = vsel %vm302_vm1, %v252_v23, 0.0 }
  0xb3   : > { %v275_v43 = vsel %vm256_vm0, %v271_v28, 0.0  ;;  %v317_v48 = vsel %vm302_vm1, %v271_v28, 0.0 }
  0xb4   : > { %v231_v29 = vpop.xlane.xlu1 %230  ;;  %v253_v30 = vmul.f32 %v249_v25, %v233_v26 }
  0xb5   : > { %v235_v33 = vmul.f32 0.00390625, %v231_v29  ;;  %v241_v34 = vpop.xlane.xlu0 %240 }
  0xb6   : > { %v258_v36 = vsel %vm256_vm0, %v253_v30, 0.0  ;;  %v304_v37 = vsel %vm302_vm1, %v253_v30, 0.0  ;;  %v272_v38 = vmul.f32 %v249_v25, %v241_v34 }
  0xb7   : > { %v259_v39 = vadd.f32 %v258_v36, %v257_v32  ;;  %v305_v40 = vadd.f32 %v304_v37, %v303_v35  ;;  %v255_v42 = vmul.f32 %v251_v31, %v235_v33 }
  0xb8   : > { %v276_v44 = vsel %vm256_vm0, %v272_v38, 0.0  ;;  %v318_v45 = vsel %vm302_vm1, %v272_v38, 0.0  ;;  %v247_v47 = vpop.xlane.xlu1 %246 }
  0xb9   : > { %v277_v49 = vadd.f32 %v276_v44, %v275_v43  ;;  %v261_v50 = vadd.f32 %v260_v41, %v259_v39  ;;  %v307_v51 = vadd.f32 %v306_v46, %v305_v40  ;;  %v244_v52 = vpop.xlane.xlu0 %243  ;;  %v262_v54 = vsel %vm256_vm0, %v255_v42, 0.0  ;;  %v290_v40 = vld [vmem:[%s3772_s2 + $0x8] sm:$0xff]  ;;  %v289_v41 = vld [vmem:[%s3772_s2] sm:$0xff]  ;;  %v291_v43 = vld [vmem:[%s3772_s2 + $0x10] sm:$0xff] }
  0xba   : > { %v273_v53 = vmul.f32 %v250_v22, %v244_v52  ;;  %v308_v55 = vsel %vm302_vm1, %v255_v42, 0.0  ;;  %v274_v56 = vmul.f32 %v251_v31, %v247_v47  ;;  %v319_v57 = vadd.f32 %v318_v45, %v317_v48  ;;  %v292_v44 = vld [vmem:[%s3772_s2 + $0x18] sm:$0xff] }
  0xbb   : > { %v263_v58 = vadd.f32 %v262_v54, %v261_v50  ;;  %v309_v59 = vadd.f32 %v308_v55, %v307_v51  ;;  %v2393_v54 = vmov 0  }
  0xbc   : > { %v278_v60 = vsel %vm256_vm0, %v273_v53, 0.0  ;;  %v320_v61 = vsel %vm302_vm1, %v273_v53, 0.0  ;;  %v280_v62 = vsel %vm256_vm0, %v274_v56, 0.0  ;;  %v322_v63 = vsel %vm302_vm1, %v274_v56, 0.0  ;;  %2327 = vset.pattern.permute.xlu1 %v2393_v54  ;;  %2326 = vset.pattern.permute.xlu0 %v2393_v54 }
  0xbd   : > { %v279_v3 = vadd.f32 %v278_v60, %v277_v49  ;;  %v321_v7 = vadd.f32 %v320_v61, %v319_v57  ;;  %v264_v8 = vrot.slane %v263_v58, 4  ;;  %v310_v9 = vrot.slane %v309_v59, 4 }
  0xbf   : > { %v265_v12 = vadd.f32 %v264_v8, %v263_v58  ;;  %v281_v13 = vadd.f32 %v280_v62, %v279_v3  ;;  %v311_v14 = vadd.f32 %v310_v9, %v309_v59  ;;  %v323_v15 = vadd.f32 %v322_v63, %v321_v7 }
  0xc1   : > { %v266_v16 = vrot.slane %v265_v12, 2  ;;  %v282_v17 = vrot.slane %v281_v13, 4  ;;  %v312_v18 = vrot.slane %v311_v14, 2  ;;  %v324_v19 = vrot.slane %v323_v15, 4 }
  0xc3   : > { %v267_v20 = vadd.f32 %v266_v16, %v265_v12  ;;  %v283_v21 = vadd.f32 %v282_v17, %v281_v13  ;;  %v313_v22 = vadd.f32 %v312_v18, %v311_v14  ;;  %v325_v23 = vadd.f32 %v324_v19, %v323_v15 }
  0xc5   : > { %v268_v24 = vrot.slane %v267_v20, 1  ;;  %v284_v25 = vrot.slane %v283_v21, 2  ;;  %v314_v26 = vrot.slane %v313_v22, 1  ;;  %v326_v27 = vrot.slane %v325_v23, 2 }
  0xc7   : > { %v285_v28 = vadd.f32 %v284_v25, %v283_v21  ;;  %v327_v29 = vadd.f32 %v326_v27, %v325_v23  ;;  %v269_v30 = vadd.f32 %v268_v24, %v267_v20  ;;  %v315_v32 = vadd.f32 %v314_v26, %v313_v22 }
  0xc8   : > { %v2394_v23 = vmov 0.0  }
  0xc9   : > { %v286_v31 = vrot.slane %v285_v28, 1  ;;  %v328_v33 = vrot.slane %v327_v29, 1  ;;  %v270_v36 = vmax.f32 %v269_v30, 0.0  ;;  %v316_v38 = vmax.f32 %v315_v32, 0.0  ;;  %451 = vst.msk [vmem:[#allocation3] sm:$0xff] %vm446_vm2, %v2394_v23  ;;  %447 = vst.msk [vmem:[#allocation2] sm:$0xff] %vm446_vm2, %v2394_v23 }
  0xca   : > { %448 = vst.msk [vmem:[#allocation2 + $0x8] sm:$0xff] %vm446_vm2, %v2394_v23  ;;  %452 = vst.msk [vmem:[#allocation3 + $0x8] sm:$0xff] %vm446_vm2, %v2394_v23 }
  0xcb   : > { %v287_v34 = vadd.f32 %v286_v31, %v285_v28  ;;  %v329_v35 = vadd.f32 %v328_v33, %v327_v29  ;;  %453 = vst.msk [vmem:[#allocation3 + $0x10] sm:$0x3f] %vm449_vm3, %v2394_v23  ;;  %450 = vst.msk [vmem:[#allocation2 + $0x10] sm:$0x3f] %vm449_vm3, %v2394_v23  ;;  %v646_v23 = vstv %s2633_s30  ;;  %s2766_s30 = sld [smem:[#allocation5 + $0x27]] }
  0xcd   : > { %v288_v37 = vmax.f32 %v287_v34, 0.0  ;;  %v330_v39 = vmax.f32 %v329_v35, 0.0 }
  0xcf   : > { %v331_v42 = vadd.f32 %v330_v39, %v316_v38  ;;  %v293_v45 = vadd.f32 %v288_v37, %v270_v36 }
  0xd1   : > { %v333_v46 = vmul.f32 %v331_v42, %v290_v40  ;;  %v332_v47 = vmul.f32 %v331_v42, %v289_v41  ;;  %v295_v48 = vmul.f32 %v293_v45, %v290_v40  ;;  %v294_v49 = vmul.f32 %v293_v45, %v289_v41 }
  0xd2   : > { %v296_v50 = vmul.f32 %v293_v45, %v291_v43  ;;  %v297_v51 = vmul.f32 %v293_v45, %v292_v44  ;;  %v334_v52 = vmul.f32 %v331_v42, %v291_v43  ;;  %v335_v53 = vmul.f32 %v331_v42, %v292_v44 }
  0xd3   : > { %342 = vrot.lane.b32.xlu1 %v333_v46, %s2392_s19  ;;  %340 = vrot.lane.b32.xlu0 %v332_v47, %s2392_s19 }
  0xd7   : > { %344 = vrot.lane.b32.xlu1 %v334_v52, %s2392_s19 }
  0xdb   : > { %346 = vrot.lane.b32.xlu1 %v335_v53, %s2392_s19 }
 0x145   : > { %v343_v55 = vpop.permute.xlu1 %342  ;;  %v341_v56 = vpop.permute.xlu0 %340 }
 0x146   : > { %v353_v57 = vadd.f32 %v343_v55, %v295_v48  ;;  %v352_v58 = vadd.f32 %v341_v56, %v294_v49 }
 0x148   : > { %v2177_v59 = vmul.f32 -1.442695, %v353_v57  ;;  %v2176_v60 = vmul.f32 -1.442695, %v352_v58 }
 0x149   : > { %v345_v61 = vpop.permute.xlu1 %344 }
 0x14a   : > { %2328 = vpow2.f32 %v2177_v59  ;;  %v354_v62 = vadd.f32 %v345_v61, %v296_v50 }
 0x14b   : > { %2330 = vpow2.f32 %v2176_v60 }
 0x14c   : > { %v2178_v63 = vmul.f32 -1.442695, %v354_v62 }
 0x14d   : > { %v347_v3 = vpop.permute.xlu1 %346 }
 0x14e   : > { %2332 = vpow2.f32 %v2178_v63  ;;  %v355_v7 = vadd.f32 %v347_v3, %v297_v51 }
 0x150   : > { %v2179_v8 = vmul.f32 -1.442695, %v355_v7 }
 0x152   : > { %2334 = vpow2.f32 %v2179_v8 }
 0x157   : > { %v2329_v9 = vpop.eup %2328 }
 0x158   : > { %v2331_v12 = vpop.eup %2330  ;;  %v369_v13 = vadd.f32 1.0, %v2329_v9 }
 0x159   : > { %v368_v14 = vadd.f32 1.0, %v2331_v12 }
 0x15a   : > { %2336 = vrcp.f32 %v369_v13 }
 0x15b   : > { %v2333_v15 = vpop.eup %2332  ;;  %2338 = vrcp.f32 %v368_v14 }
 0x15c   : > { %v370_v16 = vadd.f32 1.0, %v2333_v15 }
 0x15e   : > { %2340 = vrcp.f32 %v370_v16 }
 0x15f   : > { %v2335_v17 = vpop.eup %2334 }
 0x160   : > { %v371_v18 = vadd.f32 1.0, %v2335_v17 }
 0x162   : > { %2342 = vrcp.f32 %v371_v18  ;;  %v618_v18 = vstv %s2629_s29  ;;  %s2757_s29 = sld [smem:[#allocation5 + $0x25]] }
 0x167   : > { %v2337_v19 = vpop.eup %2336 }
 0x168   : > { %v2339_v20 = vpop.eup %2338  ;;  %387 = vperm.xlu1 %2327, %v2337_v19  }
 0x169   : > { %382 = vperm.xlu0 %2326, %v2339_v20  }
 0x16b   : > { %v2341_v21 = vpop.eup %2340 }
 0x16c   : > { %392 = vperm.xlu1 %2327, %v2341_v21  }
 0x16f   : > { %v2343_v22 = vpop.eup %2342 }
 0x170   : > { %397 = vperm.xlu0 %2326, %v2343_v22  }
 0x1e3   : > { %v388_v24 = vpop.permute.xlu1 %387 }
 0x1e4   : > { %v383_v25 = vpop.permute.xlu0 %382  ;;  %v2555_v29 = vmul.f32 %v388_v24, %v2481_v5  ;;  %v2567_v33 = vmul.f32 %v388_v24, %v2483_v6 }
 0x1e5   : > { %v2558_v30 = vmul.f32 %v383_v25, %v2475_v2  ;;  %v2577_v2 = vmul.f32 %v383_v25, %v2479_v4 }
 0x1e6   : > { %3789 = vst [vmem:[#allocation9_spill] sm:$0xff] %v2555_v29  ;;  %3793 = vst [vmem:[#allocation13_spill] sm:$0xff] %v2567_v33 }
 0x1e7   : > { %v393_v26 = vpop.permute.xlu1 %392  ;;  %3790 = vst [vmem:[#allocation10_spill] sm:$0xff] %v2558_v30  ;;  %3795 = vst [vmem:[#allocation15_spill] sm:$0xff] %v2577_v2  ;;  %v417_v48 = vadd.f32 %v2567_v33, %v2577_v2 }
 0x1e8   : > { %v2552_v27 = vmul.f32 %v393_v26, %v2471_v0  ;;  %v2570_v34 = vmul.f32 %v393_v26, %v2473_v1  ;;  %v408_v1 = vadd.f32 %v2555_v29, %v2558_v30 }
 0x1ea   : > { %3788 = vst [vmem:[#allocation8_spill] sm:$0xff] %v2552_v27  ;;  %3794 = vst [vmem:[#allocation14_spill] sm:$0xff] %v2570_v34  ;;  %v428_v0 = vmax.f32 %v2558_v30, %v2552_v27  ;;  %v437_v6 = vmax.f32 %v2577_v2, %v2570_v34  ;;  %v409_v38 = vadd.f32 %v408_v1, %v2552_v27 }
 0x1eb   : > { %v398_v28 = vpop.permute.xlu0 %397  ;;  %v418_v51 = vadd.f32 %v417_v48, %v2570_v34 }
 0x1ec   : > { %v2561_v31 = vmul.f32 %v398_v28, %v2491_v10  ;;  %v2564_v32 = vmul.f32 %v398_v28, %v2493_v11  ;;  %v674_v28 = vstv %s2638_s5  ;;  %s2773_s5 = sld [smem:[#allocation5 + $0x29]] }
 0x1ee   : > { %3791 = vst [vmem:[#allocation11_spill] sm:$0xff] %v2561_v31  ;;  %3792 = vst [vmem:[#allocation12_spill] sm:$0xff] %v2564_v32  ;;  %v429_v5 = vmax.f32 %v2555_v29, %v2561_v31  ;;  %v438_v11 = vmax.f32 %v2567_v33, %v2564_v32  ;;  %v410_v40 = vadd.f32 %v409_v38, %v2561_v31 }
 0x1ef   : > { %v419_v53 = vadd.f32 %v418_v51, %v2564_v32 }
 0x1f0   : > { %v430_v10 = vmax.f32 %v428_v0, %v429_v5  ;;  %v439_v37 = vmax.f32 %v437_v6, %v438_v11  ;;  %v411_v43 = vrot.slane %v410_v40, 4  ;;  %v702_v11 = vstv %s2646_s6  ;;  %s2778_s6 = sld [smem:[#allocation5 + $0x2d]] }
 0x1f1   : > { %v420_v56 = vrot.slane %v419_v53, 4 }
 0x1f2   : > { %v431_v35 = vrot.slane %v430_v10, 4  ;;  %v440_v41 = vrot.slane %v439_v37, 4  ;;  %v412_v46 = vadd.f32 %v411_v43, %v410_v40 }
 0x1f3   : > { %v421_v59 = vadd.f32 %v420_v56, %v419_v53 }
 0x1f4   : > { %v432_v36 = vmax.f32 %v430_v10, %v431_v35  ;;  %v441_v45 = vmax.f32 %v439_v37, %v440_v41  ;;  %v413_v49 = vrot.slane %v412_v46, 2  ;;  %v758_v41 = vstv %s2660_s9  ;;  %s2788_s9 = sld [smem:[#allocation5 + $0x31]] }
 0x1f5   : > { %v422_v60 = vrot.slane %v421_v59, 2 }
 0x1f6   : > { %v433_v39 = vrot.slane %v432_v36, 2  ;;  %v442_v47 = vrot.slane %v441_v45, 2  ;;  %v414_v52 = vadd.f32 %v413_v49, %v412_v46 }
 0x1f7   : > { %v423_v62 = vadd.f32 %v422_v60, %v421_v59 }
 0x1f8   : > { %v434_v4 = vmax.f32 %v432_v36, %v433_v39  ;;  %v443_v50 = vmax.f32 %v441_v45, %v442_v47  ;;  %v415_v55 = vrot.slane %v414_v52, 1  ;;  %v730_v36 = vstv %s2653_s7  ;;  %s2783_s7 = sld [smem:[#allocation5 + $0x2f]] }
 0x1f9   : > { %v424_v63 = vrot.slane %v423_v62, 1  ;;  %v802_v47 = vstv %s2667_s11  ;;  %s2793_s11 = sld [smem:[#allocation5 + $0x33]] }
 0x1fa   : > { %v435_v42 = vrot.slane %v434_v4, 1  ;;  %v444_v54 = vrot.slane %v443_v50, 1  ;;  %v416_v58 = vadd.f32 %v415_v55, %v414_v52  ;;  %v830_v52 = vstv %s2677_s13  ;;  %s2798_s13 = sld [smem:[#allocation5 + $0x35]] }
 0x1fb   : > { %v425_v3 = vadd.f32 %v424_v63, %v423_v62 }
 0x1fc   : > { %v436_v44 = vmax.f32 %v434_v4, %v435_v42  ;;  %v445_v57 = vmax.f32 %v443_v50, %v444_v54  ;;  %v426_v61 = vmul.f32 0.03125, %v416_v58 }
 0x1fd   : > { %v427_v7 = vmul.f32 0.03125, %v425_v3 }
 0x1fe   : > { %469 = vrot.lane.b32.xlu1 %v436_v44, %s2395_s20  ;;  %461 = vrot.lane.b32.xlu0 %v436_v44, %s2396_s21 }
 0x202   : > { %485 = vrot.lane.b32.xlu1 %v436_v44, %s2397_s22  ;;  %477 = vrot.lane.b32.xlu0 %v436_v44, %s2398_s24 }
 0x206   : > { %501 = vrot.lane.b32.xlu1 %v436_v44, %s2399_s25  ;;  %493 = vrot.lane.b32.xlu0 %v436_v44, %s2400_s26 }
 0x20a   : > { %517 = vrot.lane.b32.xlu1 %v436_v44, %s2401_s27  ;;  %509 = vrot.lane.b32.xlu0 %v436_v44, %s2402_s28 }
 0x20e   : > { %535 = vrot.lane.b32.xlu1 %v445_v57, %s2395_s20  ;;  %527 = vrot.lane.b32.xlu0 %v445_v57, %s2396_s21 }
 0x212   : > { %551 = vrot.lane.b32.xlu1 %v445_v57, %s2397_s22  ;;  %543 = vrot.lane.b32.xlu0 %v445_v57, %s2398_s24 }
 0x216   : > { %559 = vrot.lane.b32.xlu0 %v445_v57, %s2400_s26  ;;  %455 = vrot.lane.b32.xlu1 %v426_v61, %s2396_s21 }
 0x21a   : > { %567 = vrot.lane.b32.xlu0 %v445_v57, %s2399_s25  ;;  %473 = vrot.lane.b32.xlu1 %v426_v61, %s2398_s24 }
 0x21e   : > { %575 = vrot.lane.b32.xlu0 %v445_v57, %s2402_s28  ;;  %489 = vrot.lane.b32.xlu1 %v426_v61, %s2400_s26 }
 0x222   : > { %583 = vrot.lane.b32.xlu0 %v445_v57, %s2401_s27  ;;  %505 = vrot.lane.b32.xlu1 %v426_v61, %s2402_s28  ;;  %v858_v57 = vstv %s2688_s17  ;;  %s2803_s17 = sld [smem:[#allocation5 + $0x37]] }
 0x226   : > { %465 = vrot.lane.b32.xlu0 %v426_v61, %s2395_s20  ;;  %522 = vrot.lane.b32.xlu1 %v427_v7, %s2396_s21  ;;  %s2698_s21 = sld [smem:[#allocation5 + $0x17]] }
 0x22a   : > { %481 = vrot.lane.b32.xlu0 %v426_v61, %s2397_s22  ;;  %539 = vrot.lane.b32.xlu1 %v427_v7, %s2398_s24  ;;  %s2710_s24 = sld [smem:[#allocation5 + $0x19]] }
 0x22c   : > { %v886_v3 = vstv %s2698_s21  ;;  %s2813_s21 = sld [smem:[#allocation5 + $0x3d]] }
 0x22e   : > { %497 = vrot.lane.b32.xlu0 %v426_v61, %s2399_s25  ;;  %555 = vrot.lane.b32.xlu1 %v427_v7, %s2400_s26  ;;  %s2734_s26 = sld [smem:[#allocation5 + $0x1f]] }
 0x232   : > { %513 = vrot.lane.b32.xlu0 %v426_v61, %s2401_s27  ;;  %563 = vrot.lane.b32.xlu1 %v427_v7, %s2399_s25  ;;  %s2721_s25 = sld [smem:[#allocation5 + $0x1b]] }
 0x236   : > { %531 = vrot.lane.b32.xlu0 %v427_v7, %s2395_s20  ;;  %571 = vrot.lane.b32.xlu1 %v427_v7, %s2402_s28  ;;  %s2692_s20 = sld [smem:[#allocation5 + $0x1]] }
 0x237   : > { %s2752_s28 = sld [smem:[#allocation5 + $0x23]] }
 0x23a   : > { %547 = vrot.lane.b32.xlu0 %v427_v7, %s2397_s22  ;;  %579 = vrot.lane.b32.xlu1 %v427_v7, %s2401_s27  ;;  %s2700_s22 = sld [smem:[#allocation5]] }
 0x23b   : > { %s2744_s27 = sld [smem:[#allocation5 + $0x21]] }
 0x23c   : > { %v598_v62 = vstv %s2692_s20  ;;  %s2808_s20 = sld [smem:[#allocation5 + $0x3b]] }
 0x240   : > { %v592_v63 = vstv %s2700_s22  ;;  %s2818_s22 = sld [smem:[#allocation5 + $0x3f]] }
 0x270   : > { %v470_v8 = vpop.permute.xlu1 %469  ;;  %v462_v9 = vpop.permute.xlu0 %461 }
 0x271   : > { %472 = vst.msk [vmem:[#allocation3 + $0x4] sm:$0x1] %vm458_vm4, %v470_v8  ;;  %464 = vst.msk [vmem:[#allocation3 + $0x3] sm:$0x1] %vm458_vm4, %v462_v9 }
 0x274   : > { %v486_v12 = vpop.permute.xlu1 %485  ;;  %v478_v13 = vpop.permute.xlu0 %477 }
 0x275   : > { %488 = vst.msk [vmem:[#allocation3 + $0x6] sm:$0x1] %vm458_vm4, %v486_v12  ;;  %480 = vst.msk [vmem:[#allocation3 + $0x5] sm:$0x1] %vm458_vm4, %v478_v13 }
 0x278   : > { %v502_v14 = vpop.permute.xlu1 %501  ;;  %v494_v15 = vpop.permute.xlu0 %493 }
 0x279   : > { %504 = vst.msk [vmem:[#allocation3 + $0x8] sm:$0x1] %vm458_vm4, %v502_v14  ;;  %496 = vst.msk [vmem:[#allocation3 + $0x7] sm:$0x1] %vm458_vm4, %v494_v15 }
 0x27c   : > { %v518_v16 = vpop.permute.xlu1 %517  ;;  %v510_v17 = vpop.permute.xlu0 %509 }
 0x27d   : > { %520 = vst.msk [vmem:[#allocation3 + $0xa] sm:$0x1] %vm458_vm4, %v518_v16  ;;  %512 = vst.msk [vmem:[#allocation3 + $0x9] sm:$0x1] %vm458_vm4, %v510_v17  ;;  %v914_v17 = vstv %s2710_s24  ;;  %s2823_s24 = sld [smem:[#allocation5 + $0x41]] }
 0x280   : > { %v2640_v19 = vld [vmem:[#allocation3] sm:$0xff]  ;;  %v536_v20 = vpop.permute.xlu1 %535  ;;  %v528_v21 = vpop.permute.xlu0 %527 }
 0x281   : > { %538 = vst.msk [vmem:[#allocation3 + $0xc] sm:$0x1] %vm458_vm4, %v536_v20  ;;  %530 = vst.msk [vmem:[#allocation3 + $0xb] sm:$0x1] %vm458_vm4, %v528_v21  ;;  %v619_v22 = vmul.f32 %v618_v18, %v2640_v19  ;;  %v647_v26 = vmul.f32 %v646_v23, %v2640_v19  ;;  %v675_v10 = vmul.f32 %v674_v28, %v2640_v19  ;;  %v2685_v46 = vld [vmem:[#allocation3 + $0x1] sm:$0xff] }
 0x282   : > { %v703_v1 = vmul.f32 %v702_v11, %v2640_v19  ;;  %v731_v4 = vmul.f32 %v730_v36, %v2640_v19  ;;  %v759_v45 = vmul.f32 %v758_v41, %v2640_v19  ;;  %v803_v51 = vmul.f32 %v802_v47, %v2685_v46 }
 0x283   : > { %623 = vrot.lane.b32.xlu1 %v619_v22, %s2392_s19  ;;  %v831_v56 = vmul.f32 %v830_v52, %v2685_v46  ;;  %v859_v61 = vmul.f32 %v858_v57, %v2685_v46  ;;  %v599_v12 = vmul.f32 %v598_v62, %v2640_v19  ;;  %v887_v15 = vmul.f32 %v886_v3, %v2685_v46 }
 0x284   : > { %v552_v24 = vpop.permute.xlu1 %551  ;;  %v544_v25 = vpop.permute.xlu0 %543  ;;  %v915_v22 = vmul.f32 %v914_v17, %v2685_v46 }
 0x285   : > { %554 = vst.msk [vmem:[#allocation3 + $0xe] sm:$0x1] %vm458_vm4, %v552_v24  ;;  %546 = vst.msk [vmem:[#allocation3 + $0xd] sm:$0x1] %vm458_vm4, %v544_v25 }
 0x287   : > { %651 = vrot.lane.b32.xlu1 %v647_v26, %s2403_s8 }
 0x288   : > { %v560_v0 = vpop.permute.xlu0 %559  ;;  %v456_v5 = vpop.permute.xlu1 %455 }
 0x289   : > { %562 = vst.msk [vmem:[#allocation3 + $0xf] sm:$0x1] %vm458_vm4, %v560_v0  ;;  %459 = vst.msk [vmem:[#allocation2 + $0x3] sm:$0x1] %vm458_vm4, %v456_v5  ;;  %v957_v0 = vld [vmem:[#allocation3 + $0x2] sm:$0xff]  ;;  %v986_v5 = vstv %s2734_s26  ;;  %s2833_s26 = sld [smem:[#allocation5 + $0x45]] }
 0x28b   : > { %679 = vrot.lane.b32.xlu1 %v675_v10, %s2404_s10 }
 0x28c   : > { %v568_v6 = vpop.permute.xlu0 %567  ;;  %v474_v35 = vpop.permute.xlu1 %473 }
 0x28d   : > { %570 = vst.msk [vmem:[#allocation3 + $0x10] sm:$0x1] %vm458_vm4, %v568_v6  ;;  %476 = vst.msk [vmem:[#allocation2 + $0x5] sm:$0x1] %vm458_vm4, %v474_v35  ;;  %v1014_v6 = vstv %s2744_s27  ;;  %s2838_s27 = sld [smem:[#allocation5 + $0x49]] }
 0x28f   : > { %707 = vrot.lane.b32.xlu1 %v703_v1, %s2405_s12 }
 0x290   : > { %v2670_v37 = vld [vmem:[#allocation3 + $0x8] sm:$0xff]  ;;  %v576_v38 = vpop.permute.xlu0 %575  ;;  %v490_v39 = vpop.permute.xlu1 %489 }
 0x291   : > { %578 = vst.msk [vmem:[#allocation3 + $0x11] sm:$0x1] %vm458_vm4, %v576_v38  ;;  %492 = vst.msk [vmem:[#allocation2 + $0x7] sm:$0x1] %vm458_vm4, %v490_v39  ;;  %v620_v40 = vmul.f32 %v618_v18, %v2670_v37  ;;  %v648_v44 = vmul.f32 %v646_v23, %v2670_v37  ;;  %v676_v50 = vmul.f32 %v674_v28, %v2670_v37  ;;  %v942_v23 = vstv %s2721_s25  ;;  %s2828_s25 = sld [smem:[#allocation5 + $0x43]] }
 0x292   : > { %v704_v55 = vmul.f32 %v702_v11, %v2670_v37  ;;  %v732_v60 = vmul.f32 %v730_v36, %v2670_v37  ;;  %v760_v14 = vmul.f32 %v758_v41, %v2670_v37  ;;  %v943_v28 = vmul.f32 %v942_v23, %v2685_v46 }
 0x293   : > { %625 = vrot.lane.b32.xlu0 %v620_v40, %s2392_s19  ;;  %735 = vrot.lane.b32.xlu1 %v731_v4, %s2406_s14  ;;  %v987_v11 = vmul.f32 %v986_v5, %v957_v0  ;;  %v600_v1 = vmul.f32 %v598_v62, %v2670_v37  ;;  %v1015_v39 = vmul.f32 %v1014_v6, %v957_v0  ;;  %v1042_v40 = vstv %s2752_s28  ;;  %s2843_s28 = sld [smem:[#allocation5 + $0x4b]] }
 0x294   : > { %v584_v42 = vpop.permute.xlu0 %583  ;;  %v506_v43 = vpop.permute.xlu1 %505  ;;  %v774_v16 = vld [vmem:[#allocation3 + $0x9] sm:$0xff]  ;;  %v1098_v46 = vstv %s2766_s30  ;;  %v1254_v62 = vstv %s2793_s11  ;;  %s2860_s30 = sld [smem:[#allocation5 + $0x4f]] }
 0x295   : > { %586 = vst.msk [vmem:[#allocation3 + $0x12] sm:$0x1] %vm458_vm4, %v584_v42  ;;  %508 = vst.msk [vmem:[#allocation2 + $0x9] sm:$0x1] %vm458_vm4, %v506_v43  ;;  %v804_v21 = vmul.f32 %v802_v47, %v774_v16  ;;  %v832_v26 = vmul.f32 %v830_v52, %v774_v16  ;;  %v860_v10 = vmul.f32 %v858_v57, %v774_v16  ;;  %v1070_v43 = vstv %s2757_s29  ;;  %v1141_v52 = vld [vmem:[#allocation3 + $0x3] sm:$0xff]  ;;  %s2852_s29 = sld [smem:[#allocation5 + $0x4d]] }
 0x296   : > { %v888_v38 = vmul.f32 %v886_v3, %v774_v16  ;;  %v916_v41 = vmul.f32 %v914_v17, %v774_v16  ;;  %v1043_v42 = vmul.f32 %v1042_v40, %v957_v0  ;;  %v944_v37 = vmul.f32 %v942_v23, %v774_v16  ;;  %v1325_v17 = vld [vmem:[#allocation3 + $0x4] sm:$0xff]  ;;  %s2910_s11 = sld [smem:[#allocation5 + $0x8]] }
 0x297   : > { %653 = vrot.lane.b32.xlu0 %v648_v44, %s2403_s8  ;;  %763 = vrot.lane.b32.xlu1 %v759_v45, %s2407_s18  ;;  %v1071_v44 = vmul.f32 %v1070_v43, %v957_v0  ;;  %v1255_v3 = vmul.f32 %v1254_v62, %v1141_v52 }
 0x298   : > { %v466_v48 = vpop.permute.xlu0 %465  ;;  %v523_v49 = vpop.permute.xlu1 %522  ;;  %v958_v45 = vld [vmem:[#allocation3 + $0xa] sm:$0xff] }
 0x299   : > { %468 = vst.msk [vmem:[#allocation2 + $0x4] sm:$0x1] %vm458_vm4, %v466_v48  ;;  %525 = vst.msk [vmem:[#allocation2 + $0xb] sm:$0x1] %vm458_vm4, %v523_v49  ;;  %v988_v47 = vmul.f32 %v986_v5, %v958_v45  ;;  %v1099_v48 = vmul.f32 %v1098_v46, %v957_v0  ;;  %v1126_v49 = vstv %s2773_s5  ;;  %v1072_v57 = vmul.f32 %v1070_v43, %v958_v45  ;;  %s2868_s5 = sld [smem:[#allocation5 + $0x51]] }
 0x29a   : > { %v1538_v43 = vstv %s2838_s27  ;;  %s3011_s27 = sld [smem:[#allocation5 + $0x1a]] }
 0x29b   : > { %681 = vrot.lane.b32.xlu0 %v676_v50, %s2404_s10  ;;  %807 = vrot.lane.b32.xlu1 %v803_v51, %s2392_s19  ;;  %v1016_v50 = vmul.f32 %v1014_v6, %v958_v45  ;;  %v1127_v51 = vmul.f32 %v1126_v49, %v957_v0  ;;  %v1438_v0 = vstv %s2823_s24  ;;  %v1466_v6 = vstv %s2828_s25  ;;  %s2978_s24 = sld [smem:[#allocation5 + $0x14]] }
 0x29c   : > { %v482_v53 = vpop.permute.xlu0 %481  ;;  %v540_v54 = vpop.permute.xlu1 %539  ;;  %s2989_s25 = sld [smem:[#allocation5 + $0x16]]  ;;  %v3093_v34 = vld [vmem:[#allocation3 + $0xe] sm:$0xff] }
 0x29d   : > { %484 = vst.msk [vmem:[#allocation2 + $0x6] sm:$0x1] %vm458_vm4, %v482_v53  ;;  %542 = vst.msk [vmem:[#allocation2 + $0xd] sm:$0x1] %vm458_vm4, %v540_v54  ;;  %v1170_v53 = vstv %s2778_s6  ;;  %v1044_v54 = vmul.f32 %v1042_v40, %v958_v45  ;;  %s2876_s6 = sld [smem:[#allocation5 + $0x2]] }
 0x29f   : > { %709 = vrot.lane.b32.xlu0 %v704_v55, %s2405_s12  ;;  %835 = vrot.lane.b32.xlu1 %v831_v56, %s2403_s8  ;;  %v1171_v55 = vmul.f32 %v1170_v53, %v1141_v52  ;;  %v1198_v56 = vstv %s2783_s7  ;;  %s2888_s7 = sld [smem:[#allocation5 + $0x4]] }
 0x2a0   : > { %v498_v58 = vpop.permute.xlu0 %497  ;;  %v556_v59 = vpop.permute.xlu1 %555 }
 0x2a1   : > { %500 = vst.msk [vmem:[#allocation2 + $0x8] sm:$0x1] %vm458_vm4, %v498_v58  ;;  %558 = vst.msk [vmem:[#allocation2 + $0xf] sm:$0x1] %vm458_vm4, %v556_v59  ;;  %v1199_v58 = vmul.f32 %v1198_v56, %v1141_v52  ;;  %v1226_v59 = vstv %s2788_s9  ;;  %s2899_s9 = sld [smem:[#allocation5 + $0x6]] }
 0x2a3   : > { %737 = vrot.lane.b32.xlu0 %v732_v60, %s2406_s14  ;;  %863 = vrot.lane.b32.xlu1 %v859_v61, %s2404_s10  ;;  %v1100_v60 = vmul.f32 %v1098_v46, %v958_v45  ;;  %v1227_v61 = vmul.f32 %v1226_v59, %v1141_v52  ;;  %v1566_v46 = vstv %s2843_s28  ;;  %s3024_s28 = sld [smem:[#allocation5 + $0x57]] }
 0x2a4   : > { %v2725_v7 = vld [vmem:[#allocation2] sm:$0xff]  ;;  %v514_v8 = vpop.permute.xlu0 %513  ;;  %v564_v9 = vpop.permute.xlu1 %563 }
 0x2a5   : > { %v593_v13 = vmul.f32 %v592_v63, %v2725_v7  ;;  %516 = vst.msk [vmem:[#allocation2 + $0xa] sm:$0x1] %vm458_vm4, %v514_v8  ;;  %566 = vst.msk [vmem:[#allocation2 + $0x10] sm:$0x1] %vm458_vm4, %v564_v9  ;;  %v1142_v8 = vld [vmem:[#allocation3 + $0xb] sm:$0xff]  ;;  %v1282_v9 = vstv %s2798_s13  ;;  %s2921_s13 = sld [smem:[#allocation5 + $0xa]] }
 0x2a6   : > { %v1256_v23 = vmul.f32 %v1254_v62, %v1142_v8 }
 0x2a7   : > { %v2736_v18 = vadd.f32 %v599_v12, %v593_v13  ;;  %765 = vrot.lane.b32.xlu0 %v760_v14, %s2407_s18  ;;  %891 = vrot.lane.b32.xlu1 %v887_v15, %s2405_s12  ;;  %v1172_v12 = vmul.f32 %v1170_v53, %v1142_v8  ;;  %v1283_v13 = vmul.f32 %v1282_v9, %v1141_v52  ;;  %v1310_v14 = vstv %s2803_s17  ;;  %s2932_s17 = sld [smem:[#allocation5 + $0xc]] }
 0x2a8   : > { %v532_v19 = vpop.permute.xlu0 %531  ;;  %v572_v20 = vpop.permute.xlu1 %571  ;;  %v1200_v15 = vmul.f32 %v1198_v56, %v1142_v8  ;;  %v1311_v16 = vmul.f32 %v1310_v14, %v1141_v52  ;;  %v1312_v5 = vmul.f32 %v1310_v14, %v1142_v8 }
 0x2a9   : > { %534 = vst.msk [vmem:[#allocation2 + $0xc] sm:$0x1] %vm458_vm4, %v532_v19  ;;  %574 = vst.msk [vmem:[#allocation2 + $0x11] sm:$0x1] %vm458_vm4, %v572_v20  ;;  %v1354_v19 = vstv %s2808_s20  ;;  %v1228_v20 = vmul.f32 %v1226_v59, %v1142_v8  ;;  %v2885_v59 = vld [vmem:[#allocation3 + $0xd] sm:$0xff]  ;;  %s2943_s20 = sld [smem:[#allocation5 + $0x53]] }
 0x2ab   : > { %809 = vrot.lane.b32.xlu0 %v804_v21, %s2392_s19  ;;  %919 = vrot.lane.b32.xlu1 %v915_v22, %s2406_s14  ;;  %v1355_v21 = vmul.f32 %v1354_v19, %v1325_v17  ;;  %v1382_v22 = vstv %s2813_s21  ;;  %s2954_s21 = sld [smem:[#allocation5 + $0x10]] }
 0x2ac   : > { %v548_v24 = vpop.permute.xlu0 %547  ;;  %v580_v25 = vpop.permute.xlu1 %579 }
 0x2ad   : > { %550 = vst.msk [vmem:[#allocation2 + $0xe] sm:$0x1] %vm458_vm4, %v548_v24  ;;  %582 = vst.msk [vmem:[#allocation2 + $0x12] sm:$0x1] %vm458_vm4, %v580_v25  ;;  %v1383_v24 = vmul.f32 %v1382_v22, %v1325_v17  ;;  %v1410_v25 = vstv %s2818_s22  ;;  %s2965_s22 = sld [smem:[#allocation5 + $0x12]] }
 0x2af   : > { %837 = vrot.lane.b32.xlu0 %v832_v26, %s2403_s8  ;;  %947 = vrot.lane.b32.xlu1 %v943_v28, %s2407_s18  ;;  %v1284_v26 = vmul.f32 %v1282_v9, %v1142_v8  ;;  %v1411_v28 = vmul.f32 %v1410_v25, %v1325_v17  ;;  %v604_v8 = vstv %s2876_s6  ;;  %s3072_s6 = sld [smem:[#allocation5 + $0x24]] }
 0x2b0   : > { %v605_v14 = vmul.f32 %v604_v8, %v2725_v7 }
 0x2b3   : > { %865 = vrot.lane.b32.xlu0 %v860_v10, %s2404_s10  ;;  %991 = vrot.lane.b32.xlu1 %v987_v11, %s2392_s19  ;;  %v1439_v10 = vmul.f32 %v1438_v0, %v1325_v17  ;;  %v1326_v11 = vld [vmem:[#allocation3 + $0xc] sm:$0xff] }
 0x2b4   : > { %v2761_v35 = vld [vmem:[#allocation2 + $0x8] sm:$0xff]  ;;  %v1384_v40 = vmul.f32 %v1382_v22, %v1326_v11  ;;  %v1468_v52 = vmul.f32 %v1466_v6, %v1326_v11 }
 0x2b5   : > { %v594_v36 = vmul.f32 %v592_v63, %v2761_v35  ;;  %v1128_v63 = vmul.f32 %v1126_v49, %v958_v45  ;;  %v3106_v33 = vld [vmem:[#allocation2 + $0xa] sm:$0xff] }
 0x2b7   : > { %v2768_v4 = vadd.f32 %v600_v1, %v594_v36  ;;  %893 = vrot.lane.b32.xlu0 %v888_v38, %s2405_s12  ;;  %1019 = vrot.lane.b32.xlu1 %v1015_v39, %s2403_s8  ;;  %v1356_v1 = vmul.f32 %v1354_v19, %v1326_v11  ;;  %v1467_v36 = vmul.f32 %v1466_v6, %v1325_v17  ;;  %v1494_v38 = vstv %s2833_s26  ;;  %s3000_s26 = sld [smem:[#allocation5 + $0x18]] }
 0x2bb   : > { %921 = vrot.lane.b32.xlu0 %v916_v41, %s2406_s14  ;;  %1047 = vrot.lane.b32.xlu1 %v1043_v42, %s2404_s10  ;;  %v1495_v41 = vmul.f32 %v1494_v38, %v1325_v17  ;;  %v2849_v42 = vld [vmem:[#allocation3 + $0x5] sm:$0xff] }
 0x2bc   : > { %v1539_v45 = vmul.f32 %v1538_v43, %v2849_v42  ;;  %v1567_v49 = vmul.f32 %v1566_v46, %v2849_v42 }
 0x2bf   : > { %949 = vrot.lane.b32.xlu0 %v944_v37, %s2407_s18  ;;  %1075 = vrot.lane.b32.xlu1 %v1071_v44, %s2405_s12  ;;  %v1412_v44 = vmul.f32 %v1410_v25, %v1326_v11 }
 0x2c3   : > { %993 = vrot.lane.b32.xlu0 %v988_v47, %s2392_s19  ;;  %1103 = vrot.lane.b32.xlu1 %v1099_v48, %s2406_s14  ;;  %v1440_v48 = vmul.f32 %v1438_v0, %v1326_v11 }
 0x2c7   : > { %1021 = vrot.lane.b32.xlu0 %v1016_v50, %s2403_s8  ;;  %1131 = vrot.lane.b32.xlu1 %v1127_v51, %s2407_s18  ;;  %v1594_v50 = vstv %s2852_s29  ;;  %s3035_s29 = sld [smem:[#allocation5 + $0x1e]] }
 0x2c8   : > { %v1595_v53 = vmul.f32 %v1594_v50, %v2849_v42  ;;  %v1596_v19 = vmul.f32 %v1594_v50, %v2885_v59 }
 0x2cb   : > { %1049 = vrot.lane.b32.xlu0 %v1044_v54, %s2404_s10  ;;  %1175 = vrot.lane.b32.xlu1 %v1171_v55, %s2392_s19  ;;  %v1622_v54 = vstv %s2860_s30  ;;  %s3048_s30 = sld [smem:[#allocation5 + $0x20]] }
 0x2cf   : > { %1077 = vrot.lane.b32.xlu0 %v1072_v57, %s2405_s12  ;;  %1203 = vrot.lane.b32.xlu1 %v1199_v58, %s2403_s8  ;;  %v1496_v57 = vmul.f32 %v1494_v38, %v1326_v11  ;;  %v1623_v58 = vmul.f32 %v1622_v54, %v2849_v42  ;;  %v716_v11 = vstv %s2921_s13  ;;  %v606_v38 = vmul.f32 %v604_v8, %v2761_v35  ;;  %s3120_s13 = sld [smem:[#allocation5 + $0x2c]] }
 0x2d3   : > { %1105 = vrot.lane.b32.xlu0 %v1100_v60, %s2406_s14  ;;  %1231 = vrot.lane.b32.xlu1 %v1227_v61, %s2404_s10  ;;  %v1650_v60 = vstv %s2868_s5  ;;  %s3061_s5 = sld [smem:[#allocation5 + $0x22]] }
 0x2d7   : > { %1133 = vrot.lane.b32.xlu0 %v1128_v63, %s2407_s18  ;;  %1259 = vrot.lane.b32.xlu1 %v1255_v3, %s2405_s12  ;;  %v1540_v63 = vmul.f32 %v1538_v43, %v2885_v59  ;;  %v1651_v3 = vmul.f32 %v1650_v60, %v2849_v42 }
 0x2d9   : > { %v1028_v32 = vstv %s3061_s5  ;;  %s3256_s5 = sld [smem:[#allocation5 + $0x44]] }
 0x2db   : > { %1177 = vrot.lane.b32.xlu0 %v1172_v12, %s2392_s19  ;;  %1287 = vrot.lane.b32.xlu1 %v1283_v13, %s2406_s14  ;;  %v1568_v13 = vmul.f32 %v1566_v46, %v2885_v59  ;;  %v1678_v46 = vstv %s2943_s20  ;;  %s3144_s20 = sld [smem:[#allocation5 + $0x30]] }
 0x2dc   : > { %v1679_v50 = vmul.f32 %v1678_v46, %v2849_v42 }
 0x2df   : > { %1205 = vrot.lane.b32.xlu0 %v1200_v15, %s2403_s8  ;;  %1315 = vrot.lane.b32.xlu1 %v1311_v16, %s2407_s18  ;;  %v632_v15 = vstv %s2888_s7  ;;  %s3083_s7 = sld [smem:[#allocation5 + $0x26]] }
 0x2e3   : > { %1233 = vrot.lane.b32.xlu0 %v1228_v20, %s2404_s10  ;;  %1359 = vrot.lane.b32.xlu1 %v1355_v21, %s2392_s19  ;;  %v633_v20 = vmul.f32 %v632_v15, %v2725_v7  ;;  %v660_v21 = vstv %s2899_s9  ;;  %s3096_s9 = sld [smem:[#allocation5 + $0x28]] }
 0x2e4   : > { %v661_v25 = vmul.f32 %v660_v21, %v2725_v7 }
 0x2e5   : > { %v1084_v29 = vstv %s3083_s7  ;;  %s3277_s7 = sld [smem:[#allocation5 + $0xe]] }
 0x2e7   : > { %1261 = vrot.lane.b32.xlu0 %v1256_v23, %s2405_s12  ;;  %1387 = vrot.lane.b32.xlu1 %v1383_v24, %s2403_s8  ;;  %v1624_v24 = vmul.f32 %v1622_v54, %v2885_v59 }
 0x2e9   : > { %v1112_v30 = vstv %s3096_s9  ;;  %s3280_s9 = sld [smem:[#allocation5 + $0x48]] }
 0x2eb   : > { %1289 = vrot.lane.b32.xlu0 %v1284_v26, %s2406_s14  ;;  %1415 = vrot.lane.b32.xlu1 %v1411_v28, %s2404_s10  ;;  %v688_v26 = vstv %s2910_s11  ;;  %s3109_s11 = sld [smem:[#allocation5 + $0x59]] }
 0x2ec   : > { %v690_v42 = vmul.f32 %v688_v26, %v2761_v35 }
 0x2ef   : > { %1317 = vrot.lane.b32.xlu0 %v1312_v5, %s2407_s18  ;;  %1443 = vrot.lane.b32.xlu1 %v1439_v10, %s2405_s12  ;;  %v1652_v5 = vmul.f32 %v1650_v60, %v2885_v59  ;;  %v689_v10 = vmul.f32 %v688_v26, %v2725_v7  ;;  %v816_v60 = vstv %s2965_s22  ;;  %s3166_s22 = sld [smem:[#allocation5 + $0x34]] }
 0x2f3   : > { %1361 = vrot.lane.b32.xlu0 %v1356_v1, %s2392_s19  ;;  %1471 = vrot.lane.b32.xlu1 %v1467_v36, %s2406_s14  ;;  %v717_v36 = vmul.f32 %v716_v11, %v2725_v7 }
 0x2f5   : > { %v2847_v39 = vpop.permute.xlu1 %623 }
 0x2f7   : > { %1389 = vrot.lane.b32.xlu0 %v1384_v40, %s2403_s8  ;;  %1499 = vrot.lane.b32.xlu1 %v1495_v41, %s2407_s18  ;;  %v744_v40 = vstv %s2932_s17  ;;  %s3131_s17 = sld [smem:[#allocation5 + $0x2e]] }
 0x2f9   : > { %v2856_v37 = vpop.permute.xlu1 %651 }
 0x2fb   : > { %1417 = vrot.lane.b32.xlu0 %v1412_v44, %s2404_s10  ;;  %1543 = vrot.lane.b32.xlu1 %v1539_v45, %s2392_s19  ;;  %v745_v44 = vmul.f32 %v744_v40, %v2725_v7  ;;  %v634_v45 = vmul.f32 %v632_v15, %v2761_v35  ;;  %v788_v7 = vstv %s2954_s21  ;;  %s3155_s21 = sld [smem:[#allocation5 + $0x32]] }
 0x2fd   : > { %v2864_v47 = vpop.permute.xlu1 %679 }
 0x2ff   : > { %1445 = vrot.lane.b32.xlu0 %v1440_v48, %s2405_s12  ;;  %1571 = vrot.lane.b32.xlu1 %v1567_v49, %s2403_s8 }
 0x301   : > { %v2872_v51 = vpop.permute.xlu1 %707 }
 0x303   : > { %1473 = vrot.lane.b32.xlu0 %v1468_v52, %s2406_s14  ;;  %1599 = vrot.lane.b32.xlu1 %v1595_v53, %s2404_s10  ;;  %v662_v52 = vmul.f32 %v660_v21, %v2761_v35  ;;  %v2975_v53 = vld [vmem:[#allocation2 + $0x1] sm:$0xff]  ;;  %v746_v21 = vmul.f32 %v744_v40, %v2761_v35 }
 0x304   : > { %v817_v8 = vmul.f32 %v816_v60, %v2975_v53 }
 0x305   : > { %v2880_v55 = vpop.permute.xlu0 %625  ;;  %v2882_v56 = vpop.permute.xlu1 %735 }
 0x307   : > { %1501 = vrot.lane.b32.xlu0 %v1496_v57, %s2407_s18  ;;  %1627 = vrot.lane.b32.xlu1 %v1623_v58, %s2405_s12  ;;  %v789_v58 = vmul.f32 %v788_v7, %v2975_v53 }
 0x309   : > { %v2892_v61 = vpop.permute.xlu0 %653  ;;  %v2894_v62 = vpop.permute.xlu1 %763 }
 0x30b   : > { %1545 = vrot.lane.b32.xlu0 %v1540_v63, %s2392_s19  ;;  %1655 = vrot.lane.b32.xlu1 %v1651_v3, %s2406_s14 }
 0x30d   : > { %v2903_v9 = vpop.permute.xlu0 %681  ;;  %v2905_v12 = vpop.permute.xlu1 %807 }
 0x30f   : > { %1573 = vrot.lane.b32.xlu0 %v1568_v13, %s2403_s8  ;;  %609 = vrot.lane.b32.xlu1 %v605_v14, %s2392_s19  ;;  %v718_v13 = vmul.f32 %v716_v11, %v2761_v35  ;;  %v844_v14 = vstv %s2978_s24  ;;  %v3021_v11 = vld [vmem:[#allocation2 + $0x9] sm:$0xff]  ;;  %s3177_s24 = sld [smem:[#allocation5 + $0x36]] }
 0x310   : > { %v790_v40 = vmul.f32 %v788_v7, %v3021_v11  ;;  %v1722_v7 = vstv %s3024_s28  ;;  %s3225_s28 = sld [smem:[#allocation5 + $0x3e]] }
 0x311   : > { %v2914_v16 = vpop.permute.xlu0 %709  ;;  %v2916_v17 = vpop.permute.xlu1 %835  ;;  %v1724_v27 = vmul.f32 %v1722_v7, %v3093_v34 }
 0x313   : > { %1601 = vrot.lane.b32.xlu0 %v1596_v19, %s2404_s10  ;;  %637 = vrot.lane.b32.xlu1 %v633_v20, %s2403_s8  ;;  %v845_v20 = vmul.f32 %v844_v14, %v2975_v53 }
 0x315   : > { %v2925_v22 = vpop.permute.xlu0 %737  ;;  %v2927_v23 = vpop.permute.xlu1 %863 }
 0x317   : > { %1629 = vrot.lane.b32.xlu0 %v1624_v24, %s2405_s12  ;;  %665 = vrot.lane.b32.xlu1 %v661_v25, %s2404_s10  ;;  %v872_v24 = vstv %s2989_s25  ;;  %s3190_s25 = sld [smem:[#allocation5 + $0x5b]] }
 0x319   : > { %v2936_v28 = vpop.permute.xlu0 %765  ;;  %v2938_v0 = vpop.permute.xlu1 %891 }
 0x31b   : > { %1657 = vrot.lane.b32.xlu0 %v1652_v5, %s2406_s14  ;;  %693 = vrot.lane.b32.xlu1 %v689_v10, %s2405_s12  ;;  %v1680_v5 = vmul.f32 %v1678_v46, %v2885_v59  ;;  %v873_v10 = vmul.f32 %v872_v24, %v2975_v53 }
 0x31d   : > { %v2947_v6 = vpop.permute.xlu0 %809  ;;  %v2949_v1 = vpop.permute.xlu1 %919 }
 0x31f   : > { %721 = vrot.lane.b32.xlu1 %v717_v36, %s2406_s14  ;;  %611 = vrot.lane.b32.xlu0 %v606_v38, %s2392_s19  ;;  %v900_v36 = vstv %s3000_s26  ;;  %s3201_s26 = sld [smem:[#allocation5 + $0x3a]] }
 0x320   : > { %v901_v59 = vmul.f32 %v900_v36, %v2975_v53 }
 0x321   : > { %v2958_v41 = vpop.permute.xlu0 %837  ;;  %v2960_v43 = vpop.permute.xlu1 %947 }
 0x323   : > { %749 = vrot.lane.b32.xlu1 %v745_v44, %s2407_s18  ;;  %639 = vrot.lane.b32.xlu0 %v634_v45, %s2403_s8  ;;  %v928_v44 = vstv %s3011_s27  ;;  %s3212_s27 = sld [smem:[#allocation5 + $0x3c]] }
 0x325   : > { %v2969_v48 = vpop.permute.xlu0 %865  ;;  %v2971_v49 = vpop.permute.xlu1 %991 }
 0x327   : > { %1683 = vrot.lane.b32.xlu1 %v1679_v50, %s2407_s18  ;;  %667 = vrot.lane.b32.xlu0 %v662_v52, %s2404_s10  ;;  %v818_v50 = vmul.f32 %v816_v60, %v3021_v11  ;;  %v929_v52 = vmul.f32 %v928_v44, %v2975_v53 }
 0x329   : > { %v2982_v54 = vpop.permute.xlu0 %893  ;;  %v2984_v57 = vpop.permute.xlu1 %1019 }
 0x32b   : > { %793 = vrot.lane.b32.xlu1 %v789_v58, %s2392_s19  ;;  %695 = vrot.lane.b32.xlu0 %v690_v42, %s2405_s12  ;;  %v3045_v58 = vld [vmem:[#allocation3 + $0x6] sm:$0xff] }
 0x32c   : > { %v1723_v60 = vmul.f32 %v1722_v7, %v3045_v58 }
 0x32d   : > { %v2993_v63 = vpop.permute.xlu0 %921  ;;  %v2995_v3 = vpop.permute.xlu1 %1047 }
 0x32f   : > { %821 = vrot.lane.b32.xlu1 %v817_v8, %s2403_s8  ;;  %723 = vrot.lane.b32.xlu0 %v718_v13, %s2406_s14  ;;  %v846_v13 = vmul.f32 %v844_v14, %v3021_v11 }
 0x331   : > { %v3004_v15 = vpop.permute.xlu0 %949  ;;  %v3006_v19 = vpop.permute.xlu1 %1075 }
 0x333   : > { %849 = vrot.lane.b32.xlu1 %v845_v20, %s2404_s10  ;;  %751 = vrot.lane.b32.xlu0 %v746_v21, %s2407_s18  ;;  %v3058_v20 = vld [vmem:[#allocation2 + $0x2] sm:$0xff]  ;;  %v972_v21 = vstv %s3035_s29  ;;  %s3236_s29 = sld [smem:[#allocation5 + $0x40]] }
 0x334   : > { %v973_v14 = vmul.f32 %v972_v21, %v3058_v20  ;;  %v1029_v31 = vmul.f32 %v1028_v32, %v3058_v20  ;;  %v974_v2 = vmul.f32 %v972_v21, %v3106_v33  ;;  %v1085_v7 = vmul.f32 %v1084_v29, %v3058_v20 }
 0x335   : > { %v3015_v25 = vpop.permute.xlu0 %993  ;;  %v3017_v26 = vpop.permute.xlu1 %1103 }
 0x337   : > { %1685 = vrot.lane.b32.xlu0 %v1680_v5, %s2407_s18  ;;  %877 = vrot.lane.b32.xlu1 %v873_v10, %s2405_s12 }
 0x339   : > { %v3028_v35 = vpop.permute.xlu0 %1021  ;;  %v3030_v38 = vpop.permute.xlu1 %1131 }
 0x33b   : > { %795 = vrot.lane.b32.xlu0 %v790_v40, %s2392_s19  ;;  %905 = vrot.lane.b32.xlu1 %v901_v59, %s2406_s14  ;;  %v874_v40 = vmul.f32 %v872_v24, %v3021_v11  ;;  %v1000_v59 = vstv %s3048_s30  ;;  %s3246_s30 = sld [smem:[#allocation5 + $0x42]] }
 0x33d   : > { %v3039_v45 = vpop.permute.xlu0 %1049  ;;  %v3041_v46 = vpop.permute.xlu1 %1175 }
 0x33f   : > { %823 = vrot.lane.b32.xlu0 %v818_v50, %s2403_s8  ;;  %933 = vrot.lane.b32.xlu1 %v929_v52, %s2407_s18 }
 0x341   : > { %v3052_v42 = vpop.permute.xlu0 %1077  ;;  %v3054_v8 = vpop.permute.xlu1 %1203 }
 0x343   : > { %851 = vrot.lane.b32.xlu0 %v846_v13, %s2404_s10  ;;  %1727 = vrot.lane.b32.xlu1 %v1723_v60, %s2392_s19  ;;  %v902_v13 = vmul.f32 %v900_v36, %v3021_v11  ;;  %v1001_v60 = vmul.f32 %v1000_v59, %v3058_v20  ;;  %v1056_v36 = vstv %s3072_s6  ;;  %s3268_s6 = sld [smem:[#allocation5 + $0x5d]] }
 0x345   : > { %v3065_v5 = vpop.permute.xlu0 %1105  ;;  %v3067_v10 = vpop.permute.xlu1 %1231 }
 0x346   : > { %3796 = vst [vmem:[#allocation16_spill] sm:$0xff] %v3067_v10 }
 0x347   : > { %879 = vrot.lane.b32.xlu0 %v874_v40, %s2405_s12  ;;  %977 = vrot.lane.b32.xlu1 %v973_v14, %s2392_s19  ;;  %v930_v14 = vmul.f32 %v928_v44, %v3021_v11  ;;  %v1057_v44 = vmul.f32 %v1056_v36, %v3058_v20 }
 0x349   : > { %v3076_v50 = vpop.permute.xlu0 %1133  ;;  %v3078_v52 = vpop.permute.xlu1 %1259 }
 0x34a   : > { %3797 = vst [vmem:[#allocation17_spill] sm:$0xff] %v3076_v50  ;;  %3798 = vst [vmem:[#allocation18_spill] sm:$0xff] %v3078_v52  ;;  %v1424_v50 = vstv %s3236_s29  ;;  %s3398_s29 = sld [smem:[#allocation5 + $0x5a]] }
 0x34b   : > { %907 = vrot.lane.b32.xlu0 %v902_v13, %s2406_s14  ;;  %1005 = vrot.lane.b32.xlu1 %v1001_v60, %s2403_s8 }
 0x34d   : > { %v3087_v24 = vpop.permute.xlu0 %1177  ;;  %v3089_v40 = vpop.permute.xlu1 %1287 }
 0x34e   : > { %3799 = vst [vmem:[#allocation19_spill] sm:$0xff] %v3087_v24  ;;  %3800 = vst [vmem:[#allocation20_spill] sm:$0xff] %v3089_v40 }
 0x34f   : > { %935 = vrot.lane.b32.xlu0 %v930_v14, %s2407_s18  ;;  %1033 = vrot.lane.b32.xlu1 %v1029_v31, %s2404_s10 }
 0x351   : > { %v3100_v13 = vpop.permute.xlu0 %1205  ;;  %v3102_v60 = vpop.permute.xlu1 %1315 }
 0x352   : > { %3801 = vst [vmem:[#allocation21_spill] sm:$0xff] %v3100_v13  ;;  %3802 = vst [vmem:[#allocation22_spill] sm:$0xff] %v3102_v60 }
 0x353   : > { %1729 = vrot.lane.b32.xlu0 %v1724_v27, %s2392_s19  ;;  %1061 = vrot.lane.b32.xlu1 %v1057_v44, %s2405_s12  ;;  %v1002_v44 = vmul.f32 %v1000_v59, %v3106_v33  ;;  %v1156_v59 = vstv %s3120_s13  ;;  %s3291_s13 = sld [smem:[#allocation5 + $0x4a]] }
 0x355   : > { %v3113_v14 = vpop.permute.xlu0 %1233  ;;  %v3115_v31 = vpop.permute.xlu1 %1359 }
 0x356   : > { %3803 = vst [vmem:[#allocation23_spill] sm:$0xff] %v3113_v14  ;;  %3804 = vst [vmem:[#allocation24_spill] sm:$0xff] %v3115_v31  ;;  %v1113_v31 = vmul.f32 %v1112_v30, %v3058_v20  ;;  %v1750_v14 = vstv %s3109_s11  ;;  %s3284_s11 = sld [smem:[#allocation5 + $0xf]] }
 0x357   : > { %979 = vrot.lane.b32.xlu0 %v974_v2, %s2392_s19  ;;  %1089 = vrot.lane.b32.xlu1 %v1085_v7, %s2406_s14  ;;  %v1030_v7 = vmul.f32 %v1028_v32, %v3106_v33 }
 0x359   : > { %v3124_v13 = vpop.permute.xlu0 %1261  ;;  %v3126_v27 = vpop.permute.xlu1 %1387 }
 0x35a   : > { %3805 = vst [vmem:[#allocation25_spill] sm:$0xff] %v3124_v13  ;;  %3806 = vst [vmem:[#allocation26_spill] sm:$0xff] %v3126_v27  ;;  %v1751_v27 = vmul.f32 %v1750_v14, %v3045_v58  ;;  %v3141_v13 = vld [vmem:[#allocation2 + $0x3] sm:$0xff] }
 0x35b   : > { %1007 = vrot.lane.b32.xlu0 %v1002_v44, %s2403_s8  ;;  %1117 = vrot.lane.b32.xlu1 %v1113_v31, %s2407_s18  ;;  %v1157_v32 = vmul.f32 %v1156_v59, %v3141_v13 }
 0x35d   : > { %v3135_v21 = vpop.permute.xlu0 %1289  ;;  %v3137_v2 = vpop.permute.xlu1 %1415 }
 0x35e   : > { %3807 = vst [vmem:[#allocation27_spill] sm:$0xff] %v3135_v21  ;;  %3808 = vst [vmem:[#allocation28_spill] sm:$0xff] %v3137_v2  ;;  %v1058_v2 = vmul.f32 %v1056_v36, %v3106_v33  ;;  %v1184_v21 = vstv %s3131_s17  ;;  %s3303_s17 = sld [smem:[#allocation5 + $0x4c]] }
 0x35f   : > { %1035 = vrot.lane.b32.xlu0 %v1030_v7, %s2404_s10  ;;  %1755 = vrot.lane.b32.xlu1 %v1751_v27, %s2403_s8  ;;  %v1086_v27 = vmul.f32 %v1084_v29, %v3106_v33 }
 0x361   : > { %v3148_v44 = vpop.permute.xlu0 %1317  ;;  %v3150_v31 = vpop.permute.xlu1 %1443 }
 0x362   : > { %3809 = vst [vmem:[#allocation29_spill] sm:$0xff] %v3148_v44  ;;  %3810 = vst [vmem:[#allocation30_spill] sm:$0xff] %v3150_v31  ;;  %v1185_v31 = vmul.f32 %v1184_v21, %v3141_v13  ;;  %v1212_v44 = vstv %s3144_s20  ;;  %s3320_s20 = sld [smem:[#allocation5 + $0x4e]] }
 0x363   : > { %1063 = vrot.lane.b32.xlu0 %v1058_v2, %s2405_s12  ;;  %1161 = vrot.lane.b32.xlu1 %v1157_v32, %s2392_s19  ;;  %v1114_v32 = vmul.f32 %v1112_v30, %v3106_v33  ;;  %v1268_v30 = vstv %s3166_s22  ;;  %s3339_s22 = sld [smem:[#allocation5 + $0x52]] }
 0x365   : > { %v3159_v60 = vpop.permute.xlu0 %1361  ;;  %v3161_v7 = vpop.permute.xlu1 %1471 }
 0x366   : > { %3811 = vst [vmem:[#allocation31_spill] sm:$0xff] %v3159_v60  ;;  %3812 = vst [vmem:[#allocation32_spill] sm:$0xff] %v3161_v7  ;;  %v1213_v7 = vmul.f32 %v1212_v44, %v3141_v13  ;;  %v1240_v60 = vstv %s3155_s21  ;;  %s3328_s21 = sld [smem:[#allocation5 + $0x50]] }
 0x367   : > { %1091 = vrot.lane.b32.xlu0 %v1086_v27, %s2406_s14  ;;  %1189 = vrot.lane.b32.xlu1 %v1185_v31, %s2403_s8  ;;  %v1752_v31 = vmul.f32 %v1750_v14, %v3093_v34  ;;  %v1269_v14 = vmul.f32 %v1268_v30, %v3141_v13 }
 0x369   : > { %v3170_v36 = vpop.permute.xlu0 %1389  ;;  %v3172_v2 = vpop.permute.xlu1 %1499 }
 0x36a   : > { %3813 = vst [vmem:[#allocation33_spill] sm:$0xff] %v3170_v36  ;;  %3814 = vst [vmem:[#allocation34_spill] sm:$0xff] %v3172_v2  ;;  %v1241_v36 = vmul.f32 %v1240_v60, %v3141_v13  ;;  %v3187_v2 = vld [vmem:[#allocation2 + $0xb] sm:$0xff] }
 0x36b   : > { %1119 = vrot.lane.b32.xlu0 %v1114_v32, %s2407_s18  ;;  %1217 = vrot.lane.b32.xlu1 %v1213_v7, %s2404_s10 }
 0x36d   : > { %v3181_v29 = vpop.permute.xlu0 %1417  ;;  %v3183_v27 = vpop.permute.xlu1 %1543 }
 0x36e   : > { %3815 = vst [vmem:[#allocation35_spill] sm:$0xff] %v3181_v29  ;;  %3816 = vst [vmem:[#allocation36_spill] sm:$0xff] %v3183_v27  ;;  %v1158_v27 = vmul.f32 %v1156_v59, %v3187_v2  ;;  %v1296_v29 = vstv %s3177_s24  ;;  %s3352_s24 = sld [smem:[#allocation5 + $0x5f]] }
 0x36f   : > { %1757 = vrot.lane.b32.xlu0 %v1752_v31, %s2403_s8  ;;  %1245 = vrot.lane.b32.xlu1 %v1241_v36, %s2405_s12  ;;  %v1186_v36 = vmul.f32 %v1184_v21, %v3187_v2  ;;  %v1340_v21 = vstv %s3201_s26  ;;  %v1298_v52 = vmul.f32 %v1296_v29, %v3187_v2  ;;  %s3372_s26 = sld [smem:[#allocation5 + $0x56]] }
 0x371   : > { %v3194_v32 = vpop.permute.xlu0 %1445  ;;  %v3196_v7 = vpop.permute.xlu1 %1571 }
 0x372   : > { %3817 = vst [vmem:[#allocation37_spill] sm:$0xff] %v3194_v32  ;;  %3818 = vst [vmem:[#allocation38_spill] sm:$0xff] %v3196_v7  ;;  %v1297_v7 = vmul.f32 %v1296_v29, %v3141_v13  ;;  %v1778_v32 = vstv %s3190_s25  ;;  %s3367_s25 = sld [smem:[#allocation5 + $0x1c]] }
 0x373   : > { %1163 = vrot.lane.b32.xlu0 %v1158_v27, %s2392_s19  ;;  %1273 = vrot.lane.b32.xlu1 %v1269_v14, %s2406_s14  ;;  %v1214_v14 = vmul.f32 %v1212_v44, %v3187_v2 }
 0x375   : > { %v3205_v40 = vpop.permute.xlu0 %1473  ;;  %v3207_v31 = vpop.permute.xlu1 %1599 }
 0x376   : > { %3819 = vst [vmem:[#allocation39_spill] sm:$0xff] %v3205_v40  ;;  %3820 = vst [vmem:[#allocation40_spill] sm:$0xff] %v3207_v31  ;;  %v1779_v31 = vmul.f32 %v1778_v32, %v3045_v58  ;;  %v3222_v40 = vld [vmem:[#allocation2 + $0x4] sm:$0xff] }
 0x377   : > { %1191 = vrot.lane.b32.xlu0 %v1186_v36, %s2403_s8  ;;  %1301 = vrot.lane.b32.xlu1 %v1297_v7, %s2407_s18  ;;  %v1341_v44 = vmul.f32 %v1340_v21, %v3222_v40  ;;  %v1425_v29 = vmul.f32 %v1424_v50, %v3222_v40 }
 0x379   : > { %v3216_v59 = vpop.permute.xlu0 %1501  ;;  %v3218_v27 = vpop.permute.xlu1 %1627 }
 0x37a   : > { %3821 = vst [vmem:[#allocation41_spill] sm:$0xff] %v3216_v59  ;;  %3822 = vst [vmem:[#allocation42_spill] sm:$0xff] %v3218_v27  ;;  %v1242_v27 = vmul.f32 %v1240_v60, %v3187_v2  ;;  %v1368_v59 = vstv %s3212_s27  ;;  %v1396_v60 = vstv %s3225_s28  ;;  %s3376_s27 = sld [smem:[#allocation5 + $0x1d]] }
 0x37b   : > { %1219 = vrot.lane.b32.xlu0 %v1214_v14, %s2404_s10  ;;  %1783 = vrot.lane.b32.xlu1 %v1779_v31, %s2404_s10  ;;  %v1270_v31 = vmul.f32 %v1268_v30, %v3187_v2  ;;  %v1397_v30 = vmul.f32 %v1396_v60, %v3222_v40  ;;  %s3384_s28 = sld [smem:[#allocation5 + $0x58]] }
 0x37d   : > { %v3229_v36 = vpop.permute.xlu0 %1545  ;;  %v3231_v7 = vpop.permute.xlu1 %1655 }
 0x37e   : > { %3823 = vst [vmem:[#allocation43_spill] sm:$0xff] %v3229_v36  ;;  %3824 = vst [vmem:[#allocation44_spill] sm:$0xff] %v3231_v7  ;;  %v1369_v36 = vmul.f32 %v1368_v59, %v3222_v40 }
 0x37f   : > { %1247 = vrot.lane.b32.xlu0 %v1242_v27, %s2405_s12  ;;  %1345 = vrot.lane.b32.xlu1 %v1341_v44, %s2392_s19 }
 0x381   : > { %v3240_v24 = vpop.permute.xlu0 %1573  ;;  %v610_v14 = vpop.permute.xlu1 %609 }
 0x382   : > { %3825 = vst [vmem:[#allocation45_spill] sm:$0xff] %v3240_v24  ;;  %v615_v7 = vadd.f32 %v610_v14, %v2736_v18 }
 0x383   : > { %1275 = vrot.lane.b32.xlu0 %v1270_v31, %s2406_s14  ;;  %1373 = vrot.lane.b32.xlu1 %v1369_v36, %s2403_s8  ;;  %v3265_v31 = vld [vmem:[#allocation2 + $0xc] sm:$0xff] }
 0x384   : > { %v629_v27 = vadd.f32 %v2847_v39, %v615_v7  ;;  %v1780_v7 = vmul.f32 %v1778_v32, %v3093_v34 }
 0x385   : > { %v3251_v44 = vpop.permute.xlu0 %1601  ;;  %v638_v24 = vpop.permute.xlu1 %637 }
 0x386   : > { %v643_v10 = vadd.f32 %v638_v24, %v629_v27  ;;  %v1452_v24 = vstv %s3246_s30  ;;  %v1342_v27 = vmul.f32 %v1340_v21, %v3265_v31  ;;  %s3417_s30 = sld [smem:[#allocation5 + $0x5c]] }
 0x387   : > { %1303 = vrot.lane.b32.xlu0 %v1298_v52, %s2407_s18  ;;  %1401 = vrot.lane.b32.xlu1 %v1397_v30, %s2404_s10  ;;  %v1453_v32 = vmul.f32 %v1452_v24, %v3222_v40 }
 0x388   : > { %v657_v18 = vadd.f32 %v2856_v37, %v643_v10 }
 0x389   : > { %v3261_v36 = vpop.permute.xlu0 %1629  ;;  %v666_v39 = vpop.permute.xlu1 %665 }
 0x38a   : > { %3826 = vst [vmem:[#allocation46_spill] sm:$0xff] %v3261_v36  ;;  %v671_v14 = vadd.f32 %v666_v39, %v657_v18  ;;  %v1480_v18 = vstv %s3256_s5  ;;  %v1552_v36 = vstv %s3291_s13  ;;  %s3427_s5 = sld [smem:[#allocation5 + $0x5e]]  ;;  %s2409_s13 = smov 16  }
 0x38b   : > { %1785 = vrot.lane.b32.xlu0 %v1780_v7, %s2404_s10  ;;  %1429 = vrot.lane.b32.xlu1 %v1425_v29, %s2405_s12  ;;  %v1370_v7 = vmul.f32 %v1368_v59, %v3265_v31  ;;  %v1481_v29 = vmul.f32 %v1480_v18, %v3222_v40 }
 0x38c   : > { %v685_v37 = vadd.f32 %v2864_v47, %v671_v14 }
 0x38d   : > { %v3273_v10 = vpop.permute.xlu0 %1657  ;;  %v694_v52 = vpop.permute.xlu1 %693 }
 0x38e   : > { %3827 = vst [vmem:[#allocation47_spill] sm:$0xff] %v3273_v10  ;;  %v699_v30 = vadd.f32 %v694_v52, %v685_v37  ;;  %v1806_v52 = vstv %s3268_s6  ;;  %v3300_v10 = vld [vmem:[#allocation2 + $0x5] sm:$0xff]  ;;  %s3438_s6 = sld [smem:[#allocation5 + $0x60]] }
 0x38f   : > { %1347 = vrot.lane.b32.xlu0 %v1342_v27, %s2392_s19  ;;  %1457 = vrot.lane.b32.xlu1 %v1453_v32, %s2406_s14  ;;  %v776_v32 = vstv %s3277_s7  ;;  %s3449_s7 = sld [smem:[#allocation5 + $0x61]] }
 0x390   : > { %v713_v47 = vadd.f32 %v2872_v51, %v699_v30 }
 0x391   : > { %v612_v39 = vpop.permute.xlu0 %611  ;;  %v722_v21 = vpop.permute.xlu1 %721 }
 0x392   : > { %v616_v14 = vadd.f32 %v612_v39, %v2768_v4  ;;  %v727_v37 = vadd.f32 %v722_v21, %v713_v47  ;;  %v1398_v4 = vmul.f32 %v1396_v60, %v3265_v31  ;;  %v1807_v47 = vmul.f32 %v1806_v52, %v3045_v58 }
 0x393   : > { %1375 = vrot.lane.b32.xlu0 %v1370_v7, %s2403_s8  ;;  %1485 = vrot.lane.b32.xlu1 %v1481_v29, %s2407_s18  ;;  %v1524_v7 = vstv %s3280_s9  ;;  %v777_v60 = vmul.f32 %v776_v32, %v2975_v53  ;;  %s3462_s9 = sld [smem:[#allocation5 + $0x2a]] }
 0x394   : > { %v630_v51 = vadd.f32 %v2880_v55, %v616_v14  ;;  %v741_v27 = vadd.f32 %v2882_v56, %v727_v37  ;;  %v782_v55 = vstv %s3284_s11  ;;  %s3469_s11 = sld [smem:[#allocation5 + $0x2b]] }
 0x395   : > { %v640_v59 = vpop.permute.xlu0 %639  ;;  %v750_v30 = vpop.permute.xlu1 %749 }
 0x396   : > { %v644_v39 = vadd.f32 %v640_v59, %v630_v51  ;;  %v755_v21 = vadd.f32 %v750_v30, %v741_v27  ;;  %v1426_v51 = vmul.f32 %v1424_v50, %v3265_v31  ;;  %v1525_v27 = vmul.f32 %v1524_v7, %v3300_v10  ;;  %v2352_v59 = vld [vmem:[#allocation3 + $0x1] sm:$0xff] }
 0x397   : > { %1403 = vrot.lane.b32.xlu0 %v1398_v4, %s2404_s10  ;;  %1811 = vrot.lane.b32.xlu1 %v1807_v47, %s2405_s12  ;;  %v783_v30 = vmul.f32 %v2352_v59, %v782_v55 }
 0x398   : > { %v658_v56 = vadd.f32 %v2892_v61, %v644_v39  ;;  %v769_v29 = vadd.f32 %v2894_v62, %v755_v21  ;;  %v1454_v39 = vmul.f32 %v1452_v24, %v3265_v31  ;;  %v1553_v21 = vmul.f32 %v1552_v36, %v3300_v10 }
 0x399   : > { %v668_v14 = vpop.permute.xlu0 %667  ;;  %v3313_v37 = vpop.permute.xlu1 %1683  ;;  %v1482_v24 = vmul.f32 %v1480_v18, %v3265_v31 }
 0x39a   : > { %v779_v4 = vadd.f32 %v777_v60, %v769_v29  ;;  %v672_v47 = vadd.f32 %v668_v14, %v658_v56  ;;  %v1580_v29 = vstv %s3303_s17  ;;  %s2410_s17 = smov 32  }
 0x39b   : > { %1431 = vrot.lane.b32.xlu0 %v1426_v51, %s2405_s12  ;;  %1529 = vrot.lane.b32.xlu1 %v1525_v27, %s2392_s19  ;;  %v1581_v59 = vmul.f32 %v1580_v29, %v3300_v10 }
 0x39c   : > { %v785_v61 = vadd.f32 %v783_v30, %v779_v4  ;;  %v686_v62 = vadd.f32 %v2903_v9, %v672_v47  ;;  %v1608_v47 = vstv %s3320_s20  ;;  %s2411_s20 = smov 64  }
 0x39d   : > { %v696_v53 = vpop.permute.xlu0 %695  ;;  %v794_v50 = vpop.permute.xlu1 %793 }
 0x39e   : > { %v700_v60 = vadd.f32 %v696_v53, %v686_v62  ;;  %v799_v56 = vadd.f32 %v794_v50, %v785_v61  ;;  %v1808_v62 = vmul.f32 %v1806_v52, %v3093_v34  ;;  %v1609_v53 = vmul.f32 %v1608_v47, %v3300_v10 }
 0x39f   : > { %1459 = vrot.lane.b32.xlu0 %v1454_v39, %s2406_s14  ;;  %1557 = vrot.lane.b32.xlu1 %v1553_v21, %s2403_s8  ;;  %v3349_v21 = vld [vmem:[#allocation2 + $0xd] sm:$0xff] }
 0x3a0   : > { %v714_v14 = vadd.f32 %v2914_v16, %v700_v60  ;;  %v813_v9 = vadd.f32 %v2905_v12, %v799_v56  ;;  %v1636_v60 = vstv %s3328_s21  ;;  %s2412_s21 = smov 48  }
 0x3a1   : > { %v724_v51 = vpop.permute.xlu0 %723  ;;  %v822_v27 = vpop.permute.xlu1 %821 }
 0x3a2   : > { %v728_v30 = vadd.f32 %v724_v51, %v714_v14  ;;  %v827_v4 = vadd.f32 %v822_v27, %v813_v9  ;;  %v1526_v9 = vmul.f32 %v1524_v7, %v3349_v21  ;;  %v1637_v51 = vmul.f32 %v1636_v60, %v3300_v10  ;;  %v2353_v27 = vld [vmem:[#allocation3 + $0x9] sm:$0xff] }
 0x3a3   : > { %1487 = vrot.lane.b32.xlu0 %v1482_v24, %s2407_s18  ;;  %1585 = vrot.lane.b32.xlu1 %v1581_v59, %s2404_s10  ;;  %v784_v24 = vmul.f32 %v2353_v27, %v782_v55  ;;  %v1554_v55 = vmul.f32 %v1552_v36, %v3349_v21 }
 0x3a4   : > { %v742_v12 = vadd.f32 %v2925_v22, %v728_v30  ;;  %v841_v16 = vadd.f32 %v2916_v17, %v827_v4  ;;  %v778_v22 = vmul.f32 %v776_v32, %v3021_v11  ;;  %v1664_v11 = vstv %s3339_s22  ;;  %s2413_s22 = smov 80  }
 0x3a5   : > { %v752_v61 = vpop.permute.xlu0 %751  ;;  %v850_v18 = vpop.permute.xlu1 %849  ;;  %v1665_v4 = vmul.f32 %v1664_v11, %v3300_v10 }
 0x3a6   : > { %v756_v50 = vadd.f32 %v752_v61, %v742_v12  ;;  %v855_v39 = vadd.f32 %v850_v18, %v841_v16  ;;  %v1834_v61 = vstv %s3352_s24  ;;  %s2414_s24 = smov 96  }
 0x3a7   : > { %1813 = vrot.lane.b32.xlu0 %v1808_v62, %s2405_s12  ;;  %1613 = vrot.lane.b32.xlu1 %v1609_v53, %s2405_s12  ;;  %v960_v62 = vstv %s3367_s25  ;;  %s2415_s25 = smov 112  }
 0x3a8   : > { %v770_v17 = vadd.f32 %v2936_v28, %v756_v50  ;;  %v869_v52 = vadd.f32 %v2927_v23, %v855_v39  ;;  %v1582_v50 = vmul.f32 %v1580_v29, %v3349_v21  ;;  %v1835_v39 = vmul.f32 %v1834_v61, %v3045_v58 }
 0x3a9   : > { %v3361_v56 = vpop.permute.xlu0 %1685  ;;  %v878_v14 = vpop.permute.xlu1 %877  ;;  %v961_v29 = vmul.f32 %v960_v62, %v3058_v20 }
 0x3aa   : > { %v780_v28 = vadd.f32 %v778_v22, %v770_v17  ;;  %v883_v59 = vadd.f32 %v878_v14, %v869_v52  ;;  %v3395_v52 = vld [vmem:[#allocation2 + $0x6] sm:$0xff]  ;;  %v1708_v14 = vstv %s3372_s26 }
 0x3ab   : > { %1531 = vrot.lane.b32.xlu0 %v1526_v9, %s2392_s19  ;;  %1641 = vrot.lane.b32.xlu1 %v1637_v51, %s2406_s14 }
 0x3ac   : > { %v786_v23 = vadd.f32 %v784_v24, %v780_v28  ;;  %v897_v32 = vadd.f32 %v2938_v0, %v883_v59  ;;  %v1610_v24 = vmul.f32 %v1608_v47, %v3349_v21  ;;  %v1709_v28 = vmul.f32 %v1708_v14, %v3395_v52  ;;  %v2354_v59 = vld [vmem:[#allocation3 + $0x2] sm:$0xff] }
 0x3ad   : > { %v796_v7 = vpop.permute.xlu0 %795  ;;  %v906_v30 = vpop.permute.xlu1 %905 }
 0x3ae   : > { %v800_v12 = vadd.f32 %v796_v7, %v786_v23  ;;  %v911_v16 = vadd.f32 %v906_v30, %v897_v32  ;;  %v1736_v7 = vstv %s3384_s28  ;;  %s211_s28 = scalar_lea.vmem %s3774_s4, %s2281_s23 }
 0x3af   : > { %1559 = vrot.lane.b32.xlu0 %v1554_v55, %s2403_s8  ;;  %1669 = vrot.lane.b32.xlu1 %v1665_v4, %s2407_s18  ;;  %v1638_v55 = vmul.f32 %v1636_v60, %v3349_v21  ;;  %v1737_v4 = vmul.f32 %v1736_v7, %v3395_v52  ;;  %v1666_v60 = vmul.f32 %v1664_v11, %v3349_v21 }
 0x3b0   : > { %v814_v0 = vadd.f32 %v2947_v6, %v800_v12  ;;  %v925_v18 = vadd.f32 %v2949_v1, %v911_v16  ;;  %v966_v6 = vstv %s3376_s27  ;;  %v1836_v11 = vmul.f32 %v1834_v61, %v3093_v34 }
 0x3b1   : > { %v824_v36 = vpop.permute.xlu0 %823  ;;  %v934_v53 = vpop.permute.xlu1 %933  ;;  %v967_v23 = vmul.f32 %v2354_v59, %v966_v6  ;;  %v1820_v59 = vstv %s3427_s5 }
 0x3b2   : > { %v828_v17 = vadd.f32 %v824_v36, %v814_v0  ;;  %v939_v22 = vadd.f32 %v934_v53, %v925_v18  ;;  %v1764_v0 = vstv %s3398_s29 }
 0x3b3   : > { %1587 = vrot.lane.b32.xlu0 %v1582_v50, %s2404_s10  ;;  %1839 = vrot.lane.b32.xlu1 %v1835_v39, %s2406_s14  ;;  %v1765_v50 = vmul.f32 %v1764_v0, %v3395_v52 }
 0x3b4   : > { %v842_v1 = vadd.f32 %v2958_v41, %v828_v17  ;;  %v953_v9 = vadd.f32 %v2960_v43, %v939_v22  ;;  %v1792_v22 = vstv %s3417_s30 }
 0x3b5   : > { %v852_v51 = vpop.permute.xlu0 %851  ;;  %v3408_v27 = vpop.permute.xlu1 %1727 }
 0x3b6   : > { %v963_v32 = vadd.f32 %v961_v29, %v953_v9  ;;  %v856_v41 = vadd.f32 %v852_v51, %v842_v1  ;;  %v1793_v9 = vmul.f32 %v1792_v22, %v3395_v52 }
 0x3b7   : > { %1615 = vrot.lane.b32.xlu0 %v1610_v24, %s2405_s12  ;;  %1713 = vrot.lane.b32.xlu1 %v1709_v28, %s2392_s19  ;;  %v3446_v28 = vld [vmem:[#allocation2 + $0xe] sm:$0xff] }
 0x3b8   : > { %v969_v43 = vadd.f32 %v967_v23, %v963_v32  ;;  %v870_v20 = vadd.f32 %v2969_v48, %v856_v41  ;;  %v1710_v41 = vmul.f32 %v1708_v14, %v3446_v28 }
 0x3b9   : > { %v880_v47 = vpop.permute.xlu0 %879  ;;  %v978_v30 = vpop.permute.xlu1 %977 }
 0x3ba   : > { %v884_v12 = vadd.f32 %v880_v47, %v870_v20  ;;  %v983_v16 = vadd.f32 %v978_v30, %v969_v43  ;;  %v1821_v43 = vmul.f32 %v1820_v59, %v3395_v52  ;;  %v2355_v20 = vld [vmem:[#allocation3 + $0xa] sm:$0xff] }
 0x3bb   : > { %1643 = vrot.lane.b32.xlu0 %v1638_v55, %s2406_s14  ;;  %1741 = vrot.lane.b32.xlu1 %v1737_v4, %s2403_s8  ;;  %v968_v47 = vmul.f32 %v2355_v20, %v966_v6  ;;  %v1848_v55 = vstv %s3438_s6  ;;  %v1738_v4 = vmul.f32 %v1736_v7, %v3446_v28 }
 0x3bc   : > { %v898_v18 = vadd.f32 %v2982_v54, %v884_v12  ;;  %v997_v48 = vadd.f32 %v2971_v49, %v983_v16  ;;  %v1849_v12 = vmul.f32 %v1848_v55, %v3395_v52  ;;  %v1850_v20 = vmul.f32 %v1848_v55, %v3446_v28 }
 0x3bd   : > { %v908_v36 = vpop.permute.xlu0 %907  ;;  %v1006_v53 = vpop.permute.xlu1 %1005 }
 0x3be   : > { %v912_v39 = vadd.f32 %v908_v36, %v898_v18  ;;  %v1011_v17 = vadd.f32 %v1006_v53, %v997_v48  ;;  %v1862_v18 = vstv %s3449_s7 }
 0x3bf   : > { %1671 = vrot.lane.b32.xlu0 %v1666_v60, %s2407_s18  ;;  %1769 = vrot.lane.b32.xlu1 %v1765_v50, %s2404_s10  ;;  %v1766_v60 = vmul.f32 %v1764_v0, %v3446_v28  ;;  %v1863_v7 = vmul.f32 %v1862_v18, %v3045_v58  ;;  %v1144_v50 = vstv %s3462_s9  ;;  %v1794_v0 = vmul.f32 %v1792_v22, %v3446_v28 }
 0x3c0   : > { %v926_v49 = vadd.f32 %v2993_v63, %v912_v39  ;;  %v1025_v54 = vadd.f32 %v2984_v57, %v1011_v17  ;;  %v962_v63 = vmul.f32 %v960_v62, %v3106_v33 }
 0x3c1   : > { %v936_v1 = vpop.permute.xlu0 %935  ;;  %v1034_v29 = vpop.permute.xlu1 %1033 }
 0x3c2   : > { %v940_v51 = vadd.f32 %v936_v1, %v926_v49  ;;  %v1039_v24 = vadd.f32 %v1034_v29, %v1025_v54  ;;  %v1150_v49 = vstv %s3469_s11 }
 0x3c3   : > { %1841 = vrot.lane.b32.xlu0 %v1836_v11, %s2406_s14  ;;  %1797 = vrot.lane.b32.xlu1 %v1793_v9, %s2405_s12  ;;  %v2356_v9 = vld [vmem:[#allocation3 + $0x3] sm:$0xff] }
 0x3c4   : > { %v954_v57 = vadd.f32 %v3004_v15, %v940_v51  ;;  %v1053_v61 = vadd.f32 %v2995_v3, %v1039_v24  ;;  %v1151_v51 = vmul.f32 %v2356_v9, %v1150_v49 }
 0x3c5   : > { %v3458_v23 = vpop.permute.xlu0 %1729  ;;  %v1062_v32 = vpop.permute.xlu1 %1061 }
 0x3c6   : > { %v964_v30 = vadd.f32 %v962_v63, %v954_v57  ;;  %v1067_v15 = vadd.f32 %v1062_v32, %v1053_v61 }
 0x3c7   : > { %1715 = vrot.lane.b32.xlu0 %v1710_v41, %s2392_s19  ;;  %1825 = vrot.lane.b32.xlu1 %v1821_v43, %s2406_s14  ;;  %s3508_s19 = sld [smem:[#allocation5 + $0x38]] }
 0x3c8   : > { %v970_v33 = vadd.f32 %v968_v47, %v964_v30  ;;  %v1081_v3 = vadd.f32 %v3006_v19, %v1067_v15 }
 0x3c9   : > { %v980_v62 = vpop.permute.xlu0 %979  ;;  %v1090_v14 = vpop.permute.xlu1 %1089 }
 0x3ca   : > { %v984_v6 = vadd.f32 %v980_v62, %v970_v33  ;;  %v1095_v16 = vadd.f32 %v1090_v14, %v1081_v3  ;;  %v1864_v3 = vmul.f32 %v1862_v18, %v3093_v34 }
 0x3cb   : > { %1743 = vrot.lane.b32.xlu0 %v1738_v4, %s2403_s8  ;;  %1853 = vrot.lane.b32.xlu1 %v1849_v12, %s2407_s18  ;;  %v3829_v4 = vld [vmem:[#allocation16_spill] sm:$0xff]  ;;  %v1146_v12 = vmul.f32 %v1144_v50, %v3187_v2  ;;  %s3510_s8 = sld [smem:[#allocation5 + $0x39]] }
 0x3cc   : > { %v998_v48 = vadd.f32 %v3015_v25, %v984_v6  ;;  %v1109_v36 = vadd.f32 %v3017_v26, %v1095_v16  ;;  %v1145_v26 = vmul.f32 %v1144_v50, %v3141_v13  ;;  %v3831_v50 = vld [vmem:[#allocation19_spill] sm:$0xff] }
 0x3cd   : > { %v1008_v19 = vpop.permute.xlu0 %1007  ;;  %v1118_v53 = vpop.permute.xlu1 %1117 }
 0x3ce   : > { %v1012_v39 = vadd.f32 %v1008_v19, %v998_v48  ;;  %v1123_v17 = vadd.f32 %v1118_v53, %v1109_v36  ;;  %v3830_v36 = vld [vmem:[#allocation18_spill] sm:$0xff] }
 0x3cf   : > { %1771 = vrot.lane.b32.xlu0 %v1766_v60, %s2404_s10  ;;  %1867 = vrot.lane.b32.xlu1 %v1863_v7, %s2407_s18  ;;  %s3532_s10 = sld [smem:[#allocation5 + $0x46]] }
 0x3d0   : > { %v1137_v54 = vadd.f32 %v3030_v38, %v1123_v17  ;;  %v1026_v25 = vadd.f32 %v3028_v35, %v1012_v39  ;;  %v1822_v35 = vmul.f32 %v1820_v59, %v3446_v28  ;;  %v3832_v17 = vld [vmem:[#allocation20_spill] sm:$0xff] }
 0x3d1   : > { %v1036_v1 = vpop.permute.xlu0 %1035  ;;  %v3488_v29 = vpop.permute.xlu1 %1755 }
 0x3d2   : > { %v1040_v58 = vadd.f32 %v1036_v1, %v1026_v25  ;;  %v1147_v11 = vadd.f32 %v1145_v26, %v1137_v54  ;;  %v1328_v1 = vstv %s3508_s19 }
 0x3d3   : > { %1799 = vrot.lane.b32.xlu0 %v1794_v0, %s2405_s12  ;;  %s3534_s12 = sld [smem:[#allocation5 + $0x47]] }
 0x3d4   : > { %v1054_v24 = vadd.f32 %v3039_v45, %v1040_v58  ;;  %v1153_v57 = vadd.f32 %v1151_v51, %v1147_v11  ;;  %v1334_v58 = vstv %s3510_s8  ;;  %v3833_v11 = vld [vmem:[#allocation22_spill] sm:$0xff]  ;;  %v3834_v51 = vld [vmem:[#allocation21_spill] sm:$0xff] }
 0x3d5   : > { %v1064_v63 = vpop.permute.xlu0 %1063  ;;  %v1162_v38 = vpop.permute.xlu1 %1161 }
 0x3d6   : > { %v1068_v61 = vadd.f32 %v1064_v63, %v1054_v24  ;;  %v1167_v13 = vadd.f32 %v1162_v38, %v1153_v57  ;;  %v1329_v57 = vmul.f32 %v1328_v1, %v3222_v40 }
 0x3d7   : > { %1827 = vrot.lane.b32.xlu0 %v1822_v35, %s2406_s14  ;;  %s3556_s14 = sld [smem:[#allocation5 + $0x54]] }
 0x3d8   : > { %v1082_v32 = vadd.f32 %v3052_v42, %v1068_v61  ;;  %v1181_v22 = vadd.f32 %v3041_v46, %v1167_v13  ;;  %v3828_v46 = vld [vmem:[#allocation17_spill] sm:$0xff] }
 0x3d9   : > { %v1092_v41 = vpop.permute.xlu0 %1091  ;;  %v1190_v43 = vpop.permute.xlu1 %1189  ;;  %v2358_v13 = vld [vmem:[#allocation3 + $0x4] sm:$0xff] }
 0x3da   : > { %v1096_v47 = vadd.f32 %v1092_v41, %v1082_v32  ;;  %v1195_v30 = vadd.f32 %v1190_v43, %v1181_v22  ;;  %v1335_v32 = vmul.f32 %v2358_v13, %v1334_v58  ;;  %v3835_v22 = vld [vmem:[#allocation23_spill] sm:$0xff]  ;;  %v1518_v13 = vstv %s3534_s12 }
 0x3db   : > { %1855 = vrot.lane.b32.xlu0 %v1850_v20, %s2407_s18 }
 0x3dc   : > { %v1110_v45 = vadd.f32 %v3065_v5, %v1096_v47  ;;  %v1209_v59 = vadd.f32 %v3054_v8, %v1195_v30  ;;  %v2357_v5 = vld [vmem:[#allocation3 + $0xb] sm:$0xff] }
 0x3dd   : > { %v1120_v15 = vpop.permute.xlu0 %1119  ;;  %v1218_v33 = vpop.permute.xlu1 %1217  ;;  %v1152_v48 = vmul.f32 %v2357_v5, %v1150_v49 }
 0x3de   : > { %v1124_v62 = vadd.f32 %v1120_v15, %v1110_v45  ;;  %v1223_v42 = vadd.f32 %v1218_v33, %v1209_v59  ;;  %v3836_v59 = vld [vmem:[#allocation25_spill] sm:$0xff]  ;;  %v3837_v33 = vld [vmem:[#allocation24_spill] sm:$0xff] }
 0x3df   : > { %1869 = vrot.lane.b32.xlu0 %v1864_v3, %s2407_s18  ;;  %s3558_s18 = sld [smem:[#allocation5 + $0x55]] }
 0x3e0   : > { %v1138_v14 = vadd.f32 %v3828_v46, %v1124_v62  ;;  %v1237_v55 = vadd.f32 %v3829_v4, %v1223_v42 }
 0x3e1   : > { %v3506_v6 = vpop.permute.xlu0 %1757  ;;  %v1246_v16 = vpop.permute.xlu1 %1245 }
 0x3e2   : > { %v1251_v8 = vadd.f32 %v1246_v16, %v1237_v55  ;;  %v1148_v34 = vadd.f32 %v1146_v12, %v1138_v14  ;;  %v3838_v14 = vld [vmem:[#allocation27_spill] sm:$0xff]  ;;  %v3839_v55 = vld [vmem:[#allocation26_spill] sm:$0xff] }
 0x3e4   : > { %v1154_v18 = vadd.f32 %v1152_v48, %v1148_v34  ;;  %v1265_v19 = vadd.f32 %v3830_v36, %v1251_v8  ;;  %v3840_v34 = vld [vmem:[#allocation29_spill] sm:$0xff]  ;;  %v3841_v36 = vld [vmem:[#allocation28_spill] sm:$0xff] }
 0x3e5   : > { %v1164_v53 = vpop.permute.xlu0 %1163  ;;  %v1274_v60 = vpop.permute.xlu1 %1273 }
 0x3e6   : > { %v1168_v7 = vadd.f32 %v1164_v53, %v1154_v18  ;;  %v1279_v2 = vadd.f32 %v1274_v60, %v1265_v19  ;;  %v1330_v53 = vmul.f32 %v1328_v1, %v3265_v31  ;;  %v3843_v1 = vld [vmem:[#allocation31_spill] sm:$0xff] }
 0x3e8   : > { %v1182_v39 = vadd.f32 %v3831_v50, %v1168_v7  ;;  %v1293_v54 = vadd.f32 %v3832_v17, %v1279_v2  ;;  %v2359_v50 = vld [vmem:[#allocation3 + $0xc] sm:$0xff] }
 0x3e9   : > { %v1192_v25 = vpop.permute.xlu0 %1191  ;;  %v1302_v26 = vpop.permute.xlu1 %1301 }
 0x3ea   : > { %v1196_v0 = vadd.f32 %v1192_v25, %v1182_v39  ;;  %v1307_v49 = vadd.f32 %v1302_v26, %v1293_v54  ;;  %v1336_v39 = vmul.f32 %v2359_v50, %v1334_v58  ;;  %v3842_v25 = vld [vmem:[#allocation30_spill] sm:$0xff] }
 0x3ec   : > { %v1321_v9 = vadd.f32 %v3833_v11, %v1307_v49  ;;  %v1210_v24 = vadd.f32 %v3834_v51, %v1196_v0  ;;  %v3844_v51 = vld [vmem:[#allocation32_spill] sm:$0xff] }
 0x3ed   : > { %v1220_v63 = vpop.permute.xlu0 %1219  ;;  %v3520_v38 = vpop.permute.xlu1 %1783 }
 0x3ee   : > { %v1224_v35 = vadd.f32 %v1220_v63, %v1210_v24  ;;  %v1331_v61 = vadd.f32 %v1329_v57, %v1321_v9 }
 0x3f0   : > { %v1238_v41 = vadd.f32 %v3835_v22, %v1224_v35  ;;  %v1337_v43 = vadd.f32 %v1335_v32, %v1331_v61  ;;  %v1512_v35 = vstv %s3532_s10  ;;  %v3845_v32 = vld [vmem:[#allocation34_spill] sm:$0xff] }
 0x3f1   : > { %v1248_v20 = vpop.permute.xlu0 %1247  ;;  %v1346_v47 = vpop.permute.xlu1 %1345 }
 0x3f2   : > { %v1252_v30 = vadd.f32 %v1248_v20, %v1238_v41  ;;  %v1351_v45 = vadd.f32 %v1346_v47, %v1337_v43  ;;  %v3846_v41 = vld [vmem:[#allocation33_spill] sm:$0xff]  ;;  %v1513_v20 = vmul.f32 %v1512_v35, %v3300_v10 }
 0x3f4   : > { %v1266_v15 = vadd.f32 %v3836_v59, %v1252_v30  ;;  %v1365_v3 = vadd.f32 %v3837_v33, %v1351_v45 }
 0x3f5   : > { %v1276_v62 = vpop.permute.xlu0 %1275  ;;  %v1374_v40 = vpop.permute.xlu1 %1373 }
 0x3f6   : > { %v1280_v42 = vadd.f32 %v1276_v62, %v1266_v15  ;;  %v1379_v46 = vadd.f32 %v1374_v40, %v1365_v3  ;;  %v2360_v15 = vld [vmem:[#allocation3 + $0x5] sm:$0xff]  ;;  %v3847_v3 = vld [vmem:[#allocation35_spill] sm:$0xff] }
 0x3f7   : > { %v1519_v33 = vmul.f32 %v2360_v15, %v1518_v13  ;;  %v1702_v15 = vstv %s3558_s18 }
 0x3f8   : > { %v1294_v4 = vadd.f32 %v3838_v14, %v1280_v42  ;;  %v1393_v12 = vadd.f32 %v3839_v55, %v1379_v46  ;;  %v3848_v55 = vld [vmem:[#allocation37_spill] sm:$0xff] }
 0x3f9   : > { %v1304_v16 = vpop.permute.xlu0 %1303  ;;  %v1402_v8 = vpop.permute.xlu1 %1401 }
 0x3fa   : > { %v1308_v5 = vadd.f32 %v1304_v16, %v1294_v4  ;;  %v1407_v48 = vadd.f32 %v1402_v8, %v1393_v12  ;;  %v3849_v16 = vld [vmem:[#allocation36_spill] sm:$0xff] }
 0x3fc   : > { %v1322_v18 = vadd.f32 %v3840_v34, %v1308_v5  ;;  %v1421_v19 = vadd.f32 %v3841_v36, %v1407_v48 }
 0x3fd   : > { %v3530_v60 = vpop.permute.xlu0 %1785  ;;  %v1430_v7 = vpop.permute.xlu1 %1429 }
 0x3fe   : > { %v1435_v2 = vadd.f32 %v1430_v7, %v1421_v19  ;;  %v1332_v17 = vadd.f32 %v1330_v53, %v1322_v18  ;;  %v3850_v18 = vld [vmem:[#allocation39_spill] sm:$0xff]  ;;  %v3851_v19 = vld [vmem:[#allocation38_spill] sm:$0xff] }
 0x400   : > { %v1338_v54 = vadd.f32 %v1336_v39, %v1332_v17  ;;  %v1449_v26 = vadd.f32 %v3842_v25, %v1435_v2  ;;  %v3852_v17 = vld [vmem:[#allocation41_spill] sm:$0xff]  ;;  %v3853_v25 = vld [vmem:[#allocation40_spill] sm:$0xff] }
 0x401   : > { %v1348_v0 = vpop.permute.xlu0 %1347  ;;  %v1458_v49 = vpop.permute.xlu1 %1457 }
 0x402   : > { %v1352_v11 = vadd.f32 %v1348_v0, %v1338_v54  ;;  %v1463_v31 = vadd.f32 %v1458_v49, %v1449_v26  ;;  %v1514_v0 = vmul.f32 %v1512_v35, %v3349_v21  ;;  %v3855_v35 = vld [vmem:[#allocation43_spill] sm:$0xff] }
 0x404   : > { %v1366_v9 = vadd.f32 %v3843_v1, %v1352_v11  ;;  %v1477_v24 = vadd.f32 %v3844_v51, %v1463_v31  ;;  %v2361_v1 = vld [vmem:[#allocation3 + $0xd] sm:$0xff] }
 0x405   : > { %v1376_v57 = vpop.permute.xlu0 %1375  ;;  %v1486_v63 = vpop.permute.xlu1 %1485 }
 0x406   : > { %v1380_v61 = vadd.f32 %v1376_v57, %v1366_v9  ;;  %v1491_v58 = vadd.f32 %v1486_v63, %v1477_v24  ;;  %v1520_v9 = vmul.f32 %v2361_v1, %v1518_v13  ;;  %v3854_v57 = vld [vmem:[#allocation42_spill] sm:$0xff] }
 0x408   : > { %v1505_v22 = vadd.f32 %v3845_v32, %v1491_v58  ;;  %v1394_v43 = vadd.f32 %v3846_v41, %v1380_v61  ;;  %v3856_v41 = vld [vmem:[#allocation44_spill] sm:$0xff] }
 0x409   : > { %v1404_v47 = vpop.permute.xlu0 %1403  ;;  %v3544_v30 = vpop.permute.xlu1 %1811 }
 0x40a   : > { %v1408_v45 = vadd.f32 %v1404_v47, %v1394_v43  ;;  %v1515_v59 = vadd.f32 %v1513_v20, %v1505_v22 }
 0x40c   : > { %v1422_v62 = vadd.f32 %v3847_v3, %v1408_v45  ;;  %v1521_v40 = vadd.f32 %v1519_v33, %v1515_v59  ;;  %v1696_v45 = vstv %s3556_s14  ;;  %v3857_v3 = vld [vmem:[#allocation45_spill] sm:$0xff] }
 0x40d   : > { %v1432_v42 = vpop.permute.xlu0 %1431  ;;  %v1530_v46 = vpop.permute.xlu1 %1529 }
 0x40e   : > { %v1436_v14 = vadd.f32 %v1432_v42, %v1422_v62  ;;  %v1535_v4 = vadd.f32 %v1530_v46, %v1521_v40  ;;  %v1697_v40 = vmul.f32 %v1696_v45, %v3395_v52 }
 0x410   : > { %v1450_v12 = vadd.f32 %v3848_v55, %v1436_v14  ;;  %v1549_v8 = vadd.f32 %v3849_v16, %v1535_v4  ;;  %v2362_v55 = vld [vmem:[#allocation3 + $0x6] sm:$0xff] }
 0x411   : > { %v1460_v5 = vpop.permute.xlu0 %1459  ;;  %v1558_v10 = vpop.permute.xlu1 %1557 }
 0x412   : > { %v1464_v48 = vadd.f32 %v1460_v5, %v1450_v12  ;;  %v1563_v34 = vadd.f32 %v1558_v10, %v1549_v8  ;;  %v1703_v12 = vmul.f32 %v2362_v55, %v1702_v15 }
 0x414   : > { %v1478_v36 = vadd.f32 %v3850_v18, %v1464_v48  ;;  %v1577_v53 = vadd.f32 %v3851_v19, %v1563_v34  ;;  %v3858_v18 = vld [vmem:[#allocation46_spill] sm:$0xff] }
 0x415   : > { %v1488_v7 = vpop.permute.xlu0 %1487  ;;  %v1586_v2 = vpop.permute.xlu1 %1585 }
 0x416   : > { %v1492_v50 = vadd.f32 %v1488_v7, %v1478_v36  ;;  %v1591_v39 = vadd.f32 %v1586_v2, %v1577_v53  ;;  %v3859_v2 = vld [vmem:[#allocation47_spill] sm:$0xff] }
 0x418   : > { %v1506_v54 = vadd.f32 %v3852_v17, %v1492_v50  ;;  %v1605_v26 = vadd.f32 %v3853_v25, %v1591_v39 }
 0x419   : > { %v3554_v49 = vpop.permute.xlu0 %1813  ;;  %v1614_v11 = vpop.permute.xlu1 %1613 }
 0x41a   : > { %v1619_v31 = vadd.f32 %v1614_v11, %v1605_v26  ;;  %v1516_v51 = vadd.f32 %v1514_v0, %v1506_v54  ;;  %v1698_v11 = vmul.f32 %v1696_v45, %v3446_v28 }
 0x41c   : > { %v1522_v24 = vadd.f32 %v1520_v9, %v1516_v51  ;;  %v1633_v63 = vadd.f32 %v3854_v57, %v1619_v31  ;;  %v2363_v9 = vld [vmem:[#allocation3 + $0xe] sm:$0xff] }
 0x41d   : > { %v1532_v61 = vpop.permute.xlu0 %1531  ;;  %v1642_v58 = vpop.permute.xlu1 %1641  ;;  %v1704_v51 = vmul.f32 %v2363_v9, %v1702_v15 }
 0x41e   : > { %v1536_v32 = vadd.f32 %v1532_v61, %v1522_v24  ;;  %v1647_v21 = vadd.f32 %v1642_v58, %v1633_v63 }
 0x420   : > { %v1550_v22 = vadd.f32 %v3855_v35, %v1536_v32  ;;  %v1661_v43 = vadd.f32 %v3856_v41, %v1647_v21 }
 0x421   : > { %v1560_v20 = vpop.permute.xlu0 %1559  ;;  %v1670_v47 = vpop.permute.xlu1 %1669 }
 0x422   : > { %v1564_v59 = vadd.f32 %v1560_v20, %v1550_v22  ;;  %v1675_v13 = vadd.f32 %v1670_v47, %v1661_v43 }
 0x424   : > { %v1689_v33 = vadd.f32 %v3313_v37, %v1675_v13  ;;  %v1578_v62 = vadd.f32 %v3857_v3, %v1564_v59 }
 0x425   : > { %v1588_v42 = vpop.permute.xlu0 %1587  ;;  %v1840_v46 = vpop.permute.xlu1 %1839 }
 0x426   : > { %v1592_v14 = vadd.f32 %v1588_v42, %v1578_v62  ;;  %v1699_v4 = vadd.f32 %v1697_v40, %v1689_v33 }
 0x428   : > { %v1606_v16 = vadd.f32 %v3251_v44, %v1592_v14  ;;  %v1705_v8 = vadd.f32 %v1703_v12, %v1699_v4  ;;  %v1887_v12 = vlaneseq }
 0x429   : > { %v1616_v5 = vpop.permute.xlu0 %1615  ;;  %v1714_v10 = vpop.permute.xlu1 %1713 }
 0x42a   : > { %v1620_v48 = vadd.f32 %v1616_v5, %v1606_v16  ;;  %v1719_v34 = vadd.f32 %v1714_v10, %v1705_v8  ;;  %v2408_v16 = vmov 1966171168   ;;  %v3582_v5 = vshrl.u32 %v1887_v12, 7 }
 0x42b   : > { %vm3586_vm5 = vcmp.lt.s32.totalorder %v1887_v12, 16  ;;  %vm3595_vm6 = vcmp.ge.s32.totalorder %v1887_v12, 16  ;;  %vm3600_vm7 = vcmp.lt.s32.totalorder %v1887_v12, 32  ;;  %vm3609_vm9 = vcmp.ge.s32.totalorder %v1887_v12, 32 }
 0x42c   : > { %v1634_v36 = vadd.f32 %v3858_v18, %v1620_v48  ;;  %v1733_v37 = vadd.f32 %v3408_v27, %v1719_v34  ;;  %vm1920_vm8 = vmand %vm3595_vm6, %vm3600_vm7  ;;  %vm3614_vm10 = vcmp.lt.s32.totalorder %v1887_v12, 48  ;;  %vm3633_vm12 = vcmp.ge.s32.totalorder %v1887_v12, 48 }
 0x42d   : > { %v1644_v19 = vpop.permute.xlu0 %1643  ;;  %v1742_v53 = vpop.permute.xlu1 %1741  ;;  %vm3783_vm11 = vmand %vm3609_vm9, %vm3614_vm10  ;;  %vm3638_vm13 = vcmp.lt.s32.totalorder %v1887_v12, 64  ;;  %vm3643_vm14 = vcmp.ge.s32.totalorder %v1887_v12, 64  ;;  %vm3648_vm15 = vcmp.lt.s32.totalorder %v1887_v12, 80  ;;  %vm3661_vm2 = vcmp.ge.s32.totalorder %v1887_v12, 80 }
 0x42e   : > { %v1648_v52 = vadd.f32 %v1644_v19, %v1634_v36  ;;  %v1747_v7 = vadd.f32 %v1742_v53, %v1733_v37  ;;  %vm3785_vm0 = vmand %vm3633_vm12, %vm3638_vm13  ;;  %vm3666_vm3 = vcmp.lt.s32.totalorder %v1887_v12, 96 }
 0x42f   : > { %vm3784_vm1 = vmand %vm3643_vm14, %vm3648_vm15 }
 0x430   : > { %v1662_v50 = vadd.f32 %v3859_v2, %v1648_v52  ;;  %v1761_v39 = vadd.f32 %v3488_v29, %v1747_v7  ;;  %vm1973_vm4 = vmand %vm3661_vm2, %vm3666_vm3 }
 0x431   : > { %v1672_v17 = vpop.permute.xlu0 %1671  ;;  %v1770_v54 = vpop.permute.xlu1 %1769  ;;  %vm3890_vm6 = vmand %vm3609_vm9, %vm3614_vm10 }
 0x432   : > { %v1676_v44 = vadd.f32 %v1672_v17, %v1662_v50  ;;  %v1775_v25 = vadd.f32 %v1770_v54, %v1761_v39 }
 0x434   : > { %v1690_v26 = vadd.f32 %v3361_v56, %v1676_v44  ;;  %v1789_v0 = vadd.f32 %v3520_v38, %v1775_v25 }
 0x435   : > { %v1842_v31 = vpop.permute.xlu0 %1841  ;;  %v1798_v27 = vpop.permute.xlu1 %1797 }
 0x436   : > { %v1803_v1 = vadd.f32 %v1798_v27, %v1789_v0  ;;  %v1700_v24 = vadd.f32 %v1698_v11, %v1690_v26 }
 0x438   : > { %v1706_v57 = vadd.f32 %v1704_v51, %v1700_v24  ;;  %v1817_v63 = vadd.f32 %v3544_v30, %v1803_v1 }
 0x439   : > { %v1716_v29 = vpop.permute.xlu0 %1715  ;;  %v1826_v61 = vpop.permute.xlu1 %1825 }
 0x43a   : > { %v1720_v58 = vadd.f32 %v1716_v29, %v1706_v57  ;;  %v1831_v32 = vadd.f32 %v1826_v61, %v1817_v63 }
 0x43c   : > { %v1734_v21 = vadd.f32 %v3458_v23, %v1720_v58  ;;  %v1845_v56 = vadd.f32 %v1840_v46, %v1831_v32 }
 0x43d   : > { %v1744_v35 = vpop.permute.xlu0 %1743  ;;  %v1854_v38 = vpop.permute.xlu1 %1853 }
 0x43e   : > { %v1748_v22 = vadd.f32 %v1744_v35, %v1734_v21  ;;  %v1859_v28 = vadd.f32 %v1854_v38, %v1845_v56 }
 0x440   : > { %v1762_v41 = vadd.f32 %v3506_v6, %v1748_v22 }
 0x441   : > { %v1772_v43 = vpop.permute.xlu0 %1771  ;;  %v1868_v20 = vpop.permute.xlu1 %1867 }
 0x442   : > { %v1776_v47 = vadd.f32 %v1772_v43, %v1762_v41  ;;  %v1873_v45 = vadd.f32 %v1868_v20, %v1859_v28 }
 0x444   : > { %v2277_v59 = vmul.f32 -1.442695, %v1873_v45  ;;  %v1790_v30 = vadd.f32 %v3530_v60, %v1776_v47  ;;  %v1894_v60 = vunpack.c.l.s4 %v2408_v16  ;;  %v3876_v47 = vmov 0 }
 0x445   : > { %v1800_v13 = vpop.permute.xlu0 %1799  ;;  %v3877_v47 = vsel %vm3648_vm15, 4294967295, %v3876_v47  ;;  %vm3714_vm15 = vcmp.lt.s32.totalorder %v1887_v12, 128  ;;  %v2074_v16 = vsub.s32 0, %v3582_v5 }
 0x446   : > { %2344 = vpow2.f32 %v2277_v59  ;;  %v1804_v15 = vadd.f32 %v1800_v13, %v1790_v30  ;;  %v1895_v8 = vunpack.c.0.s8 %v1894_v60  ;;  %vm3892_vm9 = vnez %v3877_v47 }
 0x447   : > { %vm3893_vm10 = vmand %vm3643_vm14, %vm3892_vm9  ;;  %v2078_v60 = vsub.s32 1, %v3582_v5 }
 0x448   : > { %v1818_v33 = vadd.f32 %v3554_v49, %v1804_v15  ;;  %v1898_v49 = vsub.s32 %v1895_v8, %v3582_v5 }
 0x449   : > { %v1828_v23 = vpop.permute.xlu0 %1827 }
 0x44a   : > { %v1832_v3 = vadd.f32 %v1828_v23, %v1818_v33 }
 0x44c   : > { %v1846_v62 = vadd.f32 %v1842_v31, %v1832_v3 }
 0x44d   : > { %v1856_v40 = vpop.permute.xlu0 %1855 }
 0x44e   : > { %v1860_v42 = vadd.f32 %v1856_v40, %v1846_v62 }
 0x451   : > { %v1870_v46 = vpop.permute.xlu0 %1869 }
 0x452   : > { %v1874_v14 = vadd.f32 %v1870_v46, %v1860_v42 }
 0x453   : > { %v2345_v6 = vpop.eup %2344 }
 0x454   : > { %v1881_v4 = vadd.f32 1.0, %v2345_v6  ;;  %v2278_v55 = vmul.f32 -1.442695, %v1874_v14 }
 0x456   : > { %2346 = vrcp.f32 %v1881_v4 }
 0x457   : > { %2348 = vpow2.f32 %v2278_v55 }
 0x463   : > { %v2347_v48 = vpop.eup %2346 }
 0x464   : > { %v2349_v34 = vpop.eup %2348  ;;  %v1899_v18 = vrot.slane %v2347_v48, %v1898_v49  ;;  %1891 = vst.msk [vmem:[#allocation4] sm:$0x1] %vm3586_vm5, %v2347_v48  ;;  %v1938_v52 = vcombine.high %v2347_v48, %v2347_v48  ;;  %v3894_v48 = vld [vmem:[#allocation10_spill] sm:$0xff] }
 0x465   : > { %v1882_v36 = vadd.f32 1.0, %v2349_v34 }
 0x466   : > { %v1900_v37 = vcombine.high %v1899_v18, %v1899_v18  ;;  %v1907_v53 = vrot.slane %v1899_v18, %v1898_v49  ;;  %v1945_v2 = vrot.slane %v1938_v52, %v1898_v49  ;;  %v3895_v18 = vld [vmem:[#allocation15_spill] sm:$0xff] }
 0x467   : > { %2350 = vrcp.f32 %v1882_v36 }
 0x468   : > { %v1914_v19 = vrot.slane %v1900_v37, %v1898_v49  ;;  %v1922_v7 = vcombine.high %v1907_v53, %v1907_v53  ;;  %v1952_v50 = vrot.slane %v1945_v2, %v1898_v49  ;;  %v1960_v54 = vcombine.high %v1945_v2, %v1945_v2  ;;  %v3896_v37 = vld [vmem:[#allocation9_spill] sm:$0xff] }
 0x469   : > { %v3897_v53 = vld [vmem:[#allocation13_spill] sm:$0xff] }
 0x46a   : > { %1915 = vrot.lane.b32.xlu1 %v1914_v19, %s2409_s13  ;;  %v1930_v17 = vcombine.high %v1914_v19, %v1914_v19  ;;  %v1967_v26 = vrot.slane %v1960_v54, %v1898_v49  ;;  %v1975_v27 = vcombine.high %v1952_v50, %v1952_v50  ;;  %v3901_v54 = vld [vmem:[#allocation12_spill] sm:$0xff] }
 0x46c   : > { %v1983_v51 = vcombine.high %v1967_v26, %v1967_v26 }
 0x46e   : > { %1923 = vrot.lane.b32.xlu1 %v1922_v7, %s2410_s17  ;;  %v3898_v7 = vld [vmem:[#allocation8_spill] sm:$0xff] }
 0x472   : > { %1953 = vrot.lane.b32.xlu1 %v1952_v50, %s2411_s20  ;;  %v3899_v50 = vld [vmem:[#allocation14_spill] sm:$0xff] }
 0x474   : > { %v2351_v39 = vpop.eup %2350 }
 0x475   : > { %v1999_v44 = vrot.slane %v2351_v39, %v1898_v49  ;;  %1991 = vst.msk [vmem:[#allocation4 + $0x1] sm:$0x1] %vm3586_vm5, %v2351_v39  ;;  %v2029_v31 = vcombine.high %v2351_v39, %v2351_v39  ;;  %vm3685_vm5 = vcmp.ge.s32.totalorder %v1887_v12, 96  ;;  %v3900_v39 = vld [vmem:[#allocation11_spill] sm:$0xff] }
 0x476   : > { %1931 = vrot.lane.b32.xlu1 %v1930_v17, %s2412_s21 }
 0x477   : > { %v2000_v25 = vcombine.high %v1999_v44, %v1999_v44  ;;  %v2007_v11 = vrot.slane %v1999_v44, %v1898_v49  ;;  %v2036_v9 = vrot.slane %v2029_v31, %v1898_v49 }
 0x479   : > { %v2014_v0 = vrot.slane %v2000_v25, %v1898_v49  ;;  %v2019_v1 = vcombine.high %v2007_v11, %v2007_v11  ;;  %v2043_v24 = vrot.slane %v2036_v9, %v1898_v49  ;;  %v2048_v63 = vcombine.high %v2036_v9, %v2036_v9 }
 0x47a   : > { %1968 = vrot.lane.b32.xlu1 %v1967_v26, %s2413_s22 }
 0x47b   : > { %2015 = vrot.lane.b32.xlu0 %v2014_v0, %s2409_s13  ;;  %v2024_v57 = vcombine.high %v2014_v0, %v2014_v0  ;;  %v2055_v29 = vrot.slane %v2048_v63, %v1898_v49  ;;  %v2060_v61 = vcombine.high %v2043_v24, %v2043_v24 }
 0x47d   : > { %v2065_v58 = vcombine.high %v2055_v29, %v2055_v29 }
 0x47e   : > { %1976 = vrot.lane.b32.xlu1 %v1975_v27, %s2414_s24 }
 0x47f   : > { %2020 = vrot.lane.b32.xlu0 %v2019_v1, %s2410_s17 }
 0x482   : > { %1984 = vrot.lane.b32.xlu1 %v1983_v51, %s2415_s25 }
 0x483   : > { %2044 = vrot.lane.b32.xlu0 %v2043_v24, %s2411_s20 }
 0x487   : > { %2025 = vrot.lane.b32.xlu0 %v2024_v57, %s2412_s21 }
 0x48b   : > { %2056 = vrot.lane.b32.xlu0 %v2055_v29, %s2413_s22 }
 0x48f   : > { %2061 = vrot.lane.b32.xlu0 %v2060_v61, %s2414_s24 }
 0x493   : > { %2066 = vrot.lane.b32.xlu0 %v2065_v58, %s2415_s25 }
 0x4dc   : > { %v1916_v38 = vpop.permute.xlu1 %1915 }
 0x4dd   : > { %1921 = vst.msk [vmem:[#allocation4] sm:$0x1] %vm1920_vm8, %v1916_v38 }
 0x4e0   : > { %v1924_v22 = vpop.permute.xlu1 %1923 }
 0x4e1   : > { %1929 = vst.msk [vmem:[#allocation4] sm:$0x1] %vm3783_vm11, %v1924_v22  ;;  %vm3690_vm11 = vcmp.lt.s32.totalorder %v1887_v12, 112 }
 0x4e4   : > { %v1954_v43 = vpop.permute.xlu1 %1953 }
 0x4e8   : > { %v1932_v30 = vpop.permute.xlu1 %1931 }
 0x4e9   : > { %1937 = vst.msk [vmem:[#allocation4] sm:$0x1] %vm3785_vm0, %v1932_v30  ;;  %vm3709_vm0 = vcmp.ge.s32.totalorder %v1887_v12, 112 }
 0x4ea   : > { %1959 = vst.msk [vmem:[#allocation4] sm:$0x1] %vm3784_vm1, %v1954_v43  ;;  %vm1981_vm1 = vmand %vm3685_vm5, %vm3690_vm11 }
 0x4eb   : > { %vm1989_vm7 = vmand %vm3709_vm0, %vm3714_vm15 }
 0x4ec   : > { %v1969_v33 = vpop.permute.xlu1 %1968 }
 0x4ed   : > { %v2016_v23 = vpop.permute.xlu0 %2015  ;;  %1974 = vst.msk [vmem:[#allocation4] sm:$0x1] %vm1973_vm4, %v1969_v33 }
 0x4ee   : > { %2018 = vst.msk [vmem:[#allocation4 + $0x1] sm:$0x1] %vm1920_vm8, %v2016_v23  ;;  %vm3891_vm8 = vmand %vm3633_vm12, %vm3638_vm13 }
 0x4f0   : > { %v1977_v40 = vpop.permute.xlu1 %1976 }
 0x4f1   : > { %v2021_v42 = vpop.permute.xlu0 %2020  ;;  %1982 = vst.msk [vmem:[#allocation4] sm:$0x1] %vm1981_vm1, %v1977_v40 }
 0x4f2   : > { %2023 = vst.msk [vmem:[#allocation4 + $0x1] sm:$0x1] %vm3890_vm6, %v2021_v42 }
 0x4f4   : > { %v1985_v46 = vpop.permute.xlu1 %1984 }
 0x4f5   : > { %v2045_v14 = vpop.permute.xlu0 %2044  ;;  %1990 = vst.msk [vmem:[#allocation4] sm:$0x1] %vm1989_vm7, %v1985_v46 }
 0x4f9   : > { %v2026_v6 = vpop.permute.xlu0 %2025 }
 0x4fa   : > { %2028 = vst.msk [vmem:[#allocation4 + $0x1] sm:$0x1] %vm3891_vm8, %v2026_v6 }
 0x4fb   : > { %2047 = vst.msk [vmem:[#allocation4 + $0x1] sm:$0x1] %vm3893_vm10, %v2045_v14 }
 0x4fd   : > { %v2057_v4 = vpop.permute.xlu0 %2056 }
 0x4fe   : > { %2059 = vst.msk [vmem:[#allocation4 + $0x1] sm:$0x1] %vm1973_vm4, %v2057_v4 }
 0x501   : > { %v2062_v55 = vpop.permute.xlu0 %2061 }
 0x502   : > { %2064 = vst.msk [vmem:[#allocation4 + $0x1] sm:$0x1] %vm1981_vm1, %v2062_v55 }
 0x505   : > { %v2067_v12 = vpop.permute.xlu0 %2066 }
 0x506   : > { %2069 = vst.msk [vmem:[#allocation4 + $0x1] sm:$0x1] %vm1989_vm7, %v2067_v12 }
 0x50d   : > { %v2070_v8 = vld [vmem:[#allocation4] sm:$0x3] }
 0x50e   : > { %v2075_v49 = vrot.slane %v2070_v8, %v2074_v16  ;;  %v2079_v10 = vrot.slane %v2070_v8, %v2078_v60 }
 0x510   : > { %v2082_v34 = vmul.f32 %v2075_v49, %v3894_v48  ;;  %v2083_v36 = vmul.f32 %v2079_v10, %v3895_v18  ;;  %v2084_v19 = vmul.f32 %v2075_v49, %v3896_v37  ;;  %v2085_v52 = vmul.f32 %v2079_v10, %v3897_v53 }
 0x511   : > { %v2086_v2 = vmul.f32 %v2075_v49, %v3898_v7  ;;  %v2087_v5 = vmul.f32 %v2079_v10, %v3899_v50  ;;  %v2088_v17 = vmul.f32 %v2075_v49, %v3900_v39  ;;  %v2089_v44 = vmul.f32 %v2079_v10, %v3901_v54 }
 0x512   : > { %2090 = vst [vmem:[%s211_s28] sm:$0xff] %v2082_v34  ;;  %2091 = vst [vmem:[%s211_s28 + $0x8] sm:$0xff] %v2083_v36 }
 0x513   : > { %2092 = vst [vmem:[%s211_s28 + $0x10] sm:$0xff] %v2084_v19  ;;  %2093 = vst [vmem:[%s211_s28 + $0x18] sm:$0xff] %v2085_v52 }
 0x514   : > { %2094 = vst [vmem:[%s211_s28 + $0x20] sm:$0xff] %v2086_v2  ;;  %2095 = vst [vmem:[%s211_s28 + $0x28] sm:$0xff] %v2087_v5 }
 0x515   : > { %2096 = vst [vmem:[%s211_s28 + $0x30] sm:$0xff] %v2088_v17  ;;  %2097 = vst [vmem:[%s211_s28 + $0x38] sm:$0xff] %v2089_v44 }
 0x516 PF: > { %s15_s15 = sadd.s32 1, %s2389_s15  }
 0x517   : > { %p12_p1 = scmp.ge.s32.totalorder %s15_s15, 4  }
 0x519   :  { %14 = sbr.rel (!%p12_p1) target bundleno = 1 (0x1), region = 71 }
 0x51e   :  { %2119 = vsyncpa [#allocation6], 1 }
 0x51f   :  { %2121 = vsyncpa [#allocation6 + $0x1], 1 }

</bundles_post_ra>
